<compile_context>
chip_gen: v7x
topology: tpu7x:2x2x1
jax: 0.10.0
libtpu: 0.0.40
codegen_flags: <defaults>
</compile_context>

<pallas_src>
import functools
import numpy as np
import jax
import jax.numpy as jnp
from jax.experimental import pallas as pl
from jax.experimental.pallas import tpu as pltpu

# ----------------------------- config (small) --------------------------------
SR = 24000
N_FFT = 32
HOP = 8
N_FREQ = N_FFT // 2 + 1          # 17
N_MELS = 8                       # backbone input_channels
DIM = 32                         # backbone dim
INTER = 64                       # ConvNeXt intermediate dim
N_LAYERS = 2
EPS = 1e-6
KSIZE = 7                        # conv kernel size (padding 3)
PAD = N_FFT // 2                 # center-pad / trim amount
TAPS = N_FFT // HOP              # hop-chunks per frame (4)


# ----------------------------- in-kernel helpers ------------------------------
def _layernorm(x, g, b):
    mu = jnp.mean(x, axis=-1, keepdims=True)
    var = jnp.mean((x - mu) ** 2, axis=-1, keepdims=True)
    return (x - mu) * jax.lax.rsqrt(var + EPS) * g + b


def _gelu_tanh(x):
    # TODO(synk): PyTorch nn.GELU() uses the exact erf form; tanh approximation is used
    # because erf lowering on Mosaic is not guaranteed (small ~1e-3 activation mismatch).
    c = 0.7978845608028654  # sqrt(2/pi)
    return 0.5 * x * (1.0 + jnp.tanh(c * (x + 0.044715 * x * x * x)))


def _shift_rows(x, d, valid):
    """shifted[i, :] = x[i + d, :] if 0 <= i + d < valid else 0  (d, valid static).

    pltpu.roll runs on the XLU slot (off the VALU/MXU critical path); the mask also
    reproduces Conv1d zero-padding at the sequence boundary.
    """
    n = x.shape[0]
    rolled = x if d == 0 else pltpu.roll(x, shift=(-d) % n, axis=0)
    idx = jax.lax.broadcasted_iota(jnp.int32, x.shape, 0)
    keep = jnp.logical_and(idx + d >= 0, idx + d < valid)
    return jnp.where(keep, rolled, 0.0)


# ----------------------------- fused kernel -----------------------------------
def vocos_fused_kernel(*refs, n_frames, fp, n_layers):
    """One grid step = one batch element; rows of every activation are (padded) frames."""
    F = n_frames
    n_pre = 9
    (chunks_ref, win_ref, dcos_ref, dsin_ref, fb_ref,
     ew_ref, eb_ref, ng_ref, nb_ref) = refs[:n_pre]
    blk_refs = refs[n_pre:n_pre + 9 * n_layers]
    (flg_ref, flb_ref, owm_ref, obm_ref, owp_ref, obp_ref,
     icos_ref, isin_ref, iwsq_ref) = refs[n_pre + 9 * n_layers:n_pre + 9 * n_layers + 9]
    out_ref = refs[n_pre + 9 * n_layers + 9]

    # --- in-kernel framing from raw hop-chunks (no 4x duplicated frames array in HBM) ---
    chunks = chunks_ref[...]                                # (n_chunks, HOP)
    n_chunks = chunks.shape[0]
    pad_rows = fp + TAPS - 1 - n_chunks
    if pad_rows > 0:
        chunks = jnp.concatenate(
            [chunks, jnp.zeros((pad_rows, HOP), jnp.float32)], axis=0)
    frames = jnp.concatenate(
        [chunks[s:s + fp, :] for s in range(TAPS)], axis=1)  # (fp, N_FFT)

    # --- feature extractor: hann window -> DFT (cos/sin matmuls) -> |.| -> mel -> log ---
    xw = frames * win_ref[...]                              # (fp, N_FFT)
    re = jnp.dot(xw, dcos_ref[...], preferred_element_type=jnp.float32)
    im = jnp.dot(xw, dsin_ref[...], preferred_element_type=jnp.float32)
    mag = jnp.sqrt(re * re + im * im)                       # power=1 magnitude
    mel = jnp.dot(mag, fb_ref[...], preferred_element_type=jnp.float32)
    mel = jnp.log(jnp.maximum(mel, 1e-7))                   # safe_log, (fp, N_MELS)
    row = jax.lax.broadcasted_iota(jnp.int32, mel.shape, 0)
    mel = jnp.where(row < F, mel, 0.0)                      # keep padded frame rows inert

    # --- backbone.embed: Conv1d(N_MELS, DIM, k=7, pad=3) as ONE folded matmul ---
    im2col = jnp.concatenate(
        [_shift_rows(mel, k - KSIZE // 2, F) for k in range(KSIZE)], axis=1)  # (fp, K*N_MELS)
    x = jnp.dot(im2col, ew_ref[...], preferred_element_type=jnp.float32) + eb_ref[...]
    x = _layernorm(x, ng_ref[...], nb_ref[...])             # backbone.norm

    # --- ConvNeXt blocks: dwconv(k=7) -> LN -> MLP(GELU) -> layer-scale -> +residual ---
    for i in range(n_layers):
        (dww_ref, dwb_ref, lng_ref, lnb_ref,
         w1_ref, b1_ref, w2_ref, b2_ref, gam_ref) = blk_refs[9 * i:9 * (i + 1)]
        dww = dww_ref[...]                                  # (K, DIM), loaded once
        dw = jnp.zeros_like(x)
        for k in range(KSIZE):
            dw = dw + _shift_rows(x, k - KSIZE // 2, F) * dww[k:k + 1, :]
        dw = dw + dwb_ref[...]
        h = _layernorm(dw, lng_ref[...], lnb_ref[...])
        h = jnp.dot(h, w1_ref[...], preferred_element_type=jnp.float32) + b1_ref[...]
        h = _gelu_tanh(h)
        h = jnp.dot(h, w2_ref[...], preferred_element_type=jnp.float32) + b2_ref[...]
        x = x + gam_ref[...] * h                            # residual + layer_scale

    # --- head (ISTFTHead): LN -> mag/phase linears -> exp/clip, cos/sin -> inverse rFFT ---
    xn = _layernorm(x, flg_ref[...], flb_ref[...])
    mh = jnp.dot(xn, owm_ref[...], preferred_element_type=jnp.float32) + obm_ref[...]
    ph = jnp.dot(xn, owp_ref[...], preferred_element_type=jnp.float32) + obp_ref[...]
    mh = jnp.minimum(jnp.exp(mh), 100.0)                    # exp then clip(max=1e2)
    fr = (jnp.dot(mh * jnp.cos(ph), icos_ref[...], preferred_element_type=jnp.float32)
          + jnp.dot(mh * jnp.sin(ph), isin_ref[...], preferred_element_type=jnp.float32))
    rowf = jax.lax.broadcasted_iota(jnp.int32, fr.shape, 0)
    fr = jnp.where(rowf < F, fr, 0.0)                       # padded frame rows contribute 0

    # --- vectorized overlap-add: sum of TAPS row-shifted HOP-wide slabs, then trim + norm ---
    sig = jnp.zeros((fp, HOP), jnp.float32)
    for s in range(TAPS):
        sig = sig + _shift_rows(fr[:, s * HOP:(s + 1) * HOP], -s, F)
    out_rows = out_ref.shape[0]                             # T // HOP
    pad_chunks = PAD // HOP
    out_ref[...] = sig[pad_chunks:pad_chunks + out_rows, :] * iwsq_ref[...]


# ----------------------------- constants & params -----------------------------
def hann_periodic(n):
    k = np.arange(n)
    return (0.5 - 0.5 * np.cos(2.0 * np.pi * k / n)).astype(np.float32)


def mel_filterbank(n_freq, n_mels, sr):
    # TODO(synk): HTK-style triangles without Slaney normalization; verify against the
    # torchaudio MelSpectrogram config used by the reference Vocos feature extractor.
    hz2mel = lambda f: 2595.0 * np.log10(1.0 + f / 700.0)
    mel2hz = lambda m: 700.0 * (10.0 ** (m / 2595.0) - 1.0)
    mpts = np.linspace(hz2mel(0.0), hz2mel(sr / 2.0), n_mels + 2)
    fpts = mel2hz(mpts)
    bins = np.linspace(0.0, sr / 2.0, n_freq)
    fb = np.zeros((n_freq, n_mels), np.float32)
    for m in range(n_mels):
        lo, c, hi = fpts[m], fpts[m + 1], fpts[m + 2]
        up = (bins - lo) / max(c - lo, 1e-9)
        dn = (hi - bins) / max(hi - c, 1e-9)
        fb[:, m] = np.maximum(0.0, np.minimum(up, dn))
    return fb


def build_constants():
    win = hann_periodic(N_FFT)
    n = np.arange(N_FFT)[:, None]
    k = np.arange(N_FREQ)[None, :]
    ang = 2.0 * np.pi * n * k / N_FFT
    dcos = np.cos(ang).astype(np.float32)                   # (N_FFT, N_FREQ)
    dsin = (-np.sin(ang)).astype(np.float32)                # (N_FFT, N_FREQ)
    # inverse rFFT (conjugate-symmetry weights) fused with synthesis window and 1/N,
    # kept as separate cos/sin operands so the head does two lane-aligned matmuls.
    wgt = np.full((N_FREQ,), 2.0)
    wgt[0] = 1.0
    wgt[-1] = 1.0
    kk = np.arange(N_FREQ)[:, None]
    nn = np.arange(N_FFT)[None, :]
    iang = 2.0 * np.pi * kk * nn / N_FFT
    icos = (wgt[:, None] * np.cos(iang) * win[None, :] / N_FFT).astype(np.float32)
    isin = (-wgt[:, None] * np.sin(iang) * win[None, :] / N_FFT).astype(np.float32)
    fb = mel_filterbank(N_FREQ, N_MELS, SR)
    return {
        "win": jnp.asarray(win)[None, :],
        "dcos": jnp.asarray(dcos),
        "dsin": jnp.asarray(dsin),
        "fb": jnp.asarray(fb),
        "icos": jnp.asarray(icos),
        "isin": jnp.asarray(isin),
        "win_np": win,
    }


def init_params(key):
    def nrm(k, shape, scale=0.05):
        return scale * jax.random.normal(k, shape, jnp.float32)

    keys = jax.random.split(key, 6 + 4 * N_LAYERS)
    p = {}
    # embed Conv1d(N_MELS, DIM, k=7) folded to (K*Cin, D); fold order k-major, c-minor
    p["embed_w"] = nrm(keys[0], (KSIZE * N_MELS, DIM))
    p["embed_b"] = nrm(keys[1], (1, DIM))
    p["norm_g"] = jnp.ones((1, DIM), jnp.float32)
    p["norm_b"] = jnp.zeros((1, DIM), jnp.float32)
    blocks = []
    for i in range(N_LAYERS):
        k0, k1, k2, k3 = keys[6 + 4 * i: 10 + 4 * i]
        blocks.append({
            "dw_w": nrm(k0, (KSIZE, DIM)),                   # depthwise (K, D)
            "dw_b": nrm(k1, (1, DIM)),
            "ln_g": jnp.ones((1, DIM), jnp.float32),
            "ln_b": jnp.zeros((1, DIM), jnp.float32),
            "w1": nrm(k2, (DIM, INTER)),
            "b1": jnp.zeros((1, INTER), jnp.float32),
            "w2": nrm(k3, (INTER, DIM)),
            "b2": jnp.zeros((1, DIM), jnp.float32),
            "gamma": jnp.full((1, DIM), 1.0 / N_LAYERS, jnp.float32),   # layer_scale
        })
    p["blocks"] = blocks
    p["fln_g"] = jnp.ones((1, DIM), jnp.float32)
    p["fln_b"] = jnp.zeros((1, DIM), jnp.float32)
    # head.out Linear(D, n_fft+2) split into lane-aligned magnitude / phase halves
    p["out_w_mag"] = nrm(keys[2], (DIM, N_FREQ))
    p["out_b_mag"] = nrm(keys[3], (1, N_FREQ))
    p["out_w_ph"] = nrm(keys[4], (DIM, N_FREQ))
    p["out_b_ph"] = nrm(keys[5], (1, N_FREQ))
    return p


# ----------------------------- forward (batch-gridded pallas_call) ------------
def vocos_forward(audio, params, consts):
    B, T = audio.shape
    assert T % HOP == 0, "T must be a multiple of the hop size"
    assert N_FFT % HOP == 0 and PAD % HOP == 0
    # Reflect center-padding stays in the XLA wrapper (pure data-layout op); the reshape to
    # hop-chunks is free metadata — the kernel input carries only raw-audio bytes (no 4x im2col).
    padded = jnp.pad(audio, ((0, 0), (PAD, PAD)), mode="reflect")
    plen = T + 2 * PAD
    n_chunks = plen // HOP
    F = n_chunks - TAPS + 1                                  # number of STFT frames
    FP = ((n_chunks + 7) // 8) * 8                           # padded frame rows (sublane mult.)
    chunks = padded.reshape(B, n_chunks, HOP)

    # inverse window envelope (torch.istft normalization), precomputed on host
    out_len = (F - 1) * HOP + N_FFT
    wsq = np.zeros((out_len,), np.float64)
    w2 = consts["win_np"].astype(np.float64) ** 2
    for l in range(F):
        wsq[l * HOP:l * HOP + N_FFT] += w2
    inv = np.where(wsq > 1e-11, 1.0 / np.maximum(wsq, 1e-11), 0.0)   # guarded division
    iwsq = jnp.asarray(inv[PAD:PAD + T].astype(np.float32).reshape(T // HOP, HOP))

    args = [chunks, consts["win"], consts["dcos"], consts["dsin"], consts["fb"],
            params["embed_w"], params["embed_b"], params["norm_g"], params["norm_b"]]
    for blk in params["blocks"]:
        args += [blk["dw_w"], blk["dw_b"], blk["ln_g"], blk["ln_b"],
                 blk["w1"], blk["b1"], blk["w2"], blk["b2"], blk["gamma"]]
    args += [params["fln_g"], params["fln_b"],
             params["out_w_mag"], params["out_b_mag"],
             params["out_w_ph"], params["out_b_ph"],
             consts["icos"], consts["isin"], iwsq]

    def _const_spec(a):
        return pl.BlockSpec(a.shape, lambda b, _nd=a.ndim: (0,) * _nd)

    in_specs = [pl.BlockSpec((None, n_chunks, HOP), lambda b: (b, 0, 0))]
    in_specs += [_const_spec(a) for a in args[1:]]

    kernel = functools.partial(vocos_fused_kernel, n_frames=F, fp=FP,
                               n_layers=len(params["blocks"]))
    out = pl.pallas_call(
        kernel,
        out_shape=jax.ShapeDtypeStruct((B, T // HOP, HOP), jnp.float32),
        grid=(B,),
        in_specs=in_specs,
        out_specs=pl.BlockSpec((None, T // HOP, HOP), lambda b: (b, 0, 0)),
        compiler_params=pltpu.CompilerParams(
            dimension_semantics=("parallel",),               # independent batch steps
            vmem_limit_bytes=32 * 1024 * 1024),
    )(*args)
    return out.reshape(B, T)


# ----------------------------- main -------------------------------------------
if __name__ == "__main__":
    key = jax.random.PRNGKey(0)
    kp, kx = jax.random.split(key)
    params = init_params(kp)
    consts = build_constants()

    B, T = 2, 64
    audio_input = jax.random.normal(kx, (B, T), jnp.float32)

    audio_output = vocos_forward(audio_input, params, consts)
    jax.block_until_ready(audio_output)
    assert audio_output.shape == (B, T), audio_output.shape
    assert bool(jnp.all(jnp.isfinite(audio_output)))
    print("KERNEL_OK")
</pallas_src>

<mosaic_0001>
module attributes {stable_mosaic.version = 11 : i64} {
  func.func @vocos_fused_kernel(%arg0: i32, %arg1: memref<1x12x8xf32, #tpu.memory_space<vmem>>, %arg2: memref<1x32xf32, #tpu.memory_space<vmem>>, %arg3: memref<32x17xf32, #tpu.memory_space<vmem>>, %arg4: memref<32x17xf32, #tpu.memory_space<vmem>>, %arg5: memref<17x8xf32, #tpu.memory_space<vmem>>, %arg6: memref<56x32xf32, #tpu.memory_space<vmem>>, %arg7: memref<1x32xf32, #tpu.memory_space<vmem>>, %arg8: memref<1x32xf32, #tpu.memory_space<vmem>>, %arg9: memref<1x32xf32, #tpu.memory_space<vmem>>, %arg10: memref<7x32xf32, #tpu.memory_space<vmem>>, %arg11: memref<1x32xf32, #tpu.memory_space<vmem>>, %arg12: memref<1x32xf32, #tpu.memory_space<vmem>>, %arg13: memref<1x32xf32, #tpu.memory_space<vmem>>, %arg14: memref<32x64xf32, #tpu.memory_space<vmem>>, %arg15: memref<1x64xf32, #tpu.memory_space<vmem>>, %arg16: memref<64x32xf32, #tpu.memory_space<vmem>>, %arg17: memref<1x32xf32, #tpu.memory_space<vmem>>, %arg18: memref<1x32xf32, #tpu.memory_space<vmem>>, %arg19: memref<7x32xf32, #tpu.memory_space<vmem>>, %arg20: memref<1x32xf32, #tpu.memory_space<vmem>>, %arg21: memref<1x32xf32, #tpu.memory_space<vmem>>, %arg22: memref<1x32xf32, #tpu.memory_space<vmem>>, %arg23: memref<32x64xf32, #tpu.memory_space<vmem>>, %arg24: memref<1x64xf32, #tpu.memory_space<vmem>>, %arg25: memref<64x32xf32, #tpu.memory_space<vmem>>, %arg26: memref<1x32xf32, #tpu.memory_space<vmem>>, %arg27: memref<1x32xf32, #tpu.memory_space<vmem>>, %arg28: memref<1x32xf32, #tpu.memory_space<vmem>>, %arg29: memref<1x32xf32, #tpu.memory_space<vmem>>, %arg30: memref<32x17xf32, #tpu.memory_space<vmem>>, %arg31: memref<1x17xf32, #tpu.memory_space<vmem>>, %arg32: memref<32x17xf32, #tpu.memory_space<vmem>>, %arg33: memref<1x17xf32, #tpu.memory_space<vmem>>, %arg34: memref<17x32xf32, #tpu.memory_space<vmem>>, %arg35: memref<17x32xf32, #tpu.memory_space<vmem>>, %arg36: memref<8x8xf32, #tpu.memory_space<vmem>>, %arg37: memref<1x8x8xf32, #tpu.memory_space<vmem>>) attributes {dimension_semantics = [#tpu.dimension_semantics<parallel>], iteration_bounds = array<i64: 2>, scalar_prefetch = 0 : i64, scratch_operands = 0 : i64, tpu.core_type = #tpu.core_type<tc>, window_params = [{transform_indices = @transform_0, window_bounds = array<i64: 1, 12, 8>}, {pipeline_mode = #tpu.pipeline_mode<synchronous>, transform_indices = @transform_1, window_bounds = array<i64: 1, 32>}, {pipeline_mode = #tpu.pipeline_mode<synchronous>, transform_indices = @transform_2, window_bounds = array<i64: 32, 17>}, {pipeline_mode = #tpu.pipeline_mode<synchronous>, transform_indices = @transform_3, window_bounds = array<i64: 32, 17>}, {pipeline_mode = #tpu.pipeline_mode<synchronous>, transform_indices = @transform_4, window_bounds = array<i64: 17, 8>}, {pipeline_mode = #tpu.pipeline_mode<synchronous>, transform_indices = @transform_5, window_bounds = array<i64: 56, 32>}, {pipeline_mode = #tpu.pipeline_mode<synchronous>, transform_indices = @transform_6, window_bounds = array<i64: 1, 32>}, {pipeline_mode = #tpu.pipeline_mode<synchronous>, transform_indices = @transform_7, window_bounds = array<i64: 1, 32>}, {pipeline_mode = #tpu.pipeline_mode<synchronous>, transform_indices = @transform_8, window_bounds = array<i64: 1, 32>}, {pipeline_mode = #tpu.pipeline_mode<synchronous>, transform_indices = @transform_9, window_bounds = array<i64: 7, 32>}, {pipeline_mode = #tpu.pipeline_mode<synchronous>, transform_indices = @transform_10, window_bounds = array<i64: 1, 32>}, {pipeline_mode = #tpu.pipeline_mode<synchronous>, transform_indices = @transform_11, window_bounds = array<i64: 1, 32>}, {pipeline_mode = #tpu.pipeline_mode<synchronous>, transform_indices = @transform_12, window_bounds = array<i64: 1, 32>}, {pipeline_mode = #tpu.pipeline_mode<synchronous>, transform_indices = @transform_13, window_bounds = array<i64: 32, 64>}, {pipeline_mode = #tpu.pipeline_mode<synchronous>, transform_indices = @transform_14, window_bounds = array<i64: 1, 64>}, {pipeline_mode = #tpu.pipeline_mode<synchronous>, transform_indices = @transform_15, window_bounds = array<i64: 64, 32>}, {pipeline_mode = #tpu.pipeline_mode<synchronous>, transform_indices = @transform_16, window_bounds = array<i64: 1, 32>}, {pipeline_mode = #tpu.pipeline_mode<synchronous>, transform_indices = @transform_17, window_bounds = array<i64: 1, 32>}, {pipeline_mode = #tpu.pipeline_mode<synchronous>, transform_indices = @transform_18, window_bounds = array<i64: 7, 32>}, {pipeline_mode = #tpu.pipeline_mode<synchronous>, transform_indices = @transform_19, window_bounds = array<i64: 1, 32>}, {pipeline_mode = #tpu.pipeline_mode<synchronous>, transform_indices = @transform_20, window_bounds = array<i64: 1, 32>}, {pipeline_mode = #tpu.pipeline_mode<synchronous>, transform_indices = @transform_21, window_bounds = array<i64: 1, 32>}, {pipeline_mode = #tpu.pipeline_mode<synchronous>, transform_indices = @transform_22, window_bounds = array<i64: 32, 64>}, {pipeline_mode = #tpu.pipeline_mode<synchronous>, transform_indices = @transform_23, window_bounds = array<i64: 1, 64>}, {pipeline_mode = #tpu.pipeline_mode<synchronous>, transform_indices = @transform_24, window_bounds = array<i64: 64, 32>}, {pipeline_mode = #tpu.pipeline_mode<synchronous>, transform_indices = @transform_25, window_bounds = array<i64: 1, 32>}, {pipeline_mode = #tpu.pipeline_mode<synchronous>, transform_indices = @transform_26, window_bounds = array<i64: 1, 32>}, {pipeline_mode = #tpu.pipeline_mode<synchronous>, transform_indices = @transform_27, window_bounds = array<i64: 1, 32>}, {pipeline_mode = #tpu.pipeline_mode<synchronous>, transform_indices = @transform_28, window_bounds = array<i64: 1, 32>}, {pipeline_mode = #tpu.pipeline_mode<synchronous>, transform_indices = @transform_29, window_bounds = array<i64: 32, 17>}, {pipeline_mode = #tpu.pipeline_mode<synchronous>, transform_indices = @transform_30, window_bounds = array<i64: 1, 17>}, {pipeline_mode = #tpu.pipeline_mode<synchronous>, transform_indices = @transform_31, window_bounds = array<i64: 32, 17>}, {pipeline_mode = #tpu.pipeline_mode<synchronous>, transform_indices = @transform_32, window_bounds = array<i64: 1, 17>}, {pipeline_mode = #tpu.pipeline_mode<synchronous>, transform_indices = @transform_33, window_bounds = array<i64: 17, 32>}, {pipeline_mode = #tpu.pipeline_mode<synchronous>, transform_indices = @transform_34, window_bounds = array<i64: 17, 32>}, {pipeline_mode = #tpu.pipeline_mode<synchronous>, transform_indices = @transform_35, window_bounds = array<i64: 8, 8>}, {transform_indices = @transform_36, window_bounds = array<i64: 1, 8, 8>}]} {
    %c0 = arith.constant 0 : index
    %c0_0 = arith.constant 0 : index
    %c0_1 = arith.constant 0 : index
    %0 = vector.load %arg1[%c0, %c0_0, %c0_1] : memref<1x12x8xf32, #tpu.memory_space<vmem>>, vector<1x12x8xf32>
    %1 = vector.shape_cast %0 : vector<1x12x8xf32> to vector<12x8xf32>
    %cst = arith.constant 0.000000e+00 : f32
    %2 = vector.broadcast %cst : f32 to vector<7x8xf32>
    %3 = tpu.concatenate %1, %2 in 0 : vector<12x8xf32>, vector<7x8xf32> -> vector<19x8xf32>
    %4 = vector.extract_strided_slice %3 {offsets = [0, 0], sizes = [16, 8], strides = [1, 1]} : vector<19x8xf32> to vector<16x8xf32>
    %5 = vector.extract_strided_slice %3 {offsets = [1, 0], sizes = [16, 8], strides = [1, 1]} : vector<19x8xf32> to vector<16x8xf32>
    %6 = vector.extract_strided_slice %3 {offsets = [2, 0], sizes = [16, 8], strides = [1, 1]} : vector<19x8xf32> to vector<16x8xf32>
    %7 = vector.extract_strided_slice %3 {offsets = [3, 0], sizes = [16, 8], strides = [1, 1]} : vector<19x8xf32> to vector<16x8xf32>
    %8 = tpu.concatenate %4, %5, %6, %7 in 1 : vector<16x8xf32>, vector<16x8xf32>, vector<16x8xf32>, vector<16x8xf32> -> vector<16x32xf32>
    %c0_2 = arith.constant 0 : index
    %c0_3 = arith.constant 0 : index
    %9 = vector.load %arg2[%c0_2, %c0_3] : memref<1x32xf32, #tpu.memory_space<vmem>>, vector<1x32xf32>
    %10 = vector.broadcast %9 : vector<1x32xf32> to vector<16x32xf32>
    %11 = arith.mulf %8, %10 : vector<16x32xf32>
    %c0_4 = arith.constant 0 : index
    %c0_5 = arith.constant 0 : index
    %12 = vector.load %arg3[%c0_4, %c0_5] : memref<32x17xf32, #tpu.memory_space<vmem>>, vector<32x17xf32>
    %cst_6 = arith.constant dense<0.000000e+00> : vector<16x17xf32>
    %13 = tpu.matmul %11, %12, %cst_6 {dimension_numbers = #tpu.dot_dimension_numbers<[1], [0], [0], [1], [0, 0, 1, 1], [], []>} : vector<16x32xf32>, vector<32x17xf32>, vector<16x17xf32> -> vector<16x17xf32>
    %c0_7 = arith.constant 0 : index
    %c0_8 = arith.constant 0 : index
    %14 = vector.load %arg4[%c0_7, %c0_8] : memref<32x17xf32, #tpu.memory_space<vmem>>, vector<32x17xf32>
    %cst_9 = arith.constant dense<0.000000e+00> : vector<16x17xf32>
    %15 = tpu.matmul %11, %14, %cst_9 {dimension_numbers = #tpu.dot_dimension_numbers<[1], [0], [0], [1], [0, 0, 1, 1], [], []>} : vector<16x32xf32>, vector<32x17xf32>, vector<16x17xf32> -> vector<16x17xf32>
    %16 = arith.mulf %13, %13 : vector<16x17xf32>
    %17 = arith.mulf %15, %15 : vector<16x17xf32>
    %18 = arith.addf %16, %17 : vector<16x17xf32>
    %19 = math.sqrt %18 : vector<16x17xf32>
    %c0_10 = arith.constant 0 : index
    %c0_11 = arith.constant 0 : index
    %20 = vector.load %arg5[%c0_10, %c0_11] : memref<17x8xf32, #tpu.memory_space<vmem>>, vector<17x8xf32>
    %cst_12 = arith.constant dense<0.000000e+00> : vector<16x8xf32>
    %21 = tpu.matmul %19, %20, %cst_12 {dimension_numbers = #tpu.dot_dimension_numbers<[1], [0], [0], [1], [0, 0, 1, 1], [], []>} : vector<16x17xf32>, vector<17x8xf32>, vector<16x8xf32> -> vector<16x8xf32>
    %cst_13 = arith.constant 1.000000e-07 : f32
    %22 = vector.broadcast %cst_13 : f32 to vector<16x8xf32>
    %23 = arith.maximumf %21, %22 : vector<16x8xf32>
    %24 = math.log %23 : vector<16x8xf32>
    %25 = tpu.iota {dimensions = array<i32: 0>} : vector<16x8xi32>
    %c9_i32 = arith.constant 9 : i32
    %26 = vector.broadcast %c9_i32 : i32 to vector<16x8xi32>
    %27 = arith.cmpi slt, %25, %26 : vector<16x8xi32>
    %cst_14 = arith.constant 0.000000e+00 : f32
    %28 = vector.broadcast %cst_14 : f32 to vector<16x8xf32>
    %29 = arith.select %27, %24, %28 : vector<16x8xi1>, vector<16x8xf32>
    %c3_i32 = arith.constant 3 : i32
    %30 = tpu.dynamic_rotate %29 by %c3_i32 dim 0 : vector<16x8xf32>, i32 -> vector<16x8xf32>
    %31 = tpu.iota {dimensions = array<i32: 0>} : vector<16x8xi32>
    %c-3_i32 = arith.constant -3 : i32
    %32 = vector.broadcast %c-3_i32 : i32 to vector<16x8xi32>
    %33 = arith.addi %31, %32 : vector<16x8xi32>
    %c0_i32 = arith.constant 0 : i32
    %34 = vector.broadcast %c0_i32 : i32 to vector<16x8xi32>
    %35 = arith.cmpi sge, %33, %34 : vector<16x8xi32>
    %c-3_i32_15 = arith.constant -3 : i32
    %36 = vector.broadcast %c-3_i32_15 : i32 to vector<16x8xi32>
    %37 = arith.addi %31, %36 : vector<16x8xi32>
    %c9_i32_16 = arith.constant 9 : i32
    %38 = vector.broadcast %c9_i32_16 : i32 to vector<16x8xi32>
    %39 = arith.cmpi slt, %37, %38 : vector<16x8xi32>
    %40 = arith.andi %35, %39 : vector<16x8xi1>
    %cst_17 = arith.constant 0.000000e+00 : f32
    %41 = vector.broadcast %cst_17 : f32 to vector<16x8xf32>
    %42 = arith.select %40, %30, %41 : vector<16x8xi1>, vector<16x8xf32>
    %c2_i32 = arith.constant 2 : i32
    %43 = tpu.dynamic_rotate %29 by %c2_i32 dim 0 : vector<16x8xf32>, i32 -> vector<16x8xf32>
    %44 = tpu.iota {dimensions = array<i32: 0>} : vector<16x8xi32>
    %c-2_i32 = arith.constant -2 : i32
    %45 = vector.broadcast %c-2_i32 : i32 to vector<16x8xi32>
    %46 = arith.addi %44, %45 : vector<16x8xi32>
    %c0_i32_18 = arith.constant 0 : i32
    %47 = vector.broadcast %c0_i32_18 : i32 to vector<16x8xi32>
    %48 = arith.cmpi sge, %46, %47 : vector<16x8xi32>
    %c-2_i32_19 = arith.constant -2 : i32
    %49 = vector.broadcast %c-2_i32_19 : i32 to vector<16x8xi32>
    %50 = arith.addi %44, %49 : vector<16x8xi32>
    %c9_i32_20 = arith.constant 9 : i32
    %51 = vector.broadcast %c9_i32_20 : i32 to vector<16x8xi32>
    %52 = arith.cmpi slt, %50, %51 : vector<16x8xi32>
    %53 = arith.andi %48, %52 : vector<16x8xi1>
    %cst_21 = arith.constant 0.000000e+00 : f32
    %54 = vector.broadcast %cst_21 : f32 to vector<16x8xf32>
    %55 = arith.select %53, %43, %54 : vector<16x8xi1>, vector<16x8xf32>
    %c1_i32 = arith.constant 1 : i32
    %56 = tpu.dynamic_rotate %29 by %c1_i32 dim 0 : vector<16x8xf32>, i32 -> vector<16x8xf32>
    %57 = tpu.iota {dimensions = array<i32: 0>} : vector<16x8xi32>
    %c-1_i32 = arith.constant -1 : i32
    %58 = vector.broadcast %c-1_i32 : i32 to vector<16x8xi32>
    %59 = arith.addi %57, %58 : vector<16x8xi32>
    %c0_i32_22 = arith.constant 0 : i32
    %60 = vector.broadcast %c0_i32_22 : i32 to vector<16x8xi32>
    %61 = arith.cmpi sge, %59, %60 : vector<16x8xi32>
    %c-1_i32_23 = arith.constant -1 : i32
    %62 = vector.broadcast %c-1_i32_23 : i32 to vector<16x8xi32>
    %63 = arith.addi %57, %62 : vector<16x8xi32>
    %c9_i32_24 = arith.constant 9 : i32
    %64 = vector.broadcast %c9_i32_24 : i32 to vector<16x8xi32>
    %65 = arith.cmpi slt, %63, %64 : vector<16x8xi32>
    %66 = arith.andi %61, %65 : vector<16x8xi1>
    %cst_25 = arith.constant 0.000000e+00 : f32
    %67 = vector.broadcast %cst_25 : f32 to vector<16x8xf32>
    %68 = arith.select %66, %56, %67 : vector<16x8xi1>, vector<16x8xf32>
    %69 = tpu.iota {dimensions = array<i32: 0>} : vector<16x8xi32>
    %c0_i32_26 = arith.constant 0 : i32
    %70 = vector.broadcast %c0_i32_26 : i32 to vector<16x8xi32>
    %71 = arith.addi %69, %70 : vector<16x8xi32>
    %c0_i32_27 = arith.constant 0 : i32
    %72 = vector.broadcast %c0_i32_27 : i32 to vector<16x8xi32>
    %73 = arith.cmpi sge, %71, %72 : vector<16x8xi32>
    %c0_i32_28 = arith.constant 0 : i32
    %74 = vector.broadcast %c0_i32_28 : i32 to vector<16x8xi32>
    %75 = arith.addi %69, %74 : vector<16x8xi32>
    %c9_i32_29 = arith.constant 9 : i32
    %76 = vector.broadcast %c9_i32_29 : i32 to vector<16x8xi32>
    %77 = arith.cmpi slt, %75, %76 : vector<16x8xi32>
    %78 = arith.andi %73, %77 : vector<16x8xi1>
    %cst_30 = arith.constant 0.000000e+00 : f32
    %79 = vector.broadcast %cst_30 : f32 to vector<16x8xf32>
    %80 = arith.select %78, %29, %79 : vector<16x8xi1>, vector<16x8xf32>
    %c15_i32 = arith.constant 15 : i32
    %81 = tpu.dynamic_rotate %29 by %c15_i32 dim 0 : vector<16x8xf32>, i32 -> vector<16x8xf32>
    %82 = tpu.iota {dimensions = array<i32: 0>} : vector<16x8xi32>
    %c1_i32_31 = arith.constant 1 : i32
    %83 = vector.broadcast %c1_i32_31 : i32 to vector<16x8xi32>
    %84 = arith.addi %82, %83 : vector<16x8xi32>
    %c0_i32_32 = arith.constant 0 : i32
    %85 = vector.broadcast %c0_i32_32 : i32 to vector<16x8xi32>
    %86 = arith.cmpi sge, %84, %85 : vector<16x8xi32>
    %c1_i32_33 = arith.constant 1 : i32
    %87 = vector.broadcast %c1_i32_33 : i32 to vector<16x8xi32>
    %88 = arith.addi %82, %87 : vector<16x8xi32>
    %c9_i32_34 = arith.constant 9 : i32
    %89 = vector.broadcast %c9_i32_34 : i32 to vector<16x8xi32>
    %90 = arith.cmpi slt, %88, %89 : vector<16x8xi32>
    %91 = arith.andi %86, %90 : vector<16x8xi1>
    %cst_35 = arith.constant 0.000000e+00 : f32
    %92 = vector.broadcast %cst_35 : f32 to vector<16x8xf32>
    %93 = arith.select %91, %81, %92 : vector<16x8xi1>, vector<16x8xf32>
    %c14_i32 = arith.constant 14 : i32
    %94 = tpu.dynamic_rotate %29 by %c14_i32 dim 0 : vector<16x8xf32>, i32 -> vector<16x8xf32>
    %95 = tpu.iota {dimensions = array<i32: 0>} : vector<16x8xi32>
    %c2_i32_36 = arith.constant 2 : i32
    %96 = vector.broadcast %c2_i32_36 : i32 to vector<16x8xi32>
    %97 = arith.addi %95, %96 : vector<16x8xi32>
    %c0_i32_37 = arith.constant 0 : i32
    %98 = vector.broadcast %c0_i32_37 : i32 to vector<16x8xi32>
    %99 = arith.cmpi sge, %97, %98 : vector<16x8xi32>
    %c2_i32_38 = arith.constant 2 : i32
    %100 = vector.broadcast %c2_i32_38 : i32 to vector<16x8xi32>
    %101 = arith.addi %95, %100 : vector<16x8xi32>
    %c9_i32_39 = arith.constant 9 : i32
    %102 = vector.broadcast %c9_i32_39 : i32 to vector<16x8xi32>
    %103 = arith.cmpi slt, %101, %102 : vector<16x8xi32>
    %104 = arith.andi %99, %103 : vector<16x8xi1>
    %cst_40 = arith.constant 0.000000e+00 : f32
    %105 = vector.broadcast %cst_40 : f32 to vector<16x8xf32>
    %106 = arith.select %104, %94, %105 : vector<16x8xi1>, vector<16x8xf32>
    %c13_i32 = arith.constant 13 : i32
    %107 = tpu.dynamic_rotate %29 by %c13_i32 dim 0 : vector<16x8xf32>, i32 -> vector<16x8xf32>
    %108 = tpu.iota {dimensions = array<i32: 0>} : vector<16x8xi32>
    %c3_i32_41 = arith.constant 3 : i32
    %109 = vector.broadcast %c3_i32_41 : i32 to vector<16x8xi32>
    %110 = arith.addi %108, %109 : vector<16x8xi32>
    %c0_i32_42 = arith.constant 0 : i32
    %111 = vector.broadcast %c0_i32_42 : i32 to vector<16x8xi32>
    %112 = arith.cmpi sge, %110, %111 : vector<16x8xi32>
    %c3_i32_43 = arith.constant 3 : i32
    %113 = vector.broadcast %c3_i32_43 : i32 to vector<16x8xi32>
    %114 = arith.addi %108, %113 : vector<16x8xi32>
    %c9_i32_44 = arith.constant 9 : i32
    %115 = vector.broadcast %c9_i32_44 : i32 to vector<16x8xi32>
    %116 = arith.cmpi slt, %114, %115 : vector<16x8xi32>
    %117 = arith.andi %112, %116 : vector<16x8xi1>
    %cst_45 = arith.constant 0.000000e+00 : f32
    %118 = vector.broadcast %cst_45 : f32 to vector<16x8xf32>
    %119 = arith.select %117, %107, %118 : vector<16x8xi1>, vector<16x8xf32>
    %120 = tpu.concatenate %42, %55, %68, %80, %93, %106, %119 in 1 : vector<16x8xf32>, vector<16x8xf32>, vector<16x8xf32>, vector<16x8xf32>, vector<16x8xf32>, vector<16x8xf32>, vector<16x8xf32> -> vector<16x56xf32>
    %c0_46 = arith.constant 0 : index
    %c0_47 = arith.constant 0 : index
    %121 = vector.load %arg6[%c0_46, %c0_47] : memref<56x32xf32, #tpu.memory_space<vmem>>, vector<56x32xf32>
    %cst_48 = arith.constant dense<0.000000e+00> : vector<16x32xf32>
    %122 = tpu.matmul %120, %121, %cst_48 {dimension_numbers = #tpu.dot_dimension_numbers<[1], [0], [0], [1], [0, 0, 1, 1], [], []>} : vector<16x56xf32>, vector<56x32xf32>, vector<16x32xf32> -> vector<16x32xf32>
    %c0_49 = arith.constant 0 : index
    %c0_50 = arith.constant 0 : index
    %123 = vector.load %arg7[%c0_49, %c0_50] : memref<1x32xf32, #tpu.memory_space<vmem>>, vector<1x32xf32>
    %124 = vector.broadcast %123 : vector<1x32xf32> to vector<16x32xf32>
    %125 = arith.addf %122, %124 : vector<16x32xf32>
    %c0_51 = arith.constant 0 : index
    %c0_52 = arith.constant 0 : index
    %126 = vector.load %arg8[%c0_51, %c0_52] : memref<1x32xf32, #tpu.memory_space<vmem>>, vector<1x32xf32>
    %c0_53 = arith.constant 0 : index
    %c0_54 = arith.constant 0 : index
    %127 = vector.load %arg9[%c0_53, %c0_54] : memref<1x32xf32, #tpu.memory_space<vmem>>, vector<1x32xf32>
    %cst_55 = arith.constant dense<0.000000e+00> : vector<16xf32>
    %128 = vector.multi_reduction <add>, %125, %cst_55 [1] : vector<16x32xf32> to vector<16xf32>
    %129 = vector.shape_cast %128 : vector<16xf32> to vector<16x1xf32>
    %cst_56 = arith.constant 3.200000e+01 : f32
    %130 = vector.broadcast %cst_56 : f32 to vector<16x1xf32>
    %131 = arith.divf %129, %130 : vector<16x1xf32>
    %132 = vector.broadcast %131 : vector<16x1xf32> to vector<16x32xf32>
    %133 = arith.subf %125, %132 : vector<16x32xf32>
    %134 = arith.mulf %133, %133 : vector<16x32xf32>
    %cst_57 = arith.constant dense<0.000000e+00> : vector<16xf32>
    %135 = vector.multi_reduction <add>, %134, %cst_57 [1] : vector<16x32xf32> to vector<16xf32>
    %136 = vector.shape_cast %135 : vector<16xf32> to vector<16x1xf32>
    %cst_58 = arith.constant 3.200000e+01 : f32
    %137 = vector.broadcast %cst_58 : f32 to vector<16x1xf32>
    %138 = arith.divf %136, %137 : vector<16x1xf32>
    %139 = vector.broadcast %131 : vector<16x1xf32> to vector<16x32xf32>
    %140 = arith.subf %125, %139 : vector<16x32xf32>
    %cst_59 = arith.constant 9.99999997E-7 : f32
    %141 = vector.broadcast %cst_59 : f32 to vector<16x1xf32>
    %142 = arith.addf %138, %141 : vector<16x1xf32>
    %143 = math.rsqrt %142 : vector<16x1xf32>
    %144 = vector.broadcast %143 : vector<16x1xf32> to vector<16x32xf32>
    %145 = arith.mulf %140, %144 : vector<16x32xf32>
    %146 = vector.broadcast %126 : vector<1x32xf32> to vector<16x32xf32>
    %147 = arith.mulf %145, %146 : vector<16x32xf32>
    %148 = vector.broadcast %127 : vector<1x32xf32> to vector<16x32xf32>
    %149 = arith.addf %147, %148 : vector<16x32xf32>
    %c0_60 = arith.constant 0 : index
    %c0_61 = arith.constant 0 : index
    %150 = vector.load %arg10[%c0_60, %c0_61] : memref<7x32xf32, #tpu.memory_space<vmem>>, vector<7x32xf32>
    %cst_62 = arith.constant 0.000000e+00 : f32
    %151 = vector.broadcast %cst_62 : f32 to vector<16x32xf32>
    %c3_i32_63 = arith.constant 3 : i32
    %152 = tpu.dynamic_rotate %149 by %c3_i32_63 dim 0 : vector<16x32xf32>, i32 -> vector<16x32xf32>
    %153 = tpu.iota {dimensions = array<i32: 0>} : vector<16x32xi32>
    %c-3_i32_64 = arith.constant -3 : i32
    %154 = vector.broadcast %c-3_i32_64 : i32 to vector<16x32xi32>
    %155 = arith.addi %153, %154 : vector<16x32xi32>
    %c0_i32_65 = arith.constant 0 : i32
    %156 = vector.broadcast %c0_i32_65 : i32 to vector<16x32xi32>
    %157 = arith.cmpi sge, %155, %156 : vector<16x32xi32>
    %c-3_i32_66 = arith.constant -3 : i32
    %158 = vector.broadcast %c-3_i32_66 : i32 to vector<16x32xi32>
    %159 = arith.addi %153, %158 : vector<16x32xi32>
    %c9_i32_67 = arith.constant 9 : i32
    %160 = vector.broadcast %c9_i32_67 : i32 to vector<16x32xi32>
    %161 = arith.cmpi slt, %159, %160 : vector<16x32xi32>
    %162 = arith.andi %157, %161 : vector<16x32xi1>
    %cst_68 = arith.constant 0.000000e+00 : f32
    %163 = vector.broadcast %cst_68 : f32 to vector<16x32xf32>
    %164 = arith.select %162, %152, %163 : vector<16x32xi1>, vector<16x32xf32>
    %165 = vector.extract_strided_slice %150 {offsets = [0, 0], sizes = [1, 32], strides = [1, 1]} : vector<7x32xf32> to vector<1x32xf32>
    %166 = vector.broadcast %165 : vector<1x32xf32> to vector<16x32xf32>
    %167 = arith.mulf %164, %166 : vector<16x32xf32>
    %168 = arith.addf %151, %167 : vector<16x32xf32>
    %c2_i32_69 = arith.constant 2 : i32
    %169 = tpu.dynamic_rotate %149 by %c2_i32_69 dim 0 : vector<16x32xf32>, i32 -> vector<16x32xf32>
    %170 = tpu.iota {dimensions = array<i32: 0>} : vector<16x32xi32>
    %c-2_i32_70 = arith.constant -2 : i32
    %171 = vector.broadcast %c-2_i32_70 : i32 to vector<16x32xi32>
    %172 = arith.addi %170, %171 : vector<16x32xi32>
    %c0_i32_71 = arith.constant 0 : i32
    %173 = vector.broadcast %c0_i32_71 : i32 to vector<16x32xi32>
    %174 = arith.cmpi sge, %172, %173 : vector<16x32xi32>
    %c-2_i32_72 = arith.constant -2 : i32
    %175 = vector.broadcast %c-2_i32_72 : i32 to vector<16x32xi32>
    %176 = arith.addi %170, %175 : vector<16x32xi32>
    %c9_i32_73 = arith.constant 9 : i32
    %177 = vector.broadcast %c9_i32_73 : i32 to vector<16x32xi32>
    %178 = arith.cmpi slt, %176, %177 : vector<16x32xi32>
    %179 = arith.andi %174, %178 : vector<16x32xi1>
    %cst_74 = arith.constant 0.000000e+00 : f32
    %180 = vector.broadcast %cst_74 : f32 to vector<16x32xf32>
    %181 = arith.select %179, %169, %180 : vector<16x32xi1>, vector<16x32xf32>
    %182 = vector.extract_strided_slice %150 {offsets = [1, 0], sizes = [1, 32], strides = [1, 1]} : vector<7x32xf32> to vector<1x32xf32>
    %183 = vector.broadcast %182 : vector<1x32xf32> to vector<16x32xf32>
    %184 = arith.mulf %181, %183 : vector<16x32xf32>
    %185 = arith.addf %168, %184 : vector<16x32xf32>
    %c1_i32_75 = arith.constant 1 : i32
    %186 = tpu.dynamic_rotate %149 by %c1_i32_75 dim 0 : vector<16x32xf32>, i32 -> vector<16x32xf32>
    %187 = tpu.iota {dimensions = array<i32: 0>} : vector<16x32xi32>
    %c-1_i32_76 = arith.constant -1 : i32
    %188 = vector.broadcast %c-1_i32_76 : i32 to vector<16x32xi32>
    %189 = arith.addi %187, %188 : vector<16x32xi32>
    %c0_i32_77 = arith.constant 0 : i32
    %190 = vector.broadcast %c0_i32_77 : i32 to vector<16x32xi32>
    %191 = arith.cmpi sge, %189, %190 : vector<16x32xi32>
    %c-1_i32_78 = arith.constant -1 : i32
    %192 = vector.broadcast %c-1_i32_78 : i32 to vector<16x32xi32>
    %193 = arith.addi %187, %192 : vector<16x32xi32>
    %c9_i32_79 = arith.constant 9 : i32
    %194 = vector.broadcast %c9_i32_79 : i32 to vector<16x32xi32>
    %195 = arith.cmpi slt, %193, %194 : vector<16x32xi32>
    %196 = arith.andi %191, %195 : vector<16x32xi1>
    %cst_80 = arith.constant 0.000000e+00 : f32
    %197 = vector.broadcast %cst_80 : f32 to vector<16x32xf32>
    %198 = arith.select %196, %186, %197 : vector<16x32xi1>, vector<16x32xf32>
    %199 = vector.extract_strided_slice %150 {offsets = [2, 0], sizes = [1, 32], strides = [1, 1]} : vector<7x32xf32> to vector<1x32xf32>
    %200 = vector.broadcast %199 : vector<1x32xf32> to vector<16x32xf32>
    %201 = arith.mulf %198, %200 : vector<16x32xf32>
    %202 = arith.addf %185, %201 : vector<16x32xf32>
    %203 = tpu.iota {dimensions = array<i32: 0>} : vector<16x32xi32>
    %c0_i32_81 = arith.constant 0 : i32
    %204 = vector.broadcast %c0_i32_81 : i32 to vector<16x32xi32>
    %205 = arith.addi %203, %204 : vector<16x32xi32>
    %c0_i32_82 = arith.constant 0 : i32
    %206 = vector.broadcast %c0_i32_82 : i32 to vector<16x32xi32>
    %207 = arith.cmpi sge, %205, %206 : vector<16x32xi32>
    %c0_i32_83 = arith.constant 0 : i32
    %208 = vector.broadcast %c0_i32_83 : i32 to vector<16x32xi32>
    %209 = arith.addi %203, %208 : vector<16x32xi32>
    %c9_i32_84 = arith.constant 9 : i32
    %210 = vector.broadcast %c9_i32_84 : i32 to vector<16x32xi32>
    %211 = arith.cmpi slt, %209, %210 : vector<16x32xi32>
    %212 = arith.andi %207, %211 : vector<16x32xi1>
    %cst_85 = arith.constant 0.000000e+00 : f32
    %213 = vector.broadcast %cst_85 : f32 to vector<16x32xf32>
    %214 = arith.select %212, %149, %213 : vector<16x32xi1>, vector<16x32xf32>
    %215 = vector.extract_strided_slice %150 {offsets = [3, 0], sizes = [1, 32], strides = [1, 1]} : vector<7x32xf32> to vector<1x32xf32>
    %216 = vector.broadcast %215 : vector<1x32xf32> to vector<16x32xf32>
    %217 = arith.mulf %214, %216 : vector<16x32xf32>
    %218 = arith.addf %202, %217 : vector<16x32xf32>
    %c15_i32_86 = arith.constant 15 : i32
    %219 = tpu.dynamic_rotate %149 by %c15_i32_86 dim 0 : vector<16x32xf32>, i32 -> vector<16x32xf32>
    %220 = tpu.iota {dimensions = array<i32: 0>} : vector<16x32xi32>
    %c1_i32_87 = arith.constant 1 : i32
    %221 = vector.broadcast %c1_i32_87 : i32 to vector<16x32xi32>
    %222 = arith.addi %220, %221 : vector<16x32xi32>
    %c0_i32_88 = arith.constant 0 : i32
    %223 = vector.broadcast %c0_i32_88 : i32 to vector<16x32xi32>
    %224 = arith.cmpi sge, %222, %223 : vector<16x32xi32>
    %c1_i32_89 = arith.constant 1 : i32
    %225 = vector.broadcast %c1_i32_89 : i32 to vector<16x32xi32>
    %226 = arith.addi %220, %225 : vector<16x32xi32>
    %c9_i32_90 = arith.constant 9 : i32
    %227 = vector.broadcast %c9_i32_90 : i32 to vector<16x32xi32>
    %228 = arith.cmpi slt, %226, %227 : vector<16x32xi32>
    %229 = arith.andi %224, %228 : vector<16x32xi1>
    %cst_91 = arith.constant 0.000000e+00 : f32
    %230 = vector.broadcast %cst_91 : f32 to vector<16x32xf32>
    %231 = arith.select %229, %219, %230 : vector<16x32xi1>, vector<16x32xf32>
    %232 = vector.extract_strided_slice %150 {offsets = [4, 0], sizes = [1, 32], strides = [1, 1]} : vector<7x32xf32> to vector<1x32xf32>
    %233 = vector.broadcast %232 : vector<1x32xf32> to vector<16x32xf32>
    %234 = arith.mulf %231, %233 : vector<16x32xf32>
    %235 = arith.addf %218, %234 : vector<16x32xf32>
    %c14_i32_92 = arith.constant 14 : i32
    %236 = tpu.dynamic_rotate %149 by %c14_i32_92 dim 0 : vector<16x32xf32>, i32 -> vector<16x32xf32>
    %237 = tpu.iota {dimensions = array<i32: 0>} : vector<16x32xi32>
    %c2_i32_93 = arith.constant 2 : i32
    %238 = vector.broadcast %c2_i32_93 : i32 to vector<16x32xi32>
    %239 = arith.addi %237, %238 : vector<16x32xi32>
    %c0_i32_94 = arith.constant 0 : i32
    %240 = vector.broadcast %c0_i32_94 : i32 to vector<16x32xi32>
    %241 = arith.cmpi sge, %239, %240 : vector<16x32xi32>
    %c2_i32_95 = arith.constant 2 : i32
    %242 = vector.broadcast %c2_i32_95 : i32 to vector<16x32xi32>
    %243 = arith.addi %237, %242 : vector<16x32xi32>
    %c9_i32_96 = arith.constant 9 : i32
    %244 = vector.broadcast %c9_i32_96 : i32 to vector<16x32xi32>
    %245 = arith.cmpi slt, %243, %244 : vector<16x32xi32>
    %246 = arith.andi %241, %245 : vector<16x32xi1>
    %cst_97 = arith.constant 0.000000e+00 : f32
    %247 = vector.broadcast %cst_97 : f32 to vector<16x32xf32>
    %248 = arith.select %246, %236, %247 : vector<16x32xi1>, vector<16x32xf32>
    %249 = vector.extract_strided_slice %150 {offsets = [5, 0], sizes = [1, 32], strides = [1, 1]} : vector<7x32xf32> to vector<1x32xf32>
    %250 = vector.broadcast %249 : vector<1x32xf32> to vector<16x32xf32>
    %251 = arith.mulf %248, %250 : vector<16x32xf32>
    %252 = arith.addf %235, %251 : vector<16x32xf32>
    %c13_i32_98 = arith.constant 13 : i32
    %253 = tpu.dynamic_rotate %149 by %c13_i32_98 dim 0 : vector<16x32xf32>, i32 -> vector<16x32xf32>
    %254 = tpu.iota {dimensions = array<i32: 0>} : vector<16x32xi32>
    %c3_i32_99 = arith.constant 3 : i32
    %255 = vector.broadcast %c3_i32_99 : i32 to vector<16x32xi32>
    %256 = arith.addi %254, %255 : vector<16x32xi32>
    %c0_i32_100 = arith.constant 0 : i32
    %257 = vector.broadcast %c0_i32_100 : i32 to vector<16x32xi32>
    %258 = arith.cmpi sge, %256, %257 : vector<16x32xi32>
    %c3_i32_101 = arith.constant 3 : i32
    %259 = vector.broadcast %c3_i32_101 : i32 to vector<16x32xi32>
    %260 = arith.addi %254, %259 : vector<16x32xi32>
    %c9_i32_102 = arith.constant 9 : i32
    %261 = vector.broadcast %c9_i32_102 : i32 to vector<16x32xi32>
    %262 = arith.cmpi slt, %260, %261 : vector<16x32xi32>
    %263 = arith.andi %258, %262 : vector<16x32xi1>
    %cst_103 = arith.constant 0.000000e+00 : f32
    %264 = vector.broadcast %cst_103 : f32 to vector<16x32xf32>
    %265 = arith.select %263, %253, %264 : vector<16x32xi1>, vector<16x32xf32>
    %266 = vector.extract_strided_slice %150 {offsets = [6, 0], sizes = [1, 32], strides = [1, 1]} : vector<7x32xf32> to vector<1x32xf32>
    %267 = vector.broadcast %266 : vector<1x32xf32> to vector<16x32xf32>
    %268 = arith.mulf %265, %267 : vector<16x32xf32>
    %269 = arith.addf %252, %268 : vector<16x32xf32>
    %c0_104 = arith.constant 0 : index
    %c0_105 = arith.constant 0 : index
    %270 = vector.load %arg11[%c0_104, %c0_105] : memref<1x32xf32, #tpu.memory_space<vmem>>, vector<1x32xf32>
    %271 = vector.broadcast %270 : vector<1x32xf32> to vector<16x32xf32>
    %272 = arith.addf %269, %271 : vector<16x32xf32>
    %c0_106 = arith.constant 0 : index
    %c0_107 = arith.constant 0 : index
    %273 = vector.load %arg12[%c0_106, %c0_107] : memref<1x32xf32, #tpu.memory_space<vmem>>, vector<1x32xf32>
    %c0_108 = arith.constant 0 : index
    %c0_109 = arith.constant 0 : index
    %274 = vector.load %arg13[%c0_108, %c0_109] : memref<1x32xf32, #tpu.memory_space<vmem>>, vector<1x32xf32>
    %cst_110 = arith.constant dense<0.000000e+00> : vector<16xf32>
    %275 = vector.multi_reduction <add>, %272, %cst_110 [1] : vector<16x32xf32> to vector<16xf32>
    %276 = vector.shape_cast %275 : vector<16xf32> to vector<16x1xf32>
    %cst_111 = arith.constant 3.200000e+01 : f32
    %277 = vector.broadcast %cst_111 : f32 to vector<16x1xf32>
    %278 = arith.divf %276, %277 : vector<16x1xf32>
    %279 = vector.broadcast %278 : vector<16x1xf32> to vector<16x32xf32>
    %280 = arith.subf %272, %279 : vector<16x32xf32>
    %281 = arith.mulf %280, %280 : vector<16x32xf32>
    %cst_112 = arith.constant dense<0.000000e+00> : vector<16xf32>
    %282 = vector.multi_reduction <add>, %281, %cst_112 [1] : vector<16x32xf32> to vector<16xf32>
    %283 = vector.shape_cast %282 : vector<16xf32> to vector<16x1xf32>
    %cst_113 = arith.constant 3.200000e+01 : f32
    %284 = vector.broadcast %cst_113 : f32 to vector<16x1xf32>
    %285 = arith.divf %283, %284 : vector<16x1xf32>
    %286 = vector.broadcast %278 : vector<16x1xf32> to vector<16x32xf32>
    %287 = arith.subf %272, %286 : vector<16x32xf32>
    %cst_114 = arith.constant 9.99999997E-7 : f32
    %288 = vector.broadcast %cst_114 : f32 to vector<16x1xf32>
    %289 = arith.addf %285, %288 : vector<16x1xf32>
    %290 = math.rsqrt %289 : vector<16x1xf32>
    %291 = vector.broadcast %290 : vector<16x1xf32> to vector<16x32xf32>
    %292 = arith.mulf %287, %291 : vector<16x32xf32>
    %293 = vector.broadcast %273 : vector<1x32xf32> to vector<16x32xf32>
    %294 = arith.mulf %292, %293 : vector<16x32xf32>
    %295 = vector.broadcast %274 : vector<1x32xf32> to vector<16x32xf32>
    %296 = arith.addf %294, %295 : vector<16x32xf32>
    %c0_115 = arith.constant 0 : index
    %c0_116 = arith.constant 0 : index
    %297 = vector.load %arg14[%c0_115, %c0_116] : memref<32x64xf32, #tpu.memory_space<vmem>>, vector<32x64xf32>
    %cst_117 = arith.constant dense<0.000000e+00> : vector<16x64xf32>
    %298 = tpu.matmul %296, %297, %cst_117 {dimension_numbers = #tpu.dot_dimension_numbers<[1], [0], [0], [1], [0, 0, 1, 1], [], []>} : vector<16x32xf32>, vector<32x64xf32>, vector<16x64xf32> -> vector<16x64xf32>
    %c0_118 = arith.constant 0 : index
    %c0_119 = arith.constant 0 : index
    %299 = vector.load %arg15[%c0_118, %c0_119] : memref<1x64xf32, #tpu.memory_space<vmem>>, vector<1x64xf32>
    %300 = vector.broadcast %299 : vector<1x64xf32> to vector<16x64xf32>
    %301 = arith.addf %298, %300 : vector<16x64xf32>
    %cst_120 = arith.constant 5.000000e-01 : f32
    %302 = vector.broadcast %cst_120 : f32 to vector<16x64xf32>
    %303 = arith.mulf %302, %301 : vector<16x64xf32>
    %cst_121 = arith.constant 4.471500e-02 : f32
    %304 = vector.broadcast %cst_121 : f32 to vector<16x64xf32>
    %305 = arith.mulf %304, %301 : vector<16x64xf32>
    %306 = arith.mulf %305, %301 : vector<16x64xf32>
    %307 = arith.mulf %306, %301 : vector<16x64xf32>
    %308 = arith.addf %301, %307 : vector<16x64xf32>
    %cst_122 = arith.constant 0.797884583 : f32
    %309 = vector.broadcast %cst_122 : f32 to vector<16x64xf32>
    %310 = arith.mulf %309, %308 : vector<16x64xf32>
    %311 = math.tanh %310 : vector<16x64xf32>
    %cst_123 = arith.constant 1.000000e+00 : f32
    %312 = vector.broadcast %cst_123 : f32 to vector<16x64xf32>
    %313 = arith.addf %312, %311 : vector<16x64xf32>
    %314 = arith.mulf %303, %313 : vector<16x64xf32>
    %c0_124 = arith.constant 0 : index
    %c0_125 = arith.constant 0 : index
    %315 = vector.load %arg16[%c0_124, %c0_125] : memref<64x32xf32, #tpu.memory_space<vmem>>, vector<64x32xf32>
    %cst_126 = arith.constant dense<0.000000e+00> : vector<16x32xf32>
    %316 = tpu.matmul %314, %315, %cst_126 {dimension_numbers = #tpu.dot_dimension_numbers<[1], [0], [0], [1], [0, 0, 1, 1], [], []>} : vector<16x64xf32>, vector<64x32xf32>, vector<16x32xf32> -> vector<16x32xf32>
    %c0_127 = arith.constant 0 : index
    %c0_128 = arith.constant 0 : index
    %317 = vector.load %arg17[%c0_127, %c0_128] : memref<1x32xf32, #tpu.memory_space<vmem>>, vector<1x32xf32>
    %318 = vector.broadcast %317 : vector<1x32xf32> to vector<16x32xf32>
    %319 = arith.addf %316, %318 : vector<16x32xf32>
    %c0_129 = arith.constant 0 : index
    %c0_130 = arith.constant 0 : index
    %320 = vector.load %arg18[%c0_129, %c0_130] : memref<1x32xf32, #tpu.memory_space<vmem>>, vector<1x32xf32>
    %321 = vector.broadcast %320 : vector<1x32xf32> to vector<16x32xf32>
    %322 = arith.mulf %321, %319 : vector<16x32xf32>
    %323 = arith.addf %149, %322 : vector<16x32xf32>
    %c0_131 = arith.constant 0 : index
    %c0_132 = arith.constant 0 : index
    %324 = vector.load %arg19[%c0_131, %c0_132] : memref<7x32xf32, #tpu.memory_space<vmem>>, vector<7x32xf32>
    %cst_133 = arith.constant 0.000000e+00 : f32
    %325 = vector.broadcast %cst_133 : f32 to vector<16x32xf32>
    %c3_i32_134 = arith.constant 3 : i32
    %326 = tpu.dynamic_rotate %323 by %c3_i32_134 dim 0 : vector<16x32xf32>, i32 -> vector<16x32xf32>
    %327 = tpu.iota {dimensions = array<i32: 0>} : vector<16x32xi32>
    %c-3_i32_135 = arith.constant -3 : i32
    %328 = vector.broadcast %c-3_i32_135 : i32 to vector<16x32xi32>
    %329 = arith.addi %327, %328 : vector<16x32xi32>
    %c0_i32_136 = arith.constant 0 : i32
    %330 = vector.broadcast %c0_i32_136 : i32 to vector<16x32xi32>
    %331 = arith.cmpi sge, %329, %330 : vector<16x32xi32>
    %c-3_i32_137 = arith.constant -3 : i32
    %332 = vector.broadcast %c-3_i32_137 : i32 to vector<16x32xi32>
    %333 = arith.addi %327, %332 : vector<16x32xi32>
    %c9_i32_138 = arith.constant 9 : i32
    %334 = vector.broadcast %c9_i32_138 : i32 to vector<16x32xi32>
    %335 = arith.cmpi slt, %333, %334 : vector<16x32xi32>
    %336 = arith.andi %331, %335 : vector<16x32xi1>
    %cst_139 = arith.constant 0.000000e+00 : f32
    %337 = vector.broadcast %cst_139 : f32 to vector<16x32xf32>
    %338 = arith.select %336, %326, %337 : vector<16x32xi1>, vector<16x32xf32>
    %339 = vector.extract_strided_slice %324 {offsets = [0, 0], sizes = [1, 32], strides = [1, 1]} : vector<7x32xf32> to vector<1x32xf32>
    %340 = vector.broadcast %339 : vector<1x32xf32> to vector<16x32xf32>
    %341 = arith.mulf %338, %340 : vector<16x32xf32>
    %342 = arith.addf %325, %341 : vector<16x32xf32>
    %c2_i32_140 = arith.constant 2 : i32
    %343 = tpu.dynamic_rotate %323 by %c2_i32_140 dim 0 : vector<16x32xf32>, i32 -> vector<16x32xf32>
    %344 = tpu.iota {dimensions = array<i32: 0>} : vector<16x32xi32>
    %c-2_i32_141 = arith.constant -2 : i32
    %345 = vector.broadcast %c-2_i32_141 : i32 to vector<16x32xi32>
    %346 = arith.addi %344, %345 : vector<16x32xi32>
    %c0_i32_142 = arith.constant 0 : i32
    %347 = vector.broadcast %c0_i32_142 : i32 to vector<16x32xi32>
    %348 = arith.cmpi sge, %346, %347 : vector<16x32xi32>
    %c-2_i32_143 = arith.constant -2 : i32
    %349 = vector.broadcast %c-2_i32_143 : i32 to vector<16x32xi32>
    %350 = arith.addi %344, %349 : vector<16x32xi32>
    %c9_i32_144 = arith.constant 9 : i32
    %351 = vector.broadcast %c9_i32_144 : i32 to vector<16x32xi32>
    %352 = arith.cmpi slt, %350, %351 : vector<16x32xi32>
    %353 = arith.andi %348, %352 : vector<16x32xi1>
    %cst_145 = arith.constant 0.000000e+00 : f32
    %354 = vector.broadcast %cst_145 : f32 to vector<16x32xf32>
    %355 = arith.select %353, %343, %354 : vector<16x32xi1>, vector<16x32xf32>
    %356 = vector.extract_strided_slice %324 {offsets = [1, 0], sizes = [1, 32], strides = [1, 1]} : vector<7x32xf32> to vector<1x32xf32>
    %357 = vector.broadcast %356 : vector<1x32xf32> to vector<16x32xf32>
    %358 = arith.mulf %355, %357 : vector<16x32xf32>
    %359 = arith.addf %342, %358 : vector<16x32xf32>
    %c1_i32_146 = arith.constant 1 : i32
    %360 = tpu.dynamic_rotate %323 by %c1_i32_146 dim 0 : vector<16x32xf32>, i32 -> vector<16x32xf32>
    %361 = tpu.iota {dimensions = array<i32: 0>} : vector<16x32xi32>
    %c-1_i32_147 = arith.constant -1 : i32
    %362 = vector.broadcast %c-1_i32_147 : i32 to vector<16x32xi32>
    %363 = arith.addi %361, %362 : vector<16x32xi32>
    %c0_i32_148 = arith.constant 0 : i32
    %364 = vector.broadcast %c0_i32_148 : i32 to vector<16x32xi32>
    %365 = arith.cmpi sge, %363, %364 : vector<16x32xi32>
    %c-1_i32_149 = arith.constant -1 : i32
    %366 = vector.broadcast %c-1_i32_149 : i32 to vector<16x32xi32>
    %367 = arith.addi %361, %366 : vector<16x32xi32>
    %c9_i32_150 = arith.constant 9 : i32
    %368 = vector.broadcast %c9_i32_150 : i32 to vector<16x32xi32>
    %369 = arith.cmpi slt, %367, %368 : vector<16x32xi32>
    %370 = arith.andi %365, %369 : vector<16x32xi1>
    %cst_151 = arith.constant 0.000000e+00 : f32
    %371 = vector.broadcast %cst_151 : f32 to vector<16x32xf32>
    %372 = arith.select %370, %360, %371 : vector<16x32xi1>, vector<16x32xf32>
    %373 = vector.extract_strided_slice %324 {offsets = [2, 0], sizes = [1, 32], strides = [1, 1]} : vector<7x32xf32> to vector<1x32xf32>
    %374 = vector.broadcast %373 : vector<1x32xf32> to vector<16x32xf32>
    %375 = arith.mulf %372, %374 : vector<16x32xf32>
    %376 = arith.addf %359, %375 : vector<16x32xf32>
    %377 = tpu.iota {dimensions = array<i32: 0>} : vector<16x32xi32>
    %c0_i32_152 = arith.constant 0 : i32
    %378 = vector.broadcast %c0_i32_152 : i32 to vector<16x32xi32>
    %379 = arith.addi %377, %378 : vector<16x32xi32>
    %c0_i32_153 = arith.constant 0 : i32
    %380 = vector.broadcast %c0_i32_153 : i32 to vector<16x32xi32>
    %381 = arith.cmpi sge, %379, %380 : vector<16x32xi32>
    %c0_i32_154 = arith.constant 0 : i32
    %382 = vector.broadcast %c0_i32_154 : i32 to vector<16x32xi32>
    %383 = arith.addi %377, %382 : vector<16x32xi32>
    %c9_i32_155 = arith.constant 9 : i32
    %384 = vector.broadcast %c9_i32_155 : i32 to vector<16x32xi32>
    %385 = arith.cmpi slt, %383, %384 : vector<16x32xi32>
    %386 = arith.andi %381, %385 : vector<16x32xi1>
    %cst_156 = arith.constant 0.000000e+00 : f32
    %387 = vector.broadcast %cst_156 : f32 to vector<16x32xf32>
    %388 = arith.select %386, %323, %387 : vector<16x32xi1>, vector<16x32xf32>
    %389 = vector.extract_strided_slice %324 {offsets = [3, 0], sizes = [1, 32], strides = [1, 1]} : vector<7x32xf32> to vector<1x32xf32>
    %390 = vector.broadcast %389 : vector<1x32xf32> to vector<16x32xf32>
    %391 = arith.mulf %388, %390 : vector<16x32xf32>
    %392 = arith.addf %376, %391 : vector<16x32xf32>
    %c15_i32_157 = arith.constant 15 : i32
    %393 = tpu.dynamic_rotate %323 by %c15_i32_157 dim 0 : vector<16x32xf32>, i32 -> vector<16x32xf32>
    %394 = tpu.iota {dimensions = array<i32: 0>} : vector<16x32xi32>
    %c1_i32_158 = arith.constant 1 : i32
    %395 = vector.broadcast %c1_i32_158 : i32 to vector<16x32xi32>
    %396 = arith.addi %394, %395 : vector<16x32xi32>
    %c0_i32_159 = arith.constant 0 : i32
    %397 = vector.broadcast %c0_i32_159 : i32 to vector<16x32xi32>
    %398 = arith.cmpi sge, %396, %397 : vector<16x32xi32>
    %c1_i32_160 = arith.constant 1 : i32
    %399 = vector.broadcast %c1_i32_160 : i32 to vector<16x32xi32>
    %400 = arith.addi %394, %399 : vector<16x32xi32>
    %c9_i32_161 = arith.constant 9 : i32
    %401 = vector.broadcast %c9_i32_161 : i32 to vector<16x32xi32>
    %402 = arith.cmpi slt, %400, %401 : vector<16x32xi32>
    %403 = arith.andi %398, %402 : vector<16x32xi1>
    %cst_162 = arith.constant 0.000000e+00 : f32
    %404 = vector.broadcast %cst_162 : f32 to vector<16x32xf32>
    %405 = arith.select %403, %393, %404 : vector<16x32xi1>, vector<16x32xf32>
    %406 = vector.extract_strided_slice %324 {offsets = [4, 0], sizes = [1, 32], strides = [1, 1]} : vector<7x32xf32> to vector<1x32xf32>
    %407 = vector.broadcast %406 : vector<1x32xf32> to vector<16x32xf32>
    %408 = arith.mulf %405, %407 : vector<16x32xf32>
    %409 = arith.addf %392, %408 : vector<16x32xf32>
    %c14_i32_163 = arith.constant 14 : i32
    %410 = tpu.dynamic_rotate %323 by %c14_i32_163 dim 0 : vector<16x32xf32>, i32 -> vector<16x32xf32>
    %411 = tpu.iota {dimensions = array<i32: 0>} : vector<16x32xi32>
    %c2_i32_164 = arith.constant 2 : i32
    %412 = vector.broadcast %c2_i32_164 : i32 to vector<16x32xi32>
    %413 = arith.addi %411, %412 : vector<16x32xi32>
    %c0_i32_165 = arith.constant 0 : i32
    %414 = vector.broadcast %c0_i32_165 : i32 to vector<16x32xi32>
    %415 = arith.cmpi sge, %413, %414 : vector<16x32xi32>
    %c2_i32_166 = arith.constant 2 : i32
    %416 = vector.broadcast %c2_i32_166 : i32 to vector<16x32xi32>
    %417 = arith.addi %411, %416 : vector<16x32xi32>
    %c9_i32_167 = arith.constant 9 : i32
    %418 = vector.broadcast %c9_i32_167 : i32 to vector<16x32xi32>
    %419 = arith.cmpi slt, %417, %418 : vector<16x32xi32>
    %420 = arith.andi %415, %419 : vector<16x32xi1>
    %cst_168 = arith.constant 0.000000e+00 : f32
    %421 = vector.broadcast %cst_168 : f32 to vector<16x32xf32>
    %422 = arith.select %420, %410, %421 : vector<16x32xi1>, vector<16x32xf32>
    %423 = vector.extract_strided_slice %324 {offsets = [5, 0], sizes = [1, 32], strides = [1, 1]} : vector<7x32xf32> to vector<1x32xf32>
    %424 = vector.broadcast %423 : vector<1x32xf32> to vector<16x32xf32>
    %425 = arith.mulf %422, %424 : vector<16x32xf32>
    %426 = arith.addf %409, %425 : vector<16x32xf32>
    %c13_i32_169 = arith.constant 13 : i32
    %427 = tpu.dynamic_rotate %323 by %c13_i32_169 dim 0 : vector<16x32xf32>, i32 -> vector<16x32xf32>
    %428 = tpu.iota {dimensions = array<i32: 0>} : vector<16x32xi32>
    %c3_i32_170 = arith.constant 3 : i32
    %429 = vector.broadcast %c3_i32_170 : i32 to vector<16x32xi32>
    %430 = arith.addi %428, %429 : vector<16x32xi32>
    %c0_i32_171 = arith.constant 0 : i32
    %431 = vector.broadcast %c0_i32_171 : i32 to vector<16x32xi32>
    %432 = arith.cmpi sge, %430, %431 : vector<16x32xi32>
    %c3_i32_172 = arith.constant 3 : i32
    %433 = vector.broadcast %c3_i32_172 : i32 to vector<16x32xi32>
    %434 = arith.addi %428, %433 : vector<16x32xi32>
    %c9_i32_173 = arith.constant 9 : i32
    %435 = vector.broadcast %c9_i32_173 : i32 to vector<16x32xi32>
    %436 = arith.cmpi slt, %434, %435 : vector<16x32xi32>
    %437 = arith.andi %432, %436 : vector<16x32xi1>
    %cst_174 = arith.constant 0.000000e+00 : f32
    %438 = vector.broadcast %cst_174 : f32 to vector<16x32xf32>
    %439 = arith.select %437, %427, %438 : vector<16x32xi1>, vector<16x32xf32>
    %440 = vector.extract_strided_slice %324 {offsets = [6, 0], sizes = [1, 32], strides = [1, 1]} : vector<7x32xf32> to vector<1x32xf32>
    %441 = vector.broadcast %440 : vector<1x32xf32> to vector<16x32xf32>
    %442 = arith.mulf %439, %441 : vector<16x32xf32>
    %443 = arith.addf %426, %442 : vector<16x32xf32>
    %c0_175 = arith.constant 0 : index
    %c0_176 = arith.constant 0 : index
    %444 = vector.load %arg20[%c0_175, %c0_176] : memref<1x32xf32, #tpu.memory_space<vmem>>, vector<1x32xf32>
    %445 = vector.broadcast %444 : vector<1x32xf32> to vector<16x32xf32>
    %446 = arith.addf %443, %445 : vector<16x32xf32>
    %c0_177 = arith.constant 0 : index
    %c0_178 = arith.constant 0 : index
    %447 = vector.load %arg21[%c0_177, %c0_178] : memref<1x32xf32, #tpu.memory_space<vmem>>, vector<1x32xf32>
    %c0_179 = arith.constant 0 : index
    %c0_180 = arith.constant 0 : index
    %448 = vector.load %arg22[%c0_179, %c0_180] : memref<1x32xf32, #tpu.memory_space<vmem>>, vector<1x32xf32>
    %cst_181 = arith.constant dense<0.000000e+00> : vector<16xf32>
    %449 = vector.multi_reduction <add>, %446, %cst_181 [1] : vector<16x32xf32> to vector<16xf32>
    %450 = vector.shape_cast %449 : vector<16xf32> to vector<16x1xf32>
    %cst_182 = arith.constant 3.200000e+01 : f32
    %451 = vector.broadcast %cst_182 : f32 to vector<16x1xf32>
    %452 = arith.divf %450, %451 : vector<16x1xf32>
    %453 = vector.broadcast %452 : vector<16x1xf32> to vector<16x32xf32>
    %454 = arith.subf %446, %453 : vector<16x32xf32>
    %455 = arith.mulf %454, %454 : vector<16x32xf32>
    %cst_183 = arith.constant dense<0.000000e+00> : vector<16xf32>
    %456 = vector.multi_reduction <add>, %455, %cst_183 [1] : vector<16x32xf32> to vector<16xf32>
    %457 = vector.shape_cast %456 : vector<16xf32> to vector<16x1xf32>
    %cst_184 = arith.constant 3.200000e+01 : f32
    %458 = vector.broadcast %cst_184 : f32 to vector<16x1xf32>
    %459 = arith.divf %457, %458 : vector<16x1xf32>
    %460 = vector.broadcast %452 : vector<16x1xf32> to vector<16x32xf32>
    %461 = arith.subf %446, %460 : vector<16x32xf32>
    %cst_185 = arith.constant 9.99999997E-7 : f32
    %462 = vector.broadcast %cst_185 : f32 to vector<16x1xf32>
    %463 = arith.addf %459, %462 : vector<16x1xf32>
    %464 = math.rsqrt %463 : vector<16x1xf32>
    %465 = vector.broadcast %464 : vector<16x1xf32> to vector<16x32xf32>
    %466 = arith.mulf %461, %465 : vector<16x32xf32>
    %467 = vector.broadcast %447 : vector<1x32xf32> to vector<16x32xf32>
    %468 = arith.mulf %466, %467 : vector<16x32xf32>
    %469 = vector.broadcast %448 : vector<1x32xf32> to vector<16x32xf32>
    %470 = arith.addf %468, %469 : vector<16x32xf32>
    %c0_186 = arith.constant 0 : index
    %c0_187 = arith.constant 0 : index
    %471 = vector.load %arg23[%c0_186, %c0_187] : memref<32x64xf32, #tpu.memory_space<vmem>>, vector<32x64xf32>
    %cst_188 = arith.constant dense<0.000000e+00> : vector<16x64xf32>
    %472 = tpu.matmul %470, %471, %cst_188 {dimension_numbers = #tpu.dot_dimension_numbers<[1], [0], [0], [1], [0, 0, 1, 1], [], []>} : vector<16x32xf32>, vector<32x64xf32>, vector<16x64xf32> -> vector<16x64xf32>
    %c0_189 = arith.constant 0 : index
    %c0_190 = arith.constant 0 : index
    %473 = vector.load %arg24[%c0_189, %c0_190] : memref<1x64xf32, #tpu.memory_space<vmem>>, vector<1x64xf32>
    %474 = vector.broadcast %473 : vector<1x64xf32> to vector<16x64xf32>
    %475 = arith.addf %472, %474 : vector<16x64xf32>
    %cst_191 = arith.constant 5.000000e-01 : f32
    %476 = vector.broadcast %cst_191 : f32 to vector<16x64xf32>
    %477 = arith.mulf %476, %475 : vector<16x64xf32>
    %cst_192 = arith.constant 4.471500e-02 : f32
    %478 = vector.broadcast %cst_192 : f32 to vector<16x64xf32>
    %479 = arith.mulf %478, %475 : vector<16x64xf32>
    %480 = arith.mulf %479, %475 : vector<16x64xf32>
    %481 = arith.mulf %480, %475 : vector<16x64xf32>
    %482 = arith.addf %475, %481 : vector<16x64xf32>
    %cst_193 = arith.constant 0.797884583 : f32
    %483 = vector.broadcast %cst_193 : f32 to vector<16x64xf32>
    %484 = arith.mulf %483, %482 : vector<16x64xf32>
    %485 = math.tanh %484 : vector<16x64xf32>
    %cst_194 = arith.constant 1.000000e+00 : f32
    %486 = vector.broadcast %cst_194 : f32 to vector<16x64xf32>
    %487 = arith.addf %486, %485 : vector<16x64xf32>
    %488 = arith.mulf %477, %487 : vector<16x64xf32>
    %c0_195 = arith.constant 0 : index
    %c0_196 = arith.constant 0 : index
    %489 = vector.load %arg25[%c0_195, %c0_196] : memref<64x32xf32, #tpu.memory_space<vmem>>, vector<64x32xf32>
    %cst_197 = arith.constant dense<0.000000e+00> : vector<16x32xf32>
    %490 = tpu.matmul %488, %489, %cst_197 {dimension_numbers = #tpu.dot_dimension_numbers<[1], [0], [0], [1], [0, 0, 1, 1], [], []>} : vector<16x64xf32>, vector<64x32xf32>, vector<16x32xf32> -> vector<16x32xf32>
    %c0_198 = arith.constant 0 : index
    %c0_199 = arith.constant 0 : index
    %491 = vector.load %arg26[%c0_198, %c0_199] : memref<1x32xf32, #tpu.memory_space<vmem>>, vector<1x32xf32>
    %492 = vector.broadcast %491 : vector<1x32xf32> to vector<16x32xf32>
    %493 = arith.addf %490, %492 : vector<16x32xf32>
    %c0_200 = arith.constant 0 : index
    %c0_201 = arith.constant 0 : index
    %494 = vector.load %arg27[%c0_200, %c0_201] : memref<1x32xf32, #tpu.memory_space<vmem>>, vector<1x32xf32>
    %495 = vector.broadcast %494 : vector<1x32xf32> to vector<16x32xf32>
    %496 = arith.mulf %495, %493 : vector<16x32xf32>
    %497 = arith.addf %323, %496 : vector<16x32xf32>
    %c0_202 = arith.constant 0 : index
    %c0_203 = arith.constant 0 : index
    %498 = vector.load %arg28[%c0_202, %c0_203] : memref<1x32xf32, #tpu.memory_space<vmem>>, vector<1x32xf32>
    %c0_204 = arith.constant 0 : index
    %c0_205 = arith.constant 0 : index
    %499 = vector.load %arg29[%c0_204, %c0_205] : memref<1x32xf32, #tpu.memory_space<vmem>>, vector<1x32xf32>
    %cst_206 = arith.constant dense<0.000000e+00> : vector<16xf32>
    %500 = vector.multi_reduction <add>, %497, %cst_206 [1] : vector<16x32xf32> to vector<16xf32>
    %501 = vector.shape_cast %500 : vector<16xf32> to vector<16x1xf32>
    %cst_207 = arith.constant 3.200000e+01 : f32
    %502 = vector.broadcast %cst_207 : f32 to vector<16x1xf32>
    %503 = arith.divf %501, %502 : vector<16x1xf32>
    %504 = vector.broadcast %503 : vector<16x1xf32> to vector<16x32xf32>
    %505 = arith.subf %497, %504 : vector<16x32xf32>
    %506 = arith.mulf %505, %505 : vector<16x32xf32>
    %cst_208 = arith.constant dense<0.000000e+00> : vector<16xf32>
    %507 = vector.multi_reduction <add>, %506, %cst_208 [1] : vector<16x32xf32> to vector<16xf32>
    %508 = vector.shape_cast %507 : vector<16xf32> to vector<16x1xf32>
    %cst_209 = arith.constant 3.200000e+01 : f32
    %509 = vector.broadcast %cst_209 : f32 to vector<16x1xf32>
    %510 = arith.divf %508, %509 : vector<16x1xf32>
    %511 = vector.broadcast %503 : vector<16x1xf32> to vector<16x32xf32>
    %512 = arith.subf %497, %511 : vector<16x32xf32>
    %cst_210 = arith.constant 9.99999997E-7 : f32
    %513 = vector.broadcast %cst_210 : f32 to vector<16x1xf32>
    %514 = arith.addf %510, %513 : vector<16x1xf32>
    %515 = math.rsqrt %514 : vector<16x1xf32>
    %516 = vector.broadcast %515 : vector<16x1xf32> to vector<16x32xf32>
    %517 = arith.mulf %512, %516 : vector<16x32xf32>
    %518 = vector.broadcast %498 : vector<1x32xf32> to vector<16x32xf32>
    %519 = arith.mulf %517, %518 : vector<16x32xf32>
    %520 = vector.broadcast %499 : vector<1x32xf32> to vector<16x32xf32>
    %521 = arith.addf %519, %520 : vector<16x32xf32>
    %c0_211 = arith.constant 0 : index
    %c0_212 = arith.constant 0 : index
    %522 = vector.load %arg30[%c0_211, %c0_212] : memref<32x17xf32, #tpu.memory_space<vmem>>, vector<32x17xf32>
    %cst_213 = arith.constant dense<0.000000e+00> : vector<16x17xf32>
    %523 = tpu.matmul %521, %522, %cst_213 {dimension_numbers = #tpu.dot_dimension_numbers<[1], [0], [0], [1], [0, 0, 1, 1], [], []>} : vector<16x32xf32>, vector<32x17xf32>, vector<16x17xf32> -> vector<16x17xf32>
    %c0_214 = arith.constant 0 : index
    %c0_215 = arith.constant 0 : index
    %524 = vector.load %arg31[%c0_214, %c0_215] : memref<1x17xf32, #tpu.memory_space<vmem>>, vector<1x17xf32>
    %525 = vector.broadcast %524 : vector<1x17xf32> to vector<16x17xf32>
    %526 = arith.addf %523, %525 : vector<16x17xf32>
    %c0_216 = arith.constant 0 : index
    %c0_217 = arith.constant 0 : index
    %527 = vector.load %arg32[%c0_216, %c0_217] : memref<32x17xf32, #tpu.memory_space<vmem>>, vector<32x17xf32>
    %cst_218 = arith.constant dense<0.000000e+00> : vector<16x17xf32>
    %528 = tpu.matmul %521, %527, %cst_218 {dimension_numbers = #tpu.dot_dimension_numbers<[1], [0], [0], [1], [0, 0, 1, 1], [], []>} : vector<16x32xf32>, vector<32x17xf32>, vector<16x17xf32> -> vector<16x17xf32>
    %c0_219 = arith.constant 0 : index
    %c0_220 = arith.constant 0 : index
    %529 = vector.load %arg33[%c0_219, %c0_220] : memref<1x17xf32, #tpu.memory_space<vmem>>, vector<1x17xf32>
    %530 = vector.broadcast %529 : vector<1x17xf32> to vector<16x17xf32>
    %531 = arith.addf %528, %530 : vector<16x17xf32>
    %532 = math.exp %526 : vector<16x17xf32>
    %cst_221 = arith.constant 1.000000e+02 : f32
    %533 = vector.broadcast %cst_221 : f32 to vector<16x17xf32>
    %534 = arith.minimumf %532, %533 : vector<16x17xf32>
    %535 = math.cos %531 : vector<16x17xf32>
    %536 = arith.mulf %534, %535 : vector<16x17xf32>
    %c0_222 = arith.constant 0 : index
    %c0_223 = arith.constant 0 : index
    %537 = vector.load %arg34[%c0_222, %c0_223] : memref<17x32xf32, #tpu.memory_space<vmem>>, vector<17x32xf32>
    %cst_224 = arith.constant dense<0.000000e+00> : vector<16x32xf32>
    %538 = tpu.matmul %536, %537, %cst_224 {dimension_numbers = #tpu.dot_dimension_numbers<[1], [0], [0], [1], [0, 0, 1, 1], [], []>} : vector<16x17xf32>, vector<17x32xf32>, vector<16x32xf32> -> vector<16x32xf32>
    %539 = math.sin %531 : vector<16x17xf32>
    %540 = arith.mulf %534, %539 : vector<16x17xf32>
    %c0_225 = arith.constant 0 : index
    %c0_226 = arith.constant 0 : index
    %541 = vector.load %arg35[%c0_225, %c0_226] : memref<17x32xf32, #tpu.memory_space<vmem>>, vector<17x32xf32>
    %cst_227 = arith.constant dense<0.000000e+00> : vector<16x32xf32>
    %542 = tpu.matmul %540, %541, %cst_227 {dimension_numbers = #tpu.dot_dimension_numbers<[1], [0], [0], [1], [0, 0, 1, 1], [], []>} : vector<16x17xf32>, vector<17x32xf32>, vector<16x32xf32> -> vector<16x32xf32>
    %543 = arith.addf %538, %542 : vector<16x32xf32>
    %544 = tpu.iota {dimensions = array<i32: 0>} : vector<16x32xi32>
    %c9_i32_228 = arith.constant 9 : i32
    %545 = vector.broadcast %c9_i32_228 : i32 to vector<16x32xi32>
    %546 = arith.cmpi slt, %544, %545 : vector<16x32xi32>
    %cst_229 = arith.constant 0.000000e+00 : f32
    %547 = vector.broadcast %cst_229 : f32 to vector<16x32xf32>
    %548 = arith.select %546, %543, %547 : vector<16x32xi1>, vector<16x32xf32>
    %cst_230 = arith.constant 0.000000e+00 : f32
    %549 = vector.broadcast %cst_230 : f32 to vector<16x8xf32>
    %550 = vector.extract_strided_slice %548 {offsets = [0, 0], sizes = [16, 8], strides = [1, 1]} : vector<16x32xf32> to vector<16x8xf32>
    %551 = tpu.iota {dimensions = array<i32: 0>} : vector<16x8xi32>
    %c0_i32_231 = arith.constant 0 : i32
    %552 = vector.broadcast %c0_i32_231 : i32 to vector<16x8xi32>
    %553 = arith.addi %551, %552 : vector<16x8xi32>
    %c0_i32_232 = arith.constant 0 : i32
    %554 = vector.broadcast %c0_i32_232 : i32 to vector<16x8xi32>
    %555 = arith.cmpi sge, %553, %554 : vector<16x8xi32>
    %c0_i32_233 = arith.constant 0 : i32
    %556 = vector.broadcast %c0_i32_233 : i32 to vector<16x8xi32>
    %557 = arith.addi %551, %556 : vector<16x8xi32>
    %c9_i32_234 = arith.constant 9 : i32
    %558 = vector.broadcast %c9_i32_234 : i32 to vector<16x8xi32>
    %559 = arith.cmpi slt, %557, %558 : vector<16x8xi32>
    %560 = arith.andi %555, %559 : vector<16x8xi1>
    %cst_235 = arith.constant 0.000000e+00 : f32
    %561 = vector.broadcast %cst_235 : f32 to vector<16x8xf32>
    %562 = arith.select %560, %550, %561 : vector<16x8xi1>, vector<16x8xf32>
    %563 = arith.addf %549, %562 : vector<16x8xf32>
    %564 = vector.extract_strided_slice %548 {offsets = [0, 8], sizes = [16, 8], strides = [1, 1]} : vector<16x32xf32> to vector<16x8xf32>
    %c1_i32_236 = arith.constant 1 : i32
    %565 = tpu.dynamic_rotate %564 by %c1_i32_236 dim 0 : vector<16x8xf32>, i32 -> vector<16x8xf32>
    %566 = tpu.iota {dimensions = array<i32: 0>} : vector<16x8xi32>
    %c-1_i32_237 = arith.constant -1 : i32
    %567 = vector.broadcast %c-1_i32_237 : i32 to vector<16x8xi32>
    %568 = arith.addi %566, %567 : vector<16x8xi32>
    %c0_i32_238 = arith.constant 0 : i32
    %569 = vector.broadcast %c0_i32_238 : i32 to vector<16x8xi32>
    %570 = arith.cmpi sge, %568, %569 : vector<16x8xi32>
    %c-1_i32_239 = arith.constant -1 : i32
    %571 = vector.broadcast %c-1_i32_239 : i32 to vector<16x8xi32>
    %572 = arith.addi %566, %571 : vector<16x8xi32>
    %c9_i32_240 = arith.constant 9 : i32
    %573 = vector.broadcast %c9_i32_240 : i32 to vector<16x8xi32>
    %574 = arith.cmpi slt, %572, %573 : vector<16x8xi32>
    %575 = arith.andi %570, %574 : vector<16x8xi1>
    %cst_241 = arith.constant 0.000000e+00 : f32
    %576 = vector.broadcast %cst_241 : f32 to vector<16x8xf32>
    %577 = arith.select %575, %565, %576 : vector<16x8xi1>, vector<16x8xf32>
    %578 = arith.addf %563, %577 : vector<16x8xf32>
    %579 = vector.extract_strided_slice %548 {offsets = [0, 16], sizes = [16, 8], strides = [1, 1]} : vector<16x32xf32> to vector<16x8xf32>
    %c2_i32_242 = arith.constant 2 : i32
    %580 = tpu.dynamic_rotate %579 by %c2_i32_242 dim 0 : vector<16x8xf32>, i32 -> vector<16x8xf32>
    %581 = tpu.iota {dimensions = array<i32: 0>} : vector<16x8xi32>
    %c-2_i32_243 = arith.constant -2 : i32
    %582 = vector.broadcast %c-2_i32_243 : i32 to vector<16x8xi32>
    %583 = arith.addi %581, %582 : vector<16x8xi32>
    %c0_i32_244 = arith.constant 0 : i32
    %584 = vector.broadcast %c0_i32_244 : i32 to vector<16x8xi32>
    %585 = arith.cmpi sge, %583, %584 : vector<16x8xi32>
    %c-2_i32_245 = arith.constant -2 : i32
    %586 = vector.broadcast %c-2_i32_245 : i32 to vector<16x8xi32>
    %587 = arith.addi %581, %586 : vector<16x8xi32>
    %c9_i32_246 = arith.constant 9 : i32
    %588 = vector.broadcast %c9_i32_246 : i32 to vector<16x8xi32>
    %589 = arith.cmpi slt, %587, %588 : vector<16x8xi32>
    %590 = arith.andi %585, %589 : vector<16x8xi1>
    %cst_247 = arith.constant 0.000000e+00 : f32
    %591 = vector.broadcast %cst_247 : f32 to vector<16x8xf32>
    %592 = arith.select %590, %580, %591 : vector<16x8xi1>, vector<16x8xf32>
    %593 = arith.addf %578, %592 : vector<16x8xf32>
    %594 = vector.extract_strided_slice %548 {offsets = [0, 24], sizes = [16, 8], strides = [1, 1]} : vector<16x32xf32> to vector<16x8xf32>
    %c3_i32_248 = arith.constant 3 : i32
    %595 = tpu.dynamic_rotate %594 by %c3_i32_248 dim 0 : vector<16x8xf32>, i32 -> vector<16x8xf32>
    %596 = tpu.iota {dimensions = array<i32: 0>} : vector<16x8xi32>
    %c-3_i32_249 = arith.constant -3 : i32
    %597 = vector.broadcast %c-3_i32_249 : i32 to vector<16x8xi32>
    %598 = arith.addi %596, %597 : vector<16x8xi32>
    %c0_i32_250 = arith.constant 0 : i32
    %599 = vector.broadcast %c0_i32_250 : i32 to vector<16x8xi32>
    %600 = arith.cmpi sge, %598, %599 : vector<16x8xi32>
    %c-3_i32_251 = arith.constant -3 : i32
    %601 = vector.broadcast %c-3_i32_251 : i32 to vector<16x8xi32>
    %602 = arith.addi %596, %601 : vector<16x8xi32>
    %c9_i32_252 = arith.constant 9 : i32
    %603 = vector.broadcast %c9_i32_252 : i32 to vector<16x8xi32>
    %604 = arith.cmpi slt, %602, %603 : vector<16x8xi32>
    %605 = arith.andi %600, %604 : vector<16x8xi1>
    %cst_253 = arith.constant 0.000000e+00 : f32
    %606 = vector.broadcast %cst_253 : f32 to vector<16x8xf32>
    %607 = arith.select %605, %595, %606 : vector<16x8xi1>, vector<16x8xf32>
    %608 = arith.addf %593, %607 : vector<16x8xf32>
    %609 = vector.extract_strided_slice %608 {offsets = [2, 0], sizes = [8, 8], strides = [1, 1]} : vector<16x8xf32> to vector<8x8xf32>
    %c0_254 = arith.constant 0 : index
    %c0_255 = arith.constant 0 : index
    %610 = vector.load %arg36[%c0_254, %c0_255] : memref<8x8xf32, #tpu.memory_space<vmem>>, vector<8x8xf32>
    %611 = arith.mulf %609, %610 : vector<8x8xf32>
    %c0_256 = arith.constant 0 : index
    %c0_257 = arith.constant 0 : index
    %c0_258 = arith.constant 0 : index
    %612 = vector.load %arg37[%c0_256, %c0_257, %c0_258] : memref<1x8x8xf32, #tpu.memory_space<vmem>>, vector<1x8x8xf32>
    %613 = vector.shape_cast %612 : vector<1x8x8xf32> to vector<8x8xf32>
    %614 = vector.shape_cast %611 : vector<8x8xf32> to vector<1x8x8xf32>
    tpu.vector_store %arg37[%c0_256, %c0_257, %c0_258], %614 {strides = array<i32>} : memref<1x8x8xf32, #tpu.memory_space<vmem>>, vector<1x8x8xf32>,
    return
  }
  func.func @transform_0(%arg0: i32) -> (i32, i32, i32) {
    %c0_i32 = arith.constant 0 : i32
    %c0_i32_0 = arith.constant 0 : i32
    %c0_i32_1 = arith.constant 0 : i32
    return %arg0, %c0_i32, %c0_i32_0 : i32, i32, i32
  }
  func.func @transform_1(%arg0: i32) -> (i32, i32) {
    %c0_i32 = arith.constant 0 : i32
    %c0_i32_0 = arith.constant 0 : i32
    %c0_i32_1 = arith.constant 0 : i32
    return %c0_i32, %c0_i32_0 : i32, i32
  }
  func.func @transform_2(%arg0: i32) -> (i32, i32) {
    %c0_i32 = arith.constant 0 : i32
    %c0_i32_0 = arith.constant 0 : i32
    %c0_i32_1 = arith.constant 0 : i32
    return %c0_i32, %c0_i32_0 : i32, i32
  }
  func.func @transform_3(%arg0: i32) -> (i32, i32) {
    %c0_i32 = arith.constant 0 : i32
    %c0_i32_0 = arith.constant 0 : i32
    %c0_i32_1 = arith.constant 0 : i32
    return %c0_i32, %c0_i32_0 : i32, i32
  }
  func.func @transform_4(%arg0: i32) -> (i32, i32) {
    %c0_i32 = arith.constant 0 : i32
    %c0_i32_0 = arith.constant 0 : i32
    %c0_i32_1 = arith.constant 0 : i32
    return %c0_i32, %c0_i32_0 : i32, i32
  }
  func.func @transform_5(%arg0: i32) -> (i32, i32) {
    %c0_i32 = arith.constant 0 : i32
    %c0_i32_0 = arith.constant 0 : i32
    %c0_i32_1 = arith.constant 0 : i32
    return %c0_i32, %c0_i32_0 : i32, i32
  }
  func.func @transform_6(%arg0: i32) -> (i32, i32) {
    %c0_i32 = arith.constant 0 : i32
    %c0_i32_0 = arith.constant 0 : i32
    %c0_i32_1 = arith.constant 0 : i32
    return %c0_i32, %c0_i32_0 : i32, i32
  }
  func.func @transform_7(%arg0: i32) -> (i32, i32) {
    %c0_i32 = arith.constant 0 : i32
    %c0_i32_0 = arith.constant 0 : i32
    %c0_i32_1 = arith.constant 0 : i32
    return %c0_i32, %c0_i32_0 : i32, i32
  }
  func.func @transform_8(%arg0: i32) -> (i32, i32) {
    %c0_i32 = arith.constant 0 : i32
    %c0_i32_0 = arith.constant 0 : i32
    %c0_i32_1 = arith.constant 0 : i32
    return %c0_i32, %c0_i32_0 : i32, i32
  }
  func.func @transform_9(%arg0: i32) -> (i32, i32) {
    %c0_i32 = arith.constant 0 : i32
    %c0_i32_0 = arith.constant 0 : i32
    %c0_i32_1 = arith.constant 0 : i32
    return %c0_i32, %c0_i32_0 : i32, i32
  }
  func.func @transform_10(%arg0: i32) -> (i32, i32) {
    %c0_i32 = arith.constant 0 : i32
    %c0_i32_0 = arith.constant 0 : i32
    %c0_i32_1 = arith.constant 0 : i32
    return %c0_i32, %c0_i32_0 : i32, i32
  }
  func.func @transform_11(%arg0: i32) -> (i32, i32) {
    %c0_i32 = arith.constant 0 : i32
    %c0_i32_0 = arith.constant 0 : i32
    %c0_i32_1 = arith.constant 0 : i32
    return %c0_i32, %c0_i32_0 : i32, i32
  }
  func.func @transform_12(%arg0: i32) -> (i32, i32) {
    %c0_i32 = arith.constant 0 : i32
    %c0_i32_0 = arith.constant 0 : i32
    %c0_i32_1 = arith.constant 0 : i32
    return %c0_i32, %c0_i32_0 : i32, i32
  }
  func.func @transform_13(%arg0: i32) -> (i32, i32) {
    %c0_i32 = arith.constant 0 : i32
    %c0_i32_0 = arith.constant 0 : i32
    %c0_i32_1 = arith.constant 0 : i32
    return %c0_i32, %c0_i32_0 : i32, i32
  }
  func.func @transform_14(%arg0: i32) -> (i32, i32) {
    %c0_i32 = arith.constant 0 : i32
    %c0_i32_0 = arith.constant 0 : i32
    %c0_i32_1 = arith.constant 0 : i32
    return %c0_i32, %c0_i32_0 : i32, i32
  }
  func.func @transform_15(%arg0: i32) -> (i32, i32) {
    %c0_i32 = arith.constant 0 : i32
    %c0_i32_0 = arith.constant 0 : i32
    %c0_i32_1 = arith.constant 0 : i32
    return %c0_i32, %c0_i32_0 : i32, i32
  }
  func.func @transform_16(%arg0: i32) -> (i32, i32) {
    %c0_i32 = arith.constant 0 : i32
    %c0_i32_0 = arith.constant 0 : i32
    %c0_i32_1 = arith.constant 0 : i32
    return %c0_i32, %c0_i32_0 : i32, i32
  }
  func.func @transform_17(%arg0: i32) -> (i32, i32) {
    %c0_i32 = arith.constant 0 : i32
    %c0_i32_0 = arith.constant 0 : i32
    %c0_i32_1 = arith.constant 0 : i32
    return %c0_i32, %c0_i32_0 : i32, i32
  }
  func.func @transform_18(%arg0: i32) -> (i32, i32) {
    %c0_i32 = arith.constant 0 : i32
    %c0_i32_0 = arith.constant 0 : i32
    %c0_i32_1 = arith.constant 0 : i32
    return %c0_i32, %c0_i32_0 : i32, i32
  }
  func.func @transform_19(%arg0: i32) -> (i32, i32) {
    %c0_i32 = arith.constant 0 : i32
    %c0_i32_0 = arith.constant 0 : i32
    %c0_i32_1 = arith.constant 0 : i32
    return %c0_i32, %c0_i32_0 : i32, i32
  }
  func.func @transform_20(%arg0: i32) -> (i32, i32) {
    %c0_i32 = arith.constant 0 : i32
    %c0_i32_0 = arith.constant 0 : i32
    %c0_i32_1 = arith.constant 0 : i32
    return %c0_i32, %c0_i32_0 : i32, i32
  }
  func.func @transform_21(%arg0: i32) -> (i32, i32) {
    %c0_i32 = arith.constant 0 : i32
    %c0_i32_0 = arith.constant 0 : i32
    %c0_i32_1 = arith.constant 0 : i32
    return %c0_i32, %c0_i32_0 : i32, i32
  }
  func.func @transform_22(%arg0: i32) -> (i32, i32) {
    %c0_i32 = arith.constant 0 : i32
    %c0_i32_0 = arith.constant 0 : i32
    %c0_i32_1 = arith.constant 0 : i32
    return %c0_i32, %c0_i32_0 : i32, i32
  }
  func.func @transform_23(%arg0: i32) -> (i32, i32) {
    %c0_i32 = arith.constant 0 : i32
    %c0_i32_0 = arith.constant 0 : i32
    %c0_i32_1 = arith.constant 0 : i32
    return %c0_i32, %c0_i32_0 : i32, i32
  }
  func.func @transform_24(%arg0: i32) -> (i32, i32) {
    %c0_i32 = arith.constant 0 : i32
    %c0_i32_0 = arith.constant 0 : i32
    %c0_i32_1 = arith.constant 0 : i32
    return %c0_i32, %c0_i32_0 : i32, i32
  }
  func.func @transform_25(%arg0: i32) -> (i32, i32) {
    %c0_i32 = arith.constant 0 : i32
    %c0_i32_0 = arith.constant 0 : i32
    %c0_i32_1 = arith.constant 0 : i32
    return %c0_i32, %c0_i32_0 : i32, i32
  }
  func.func @transform_26(%arg0: i32) -> (i32, i32) {
    %c0_i32 = arith.constant 0 : i32
    %c0_i32_0 = arith.constant 0 : i32
    %c0_i32_1 = arith.constant 0 : i32
    return %c0_i32, %c0_i32_0 : i32, i32
  }
  func.func @transform_27(%arg0: i32) -> (i32, i32) {
    %c0_i32 = arith.constant 0 : i32
    %c0_i32_0 = arith.constant 0 : i32
    %c0_i32_1 = arith.constant 0 : i32
    return %c0_i32, %c0_i32_0 : i32, i32
  }
  func.func @transform_28(%arg0: i32) -> (i32, i32) {
    %c0_i32 = arith.constant 0 : i32
    %c0_i32_0 = arith.constant 0 : i32
    %c0_i32_1 = arith.constant 0 : i32
    return %c0_i32, %c0_i32_0 : i32, i32
  }
  func.func @transform_29(%arg0: i32) -> (i32, i32) {
    %c0_i32 = arith.constant 0 : i32
    %c0_i32_0 = arith.constant 0 : i32
    %c0_i32_1 = arith.constant 0 : i32
    return %c0_i32, %c0_i32_0 : i32, i32
  }
  func.func @transform_30(%arg0: i32) -> (i32, i32) {
    %c0_i32 = arith.constant 0 : i32
    %c0_i32_0 = arith.constant 0 : i32
    %c0_i32_1 = arith.constant 0 : i32
    return %c0_i32, %c0_i32_0 : i32, i32
  }
  func.func @transform_31(%arg0: i32) -> (i32, i32) {
    %c0_i32 = arith.constant 0 : i32
    %c0_i32_0 = arith.constant 0 : i32
    %c0_i32_1 = arith.constant 0 : i32
    return %c0_i32, %c0_i32_0 : i32, i32
  }
  func.func @transform_32(%arg0: i32) -> (i32, i32) {
    %c0_i32 = arith.constant 0 : i32
    %c0_i32_0 = arith.constant 0 : i32
    %c0_i32_1 = arith.constant 0 : i32
    return %c0_i32, %c0_i32_0 : i32, i32
  }
  func.func @transform_33(%arg0: i32) -> (i32, i32) {
    %c0_i32 = arith.constant 0 : i32
    %c0_i32_0 = arith.constant 0 : i32
    %c0_i32_1 = arith.constant 0 : i32
    return %c0_i32, %c0_i32_0 : i32, i32
  }
  func.func @transform_34(%arg0: i32) -> (i32, i32) {
    %c0_i32 = arith.constant 0 : i32
    %c0_i32_0 = arith.constant 0 : i32
    %c0_i32_1 = arith.constant 0 : i32
    return %c0_i32, %c0_i32_0 : i32, i32
  }
  func.func @transform_35(%arg0: i32) -> (i32, i32) {
    %c0_i32 = arith.constant 0 : i32
    %c0_i32_0 = arith.constant 0 : i32
    %c0_i32_1 = arith.constant 0 : i32
    return %c0_i32, %c0_i32_0 : i32, i32
  }
  func.func @transform_36(%arg0: i32) -> (i32, i32, i32) {
    %c0_i32 = arith.constant 0 : i32
    %c0_i32_0 = arith.constant 0 : i32
    %c0_i32_1 = arith.constant 0 : i32
    return %arg0, %c0_i32, %c0_i32_0 : i32, i32, i32
  }
}

</mosaic_0001>

<bundles_post_ra>
// kernel: tpu_custom_call.1
= control target key start
LH: loop header
LB: loop body
LE: loop exit
PB: predicated region body
PF: predicated region fallthrough
CT: control target
= control target key end

     0   :  { %s4080_s6 = smov 1   ;;  %s4081_s10 = smov 2   ;;  %s4911_s0 = inlined_call_operand.smem [shape: u32[37], index: -1, kind: input, shape index: {}] }
   0x1   :  { %s4141_s5 = sld [smem:[%s4911_s0]]   ;;  %s4082_s14 = smov 3  }
   0x2   :  { %s4146_s9 = sld [smem:[%s4911_s0 + %s4080_s6]]   ;;  %s4083_s18 = smov 4  }
   0x3   :  { %s4151_s13 = sld [smem:[%s4911_s0 + %s4081_s10]]   ;;  %s4084_s22 = smov 5  }
   0x4   :  { %s4156_s17 = sld [smem:[%s4911_s0 + %s4082_s14]]   ;;  %s4085_s26 = smov 6  }
   0x5   :  { %s4161_s21 = sld [smem:[%s4911_s0 + %s4083_s18]]   ;;  %s4086_s30 = smov 7  }
   0x6   :  { %s4166_s25 = sld [smem:[%s4911_s0 + %s4084_s22]]   ;;  %s4087_s4 = smov 8  }
   0x7   :  { %4934 = sst [smem:[#allocation5_spill]] %s4141_s5  ;;  %s4088_s10 = smov 9  }
   0x8   :  { %4935 = sst [smem:[#allocation6_spill]] %s4146_s9  ;;  %s4089_s15 = smov 10  }
   0x9   :  { %4936 = sst [smem:[#allocation7_spill]] %s4151_s13  ;;  %s4090_s20 = smov 11  }
   0xa   :  { %s4171_s29 = sld [smem:[%s4911_s0 + %s4085_s26]]   ;;  %s4091_s26 = smov 12  }
   0xb   :  { %s4176_s3 = sld [smem:[%s4911_s0 + %s4086_s30]]   ;;  %s4092_s1 = smov 13  }
   0xc   :  { %s4181_s8 = sld [smem:[%s4911_s0 + %s4087_s4]]   ;;  %s4093_s7 = smov 14  }
   0xd   :  { %s4186_s14 = sld [smem:[%s4911_s0 + %s4088_s10]]   ;;  %s4095_s22 = smov 16  }
   0xe   :  { %s4191_s19 = sld [smem:[%s4911_s0 + %s4089_s15]]   ;;  %s4094_s15 = smov 15  }
   0xf   :  { %s4196_s24 = sld [smem:[%s4911_s0 + %s4090_s20]]   ;;  %s4096_s28 = smov 17  }
  0x10   :  { %s4201_s30 = sld [smem:[%s4911_s0 + %s4091_s26]]  }
  0x11   :  { %4937 = sst [smem:[#allocation8_spill]] %s4176_s3 }
  0x12   :  { %4938 = sst [smem:[#allocation9_spill]] %s4181_s8 }
  0x13   :  { %s4206_s6 = sld [smem:[%s4911_s0 + %s4092_s1]]  }
  0x14   :  { %s4211_s12 = sld [smem:[%s4911_s0 + %s4093_s7]]   ;;  %s4097_s7 = smov 18  }
  0x15   :  { %s4216_s20 = sld [smem:[%s4911_s0 + %s4094_s15]]   ;;  %s4098_s15 = smov 19  }
  0x16   :  { %s4221_s27 = sld [smem:[%s4911_s0 + %s4095_s22]]   ;;  %s4099_s22 = smov 20  }
  0x17   :  { %s4226_s4 = sld [smem:[%s4911_s0 + %s4096_s28]]   ;;  %s4100_s28 = smov 21  }
  0x19   :  { %4939 = sst [smem:[#allocation10_spill]] %s4206_s6 }
  0x1a   :  { %4940 = sst [smem:[#allocation11_spill]] %s4211_s12 }
  0x1b   :  { %4941 = sst [smem:[#allocation12_spill]] %s4216_s20 }
  0x1c   :  { %4942 = sst [smem:[#allocation13_spill]] %s4221_s27 }
  0x1d   :  { %4943 = sst [smem:[#allocation14_spill]] %s4226_s4 }
  0x1e   :  { %s4231_s12 = sld [smem:[%s4911_s0 + %s4097_s7]]   ;;  %s4101_s7 = smov 22  }
  0x1f   :  { %s4236_s20 = sld [smem:[%s4911_s0 + %s4098_s15]]   ;;  %s4102_s15 = smov 23  }
  0x20   :  { %s4241_s27 = sld [smem:[%s4911_s0 + %s4099_s22]]   ;;  %s4103_s22 = smov 24  }
  0x21   :  { %s4246_s4 = sld [smem:[%s4911_s0 + %s4100_s28]]   ;;  %s4104_s28 = smov 25  }
  0x24   :  { %4944 = sst [smem:[#allocation15_spill]] %s4231_s12 }
  0x25   :  { %4945 = sst [smem:[#allocation16_spill]] %s4236_s20 }
  0x26   :  { %4946 = sst [smem:[#allocation17_spill]] %s4241_s27 }
  0x27   :  { %4947 = sst [smem:[#allocation18_spill]] %s4246_s4 }
  0x28   :  { %s4251_s12 = sld [smem:[%s4911_s0 + %s4101_s7]]   ;;  %s4105_s7 = smov 26  }
  0x29   :  { %s4256_s20 = sld [smem:[%s4911_s0 + %s4102_s15]]   ;;  %s4106_s15 = smov 27  }
  0x2a   :  { %s4261_s27 = sld [smem:[%s4911_s0 + %s4103_s22]]   ;;  %s4107_s22 = smov 28  }
  0x2b   :  { %s4266_s4 = sld [smem:[%s4911_s0 + %s4104_s28]]   ;;  %s4108_s28 = smov 29  }
  0x2e   :  { %4948 = sst [smem:[#allocation19_spill]] %s4251_s12 }
  0x2f   :  { %4949 = sst [smem:[#allocation20_spill]] %s4256_s20 }
  0x30   :  { %4950 = sst [smem:[#allocation21_spill]] %s4261_s27 }
  0x31   :  { %4951 = sst [smem:[#allocation22_spill]] %s4266_s4 }
  0x32   :  { %s4271_s12 = sld [smem:[%s4911_s0 + %s4105_s7]]   ;;  %s4109_s7 = smov 30  }
  0x33   :  { %s4276_s20 = sld [smem:[%s4911_s0 + %s4106_s15]]   ;;  %s4110_s15 = smov 31  }
  0x34   :  { %s4281_s27 = sld [smem:[%s4911_s0 + %s4107_s22]]   ;;  %s4111_s22 = smov 32  }
  0x35   :  { %s4286_s4 = sld [smem:[%s4911_s0 + %s4108_s28]]   ;;  %s4112_s28 = smov 33  }
  0x38   :  { %4952 = sst [smem:[#allocation23_spill]] %s4271_s12 }
  0x39   :  { %4953 = sst [smem:[#allocation24_spill]] %s4276_s20 }
  0x3a   :  { %4954 = sst [smem:[#allocation25_spill]] %s4281_s27 }
  0x3b   :  { %4955 = sst [smem:[#allocation26_spill]] %s4286_s4 }
  0x3c   :  { %s4291_s12 = sld [smem:[%s4911_s0 + %s4109_s7]]   ;;  %s4113_s7 = smov 34  }
  0x3d   :  { %s4296_s20 = sld [smem:[%s4911_s0 + %s4110_s15]]   ;;  %s4114_s15 = smov 35  }
  0x3e   :  { %s4301_s27 = sld [smem:[%s4911_s0 + %s4111_s22]]   ;;  %s4115_s22 = smov 36  }
  0x3f   :  { %s4306_s4 = sld [smem:[%s4911_s0 + %s4112_s28]]  }
  0x42   :  { %4956 = sst [smem:[#allocation27_spill]] %s4291_s12 }
  0x43   :  { %4957 = sst [smem:[#allocation28_spill]] %s4296_s20 }
  0x44   :  { %4958 = sst [smem:[#allocation29_spill]] %s4301_s27 }
  0x45   :  { %4959 = sst [smem:[#allocation30_spill]] %s4306_s4 }
  0x46   :  { %s4311_s12 = sld [smem:[%s4911_s0 + %s4113_s7]]  }
  0x47   :  { %s4316_s20 = sld [smem:[%s4911_s0 + %s4114_s15]]  }
  0x48   :  { %s4321_s27 = sld [smem:[%s4911_s0 + %s4115_s22]]  }
  0x4c   :  { %4960 = sst [smem:[#allocation31_spill]] %s4311_s12 }
  0x4d   :  { %78 = vsyncpa [#allocation3], 0 }
  0x4e   :  { %80 = vsyncpa [#allocation3 + $0x1], 0  ;;  %s4323_s28 = smov 0   ;;  %s4325_s1 = smov 0  }
  0x4f   :  { %s4327_s2 = smov 0   ;;  %s4329_s7 = smov 0  }
  0x50 LB: > { %s4961_s13 = sld [smem:[#allocation7_spill]]  ;;  %s4963_s6 = sld [smem:[#allocation10_spill]]  ;;  %s4078_s7 = sphi %s4329_s7, %s5019_s7   ;;  %s4074_s2 = sphi %s4327_s2, %s5018_s2   ;;  %s4070_s1 = sphi %s4325_s1, %s5017_s1   ;;  %s4066_s28 = sphi %s4323_s28, %s5016_s28  }
  0x51   : > { %s4962_s12 = sld [smem:[#allocation31_spill]]  ;;  %s4964_s4 = sld [smem:[#allocation30_spill]] }
  0x52   : > { %s4344_s0 = sadd.s32 4294967295, %s4078_s7   ;;  %s3464_s10 = sadd.s32 4294967294, %s4078_s7  }
  0x53   : > { %s4348_s11 = sadd.s32 1, %s4078_s7   ;;  %s854_s15 = sadd.s32 1, %s4074_s2 }
  0x54   : > { %s851_s16 = ssub.s32 %s4078_s7, %s4348_s11  ;;  %p864_p0 = scmp.ne.s32.totalorder %s4074_s2, %s4070_s1 }
  0x55   : > { %p852_p1 = scmp.eq.s32.totalorder %s851_s16, 0  ;;  %p865_p2 = scmp.eq.s32.totalorder %s4344_s0, 1 }
  0x56   : > { %p870_p3 = scmp.ne.s32.totalorder %s4070_s1, %s4066_s28  ;;  %p871_p4 = scmp.eq.s32.totalorder %s3464_s10, 1 }
  0x57   : > { %s4359_s18 = scalar_select %p852_p1, %s4074_s2, %s854_s15  }
  0x58   : > { %p4361_p5 = por %p865_p2, %p864_p0  ;;  %p4365_p6 = por %p871_p4, %p870_p3 }
  0x59   : > { %p3467_p7 = scmp.ge.s32.totalorder %s4078_s7, 1  ;;  %p1002_p8 = scmp.lt.s32.totalorder %s4078_s7, 3 }
  0x5b   : > { %p1003_p9 = pnand %p3467_p7, %p1002_p8 }
  0x5c   : > { %s4967_s5 = sld [smem:[#allocation5_spill]] (!%p1003_p9)  ;;  %p1092_p10 = scmp.lt.s32.totalorder (!%p1003_p9), %s4344_s0, 1  ;;  %v1158_v0 = vld [vmem:[%s4961_s13] sm:$0xff] (!%p1003_p9)  ;;  %v1159_v1 = vld [vmem:[%s4961_s13 + $0x8] sm:$0xff] (!%p1003_p9)  ;;  %v1160_v5 = vld [vmem:[%s4961_s13 + $0x10] sm:$0xff] (!%p1003_p9)  ;;  %vm1099_vm0 = vcmask (!%p1003_p9), 1043456  }
  0x5d   : > { %1006 = sbr.rel (%p1003_p9) target bundleno = 3956 (0xf74), region = 164  ;;  %v1244_v2 = vld [vmem:[%s4156_s17] sm:$0xff] (!%p1003_p9)  ;;  %v3767_v3 = vpack.c.bf16 (!%p1003_p9), %v1159_v1, %v1158_v0  ;;  %v1245_v4 = vld [vmem:[%s4156_s17 + $0x8] sm:$0xff] (!%p1003_p9)  ;;  %v1161_v6 = vld [vmem:[%s4961_s13 + $0x18] sm:$0xff] (!%p1003_p9)  ;;  %vm1116_vm1 = vcmask (!%p1003_p9), 1045504   ;;  %vm1104_vm2 = vcmask (!%p1003_p9), 1046528  }
  0x5e   : > { %v3775_v7 = vpack.c.bf16 (!%p1003_p9), %v1245_v4, %v1244_v2  ;;  %v3771_v8 = vpack.c.bf16 (!%p1003_p9), %v1161_v6, %v1160_v5  ;;  %v1246_v9 = vld [vmem:[%s4156_s17 + $0x10] sm:$0xff] (!%p1003_p9)  ;;  %v1247_v10 = vld [vmem:[%s4156_s17 + $0x18] sm:$0xff] (!%p1003_p9)  ;;  %v4116_v19 = vmov (!%p1003_p9), 0.0   ;;  %s4917_s16 = smov (!%p1003_p9), 16   ;;  %vm1128_vm3 = vcmask (!%p1003_p9), 1044480   ;;  %s4968_s9 = sld [smem:[#allocation6_spill]] (!%p1003_p9) }
  0x5f   : > { %3768 = vmatprep.subr.bf16.mxu0 (!%p1003_p9), %v3767_v3  ;;  %v3779_v11 = vpack.c.bf16 (!%p1003_p9), %v1247_v10, %v1246_v9  ;;  %v1120_v20 = vrot.slane (!%p1003_p9), %v4116_v19, 2  ;;  %v1108_v21 = vrot.slane (!%p1003_p9), %v4116_v19, 1  ;;  %v1132_v24 = vrot.slane (!%p1003_p9), %v4116_v19, 3  ;;  %v1343_v46 = vld [vmem:[%s4161_s21] sm:$0xff] (!%p1003_p9)  ;;  %v1344_v47 = vld [vmem:[%s4161_s21 + $0x8] sm:$0xff] (!%p1003_p9)  ;;  %s4970_s3 = sld [smem:[#allocation8_spill]] (!%p1003_p9) }
  0x60   : > { %3776 = vmatprep.subr.bf16.mxu1 (!%p1003_p9), %v3775_v7  ;;  %3770 = vmatpush3.bf16.msra.mxu0 (!%p1003_p9), %v3767_v3  ;;  %vm1140_vm4 = vcmask (!%p1003_p9), 64512   ;;  %vm1143_vm5 = vcmask (!%p1003_p9), 130048   ;;  %vm1146_vm6 = vcmask (!%p1003_p9), 195584   ;;  %vm1162_vm7 = vcmask (!%p1003_p9), 261120   ;;  %v1345_v49 = vld [vmem:[%s4161_s21 + $0x10] sm:$0x1] (!%p1003_p9) }
  0x61   : > { %3778 = vmatpush3.bf16.msra.mxu1 (!%p1003_p9), %v3775_v7  ;;  %3772 = vmatprep.subr.bf16.mxu0 (!%p1003_p9), %v3771_v8  ;;  %v3783_v48 = vpack.c.bf16 (!%p1003_p9), %v1344_v47, %v1343_v46  ;;  %vm4920_vm8 = vcmask (!%p1003_p9), 1040384   ;;  %vm4919_vm11 = vcmask (!%p1003_p9), 138240   ;;  %v1608_v46 = vld [vmem:[%s4166_s25 + $0x28] sm:$0xff] (!%p1003_p9)  ;;  %s4971_s8 = sld [smem:[#allocation9_spill]] (!%p1003_p9) }
  0x62   : > { %3780 = vmatprep.subr.bf16.mxu1 (!%p1003_p9), %v3779_v11 }
  0x64   : > { %s1093_s26 = scalar_select %p1092_p10, %s4344_s0, 1  ;;  %3774 = vmatpush3.bf16.msra.mxu0 %v3771_v8  ;;  %v3471_v37 = vld [vmem:[%s4968_s9] ss:$0 sm:$0xff]  ;;  %v1438_v8 = vlaneseq }
  0x65   : > { %3782 = vmatpush3.bf16.msra.mxu1 %v3779_v11  ;;  %3784 = vmatprep.subr.bf16.mxu0 %v3783_v48 }
  0x66   : > { %s3538_s10 = sshll.u32 %s1093_s26, 4  ;;  %s4118_s26 = smov 8   ;;  %v4417_v11 = vshrl.u32 %v1438_v8, 7 }
  0x67   : > { %s1096_s15 = scalar_lea.vmem %s4967_s5, %s3538_s10  ;;  %s4119_s10 = smov 24  }
  0x68   : > { %v1097_v12 = vld [vmem:[%s1096_s15] sm:$0xff]  ;;  %v1098_v13 = vld [vmem:[%s1096_s15 + $0x8] sm:$0xf]  ;;  %s4120_s15 = smov 32   ;;  %vm1498_vm15 = vcmp.lt.s32.totalorder %v4417_v11, 7  ;;  %s5000_s5 = sld [smem:[#allocation25_spill]] }
  0x69   : > { %v1100_v14 = vsel %vm1099_vm0, %v1098_v13, 0.0  ;;  %v1117_v15 = vrot.slane %v1097_v12, 2  ;;  %v1105_v16 = vrot.slane %v1097_v12, 1  ;;  %v1129_v28 = vrot.slane %v1097_v12, 3 }
  0x6a   : > { %v1118_v17 = vrot.slane %v1100_v14, 2  ;;  %v1106_v18 = vrot.slane %v1100_v14, 1  ;;  %v1130_v27 = vrot.slane %v1100_v14, 3  ;;  %vm1462_vm0 = vcmp.lt.s32.totalorder %v4417_v11, 2 }
  0x6c   : > { %v1119_v22 = vsel %vm1116_vm1, %v1117_v15, %v1118_v17  ;;  %v1107_v23 = vsel %vm1104_vm2, %v1105_v16, %v1106_v18  ;;  %v1121_v25 = vsel %vm1116_vm1, %v1118_v17, %v1120_v20  ;;  %v1109_v26 = vsel %vm1104_vm2, %v1106_v18, %v1108_v21  ;;  %v1604_v15 = vld [vmem:[%s4166_s25 + $0x8] sm:$0xff] }
  0x6d   : > { %1122 = vrot.lane.b32.xlu1 %v1119_v22, %s4917_s16  ;;  %1110 = vrot.lane.b32.xlu0 %v1107_v23, %s4118_s26  ;;  %v1133_v29 = vsel %vm1128_vm3, %v1130_v27, %v1132_v24  ;;  %v1131_v30 = vsel %vm1128_vm3, %v1129_v28, %v1130_v27  ;;  %v4430_v21 = vadd.s32 4294967294, %v4417_v11  ;;  %vm1477_vm1 = vcmp.lt.s32.totalorder %v4417_v11, 1 }
  0x6e   : > { %v4438_v24 = vadd.s32 4294967295, %v4417_v11  ;;  %vm1513_vm3 = vcmp.lt.s32.totalorder %v4417_v11, 6 }
  0x71   : > { %1124 = vrot.lane.b32.xlu1 %v1121_v25, %s4917_s16  ;;  %1112 = vrot.lane.b32.xlu0 %v1109_v26, %s4118_s26  ;;  %s4121_s16 = smov 40  }
  0x75   : > { %1136 = vrot.lane.b32.xlu1 %v1133_v29, %s4119_s10  ;;  %1134 = vrot.lane.b32.xlu0 %v1131_v30, %s4119_s10 }
  0x79   : > { %1569 = vrot.lane.b32.xlu1 %v4116_v19, %s4120_s15 }
  0x7d   : > { %1577 = vrot.lane.b32.xlu1 %v4116_v19, %s4121_s16 }
  0xdf   : > { %v1123_v31 = vpop.permute.xlu1 %1122  ;;  %v1111_v32 = vpop.permute.xlu0 %1110 }
  0xe0   : > { %v1141_v35 = vsel %vm1140_vm4, %v1097_v12, %v1111_v32  ;;  %v4420_v12 = vadd.s32 8, %v4417_v11 }
  0xe1   : > { %v1144_v40 = vsel %vm1143_vm5, %v1141_v35, %v1123_v31 }
  0xe2   : > { %v4423_v13 = vadd.s32 4294967294, %v4420_v12  ;;  %vm4921_vm14 = vcmp.lt.s32.totalorder %v4420_v12, 9  ;;  %v4433_v22 = vadd.s32 4294967295, %v4420_v12 }
  0xe3   : > { %v1125_v33 = vpop.permute.xlu1 %1124  ;;  %v1113_v34 = vpop.permute.xlu0 %1112 }
  0xe4   : > { %v1142_v36 = vsel %vm1140_vm4, %v1100_v14, %v1113_v34  ;;  %v1603_v14 = vld [vmem:[%s4166_s25] sm:$0xff]  ;;  %vm4926_vm2 = vcmp.lt.s32.totalorder %v4423_v13, 9 }
  0xe5   : > { %v1145_v39 = vsel %vm1143_vm5, %v1142_v36, %v1125_v33  ;;  %v3787_v17 = vpack.c.bf16 %v1604_v15, %v1603_v14 }
  0xe7   : > { %v1137_v38 = vpop.permute.xlu1 %1136  ;;  %v1135_v41 = vpop.permute.xlu0 %1134  ;;  %3788 = vmatprep.subr.bf16.mxu1 %v3787_v17 }
  0xe8   : > { %v1148_v42 = vsel %vm1146_vm6, %v1145_v39, %v1137_v38  ;;  %v1147_v43 = vsel %vm1146_vm6, %v1144_v40, %v1135_v41 }
  0xe9   : > { %v1156_v44 = vmul.f32 %v3471_v37, %v1147_v43  ;;  %v1157_v45 = vmul.f32 %v3471_v37, %v1148_v42  ;;  %v1605_v42 = vld [vmem:[%s4166_s25 + $0x10] sm:$0xff]  ;;  %v1606_v43 = vld [vmem:[%s4166_s25 + $0x18] sm:$0xff] }
  0xeb   : > { %3627 = vmatprep.mubr.msk.f32.mxu0 %vm1162_vm7, %v1156_v44  ;;  %3638 = vmatprep.mubr.msk.f32.mxu1 %vm1162_vm7, %v1156_v44 }
  0xec   : > { %3628 = vmatmul.mubr.msk.f32.vlgmr.msra.gmra.mrb[0].mxu0 %vm1162_vm7, %v1157_v45  ;;  %3639 = vmatmul.mubr.msk.f32.vlgmr.msra.gmra.mrb[0].mxu1 %vm1162_vm7, %v1157_v45  ;;  %v1607_v45 = vld [vmem:[%s4166_s25 + $0x20] sm:$0xff] }
  0xed   : > { %3786 = vmatpush3.bf16.msra.mxu0 %v3783_v48  ;;  %3790 = vmatpush3.bf16.msra.mxu1 %v3787_v17 }
  0xee   : > { %3645 = vmatprep.subr.msk.mxu0 %vm4920_vm8, %v1345_v49 }
  0xf1   : > { %3646 = vmatpush3.msk.msra.mxu0 %vm4920_vm8, %v1345_v49 }
 0x1bf   : > { %v3629_v50 = vpop.f32.mrb[0].mxu0  ;;  %v3640_v51 = vpop.f32.mrb[0].mxu1 }
 0x1c0   : > { %v1324_v52 = vmul.f32 %v3629_v50, %v3629_v50  ;;  %v1326_v53 = vmul.f32 %v3640_v51, %v3640_v51  ;;  %v1235_v54 = vpop.f32.mrb[1].mxu0  ;;  %v1314_v55 = vpop.f32.mrb[1].mxu1  ;;  %v3791_v51 = vpack.c.bf16 %v1606_v43, %v1605_v42 }
 0x1c1   : > { %v1323_v56 = vmul.f32 %v1235_v54, %v1235_v54  ;;  %v1325_v57 = vmul.f32 %v1314_v55, %v1314_v55  ;;  %v3795_v55 = vpack.c.bf16 %v1608_v46, %v1607_v45 }
 0x1c2   : > { %v1328_v58 = vadd.f32 %v1326_v53, %v1324_v52  ;;  %3792 = vmatprep.subr.bf16.mxu1 %v3791_v51 }
 0x1c3   : > { %v1327_v59 = vadd.f32 %v1325_v57, %v1323_v56  ;;  %v4485_v57 = vadd.s32 2, %v4417_v11  ;;  %3794 = vmatpush3.bf16.msra.mxu1 %v3791_v51 }
 0x1c4   : > { %3972 = vrsqrt.f32 %v1328_v58  ;;  %vm1338_vm9 = vcmp.eq.f32.partialorder %v1328_v58, inf  ;;  %v1341_v3 = vand.u32 2147483648, %v1328_v58  ;;  %vm1340_vm13 = vcmp.eq.f32.partialorder %v1328_v58, 0.0  ;;  %3796 = vmatprep.subr.bf16.mxu1 %v3795_v55 }
 0x1c5   : > { %3974 = vrsqrt.f32 %v1327_v59  ;;  %vm1331_vm10 = vcmp.eq.f32.partialorder %v1327_v59, inf  ;;  %v1334_v0 = vand.u32 2147483648, %v1327_v59  ;;  %vm1333_vm12 = vcmp.eq.f32.partialorder %v1327_v59, 0.0 }
 0x1c6   : > { %vm4922_vm8 = vcmp.lt.s32.totalorder %v4485_v57, 9 }
 0x1c7   : > { %3798 = vmatpush3.bf16.msra.mxu1 %v3795_v55 }
 0x1ce   : > { %v3973_v60 = vpop.eup %3972 }
 0x1cf   : > { %v3975_v61 = vpop.eup %3974  ;;  %v1337_v62 = vmul.f32 %v3973_v60, %v1328_v58  ;;  %v4494_v60 = vadd.s32 3, %v4417_v11 }
 0x1d0   : > { %v1330_v63 = vmul.f32 %v3975_v61, %v1327_v59 }
 0x1d1   : > { %v1339_v1 = vsel %vm1338_vm9, %v1328_v58, %v1337_v62  ;;  %vm4925_vm9 = vcmp.lt.s32.totalorder %v4417_v11, 5 }
 0x1d2   : > { %v1332_v2 = vsel %vm1331_vm10, %v1327_v59, %v1330_v63  ;;  %v1342_v5 = vsel %vm1340_vm13, %v1341_v3, %v1339_v1  ;;  %vm1467_vm10 = vcmp.ge.s32.totalorder %v4430_v21, 0  ;;  %vm1447_vm13 = vcmp.lt.s32.totalorder %v4417_v11, 3  ;;  %v1609_v59 = vld [vmem:[%s4166_s25 + $0x30] sm:$0xff]  ;;  %v1570_v63 = vpop.permute.xlu1 %1569 }
 0x1d3   : > { %v1335_v4 = vsel %vm1333_vm12, %v1334_v0, %v1332_v2  ;;  %vm4924_vm12 = vcmp.lt.s32.totalorder %v4433_v22, 9  ;;  %3662 = vmatprep.subr.mxu1 %v1609_v59 }
 0x1d4   : > { %3647 = vmatprep.mubr.msk.f32.mxu0 %vm4919_vm11, %v1335_v4  ;;  %3663 = vmatpush3.msra.mxu1 %v1609_v59  ;;  %v4507_v4 = vadd.s32 4294967293, %v4417_v11 }
 0x1d5   : > { %3648 = vmatmul.mubr.msk.f32.vlgmr.msra.gmra.mrb[2].mxu0 %vm4919_vm11, %v1342_v5  ;;  %vm1482_vm11 = vcmp.ge.s32.totalorder %v4438_v24, 0 }
 0x1d6   : > { %v1578_v0 = vpop.permute.xlu1 %1577 }
 0x2a8   : > { %v3649_v6 = vpop.f32.mrb[2].mxu0 }
 0x2a9   : > { %v1433_v7 = vmax.f32 %v3649_v6, 1e-07  ;;  %v1423_v9 = vpop.f32.mrb[3].mxu0 }
 0x2aa   : > { %v1432_v10 = vmax.f32 %v1423_v9, 1e-07 }
 0x2ab   : > { %3976 = vlog2.f32 %v1433_v7 }
 0x2ac   : > { %3978 = vlog2.f32 %v1432_v10 }
 0x2b5   : > { %v3977_v16 = vpop.eup %3976 }
 0x2b6   : > { %v3979_v18 = vpop.eup %3978  ;;  %v1437_v20 = vmul.f32 0.6931472, %v3977_v16 }
 0x2b7   : > { %v1435_v23 = vmul.f32 0.6931472, %v3979_v18 }
 0x2b8   : > { %v1444_v25 = vsel %vm4921_vm14, %v1437_v20, 0.0 }
 0x2b9   : > { %1559 = vrot.lane.b32.xlu0 %v1435_v23, %s4119_s10  ;;  %v1495_v26 = vsel %vm4921_vm14, %v1444_v25, 0.0  ;;  %v1496_v27 = vrot.slane %v1435_v23, 1  ;;  %v1497_v28 = vrot.slane %v1444_v25, 1  ;;  %v1460_v29 = vrot.slane %v1435_v23, 6 }
 0x2ba   : > { %1561 = vrot.lane.b32.xlu1 %v1495_v26, %s4119_s10  ;;  %v1461_v30 = vrot.slane %v1444_v25, 6  ;;  %v1475_v31 = vrot.slane %v1435_v23, 7  ;;  %v1476_v32 = vrot.slane %v1444_v25, 7  ;;  %v1511_v33 = vrot.slane %v1435_v23, 2  ;;  %s4969_s10 = smov 16  }
 0x2bb   : > { %v1499_v34 = vsel %vm1498_vm15, %v1496_v27, %v1497_v28  ;;  %v1512_v35 = vrot.slane %v1444_v25, 2  ;;  %v1526_v36 = vrot.slane %v1435_v23, 3  ;;  %v1527_v37 = vrot.slane %v1444_v25, 3 }
 0x2bc   : > { %v1463_v38 = vsel %vm1462_vm0, %v1460_v29, %v1461_v30  ;;  %v1464_v39 = vsel %vm1462_vm0, %v1461_v30, %v1460_v29  ;;  %v1478_v40 = vsel %vm1477_vm1, %v1475_v31, %v1476_v32  ;;  %v1479_v41 = vsel %vm1477_vm1, %v1476_v32, %v1475_v31 }
 0x2bd   : > { %1567 = vrot.lane.b32.xlu0 %v1499_v34, %s4120_s15  ;;  %v1474_v44 = vsel %vm4926_vm2, %v1463_v38, 0.0  ;;  %v1514_v47 = vsel %vm1513_vm3, %v1511_v33, %v1512_v35  ;;  %v1529_v48 = vsel %vm4925_vm9, %v1526_v36, %v1527_v37  ;;  %v1446_v49 = vrot.slane %v1444_v25, 5  ;;  %v3479_v33 = vld [vmem:[%s4171_s29] ss:$0 sm:$0xff]  ;;  %s4979_s15 = sld [smem:[#allocation11_spill]] }
 0x2be   : > { %1545 = vrot.lane.b32.xlu1 %v1474_v44, %s4118_s26  ;;  %v1445_v50 = vrot.slane %v1435_v23, 5  ;;  %v1473_v52 = vsel %vm1467_vm10, %v1464_v39, 0.0  ;;  %v1489_v56 = vsel %vm4924_vm12, %v1478_v40, 0.0  ;;  %v1488_v58 = vsel %vm1482_vm11, %v1479_v41, 0.0 }
 0x2bf   : > { %v1524_v61 = vsel %vm4922_vm8, %v1514_v47, 0.0  ;;  %vm4923_vm14 = vcmp.lt.s32.totalorder %v4494_v60, 9  ;;  %vm1597_vm12 = vcmask 326656   ;;  %vm1600_vm9 = vcmask 392192  }
 0x2c0   : > { %v1448_v53 = vsel %vm1447_vm13, %v1445_v50, %v1446_v49  ;;  %v1449_v54 = vsel %vm1447_vm13, %v1446_v49, %v1445_v50  ;;  %v1539_v62 = vsel %vm4923_vm14, %v1529_v48, 0.0  ;;  %vm1452_vm14 = vcmp.ge.s32.totalorder %v4507_v4, 0 }
 0x2c1   : > { %1543 = vrot.lane.b32.xlu0 %v1473_v52, %s4118_s26  ;;  %s4122_s26 = smov 48   ;;  %v1458_v14 = vsel %vm1452_vm14, %v1449_v54, 0.0  ;;  %vm1617_vm2 = vcmask 457728  }
 0x2c2   : > { %1553 = vrot.lane.b32.xlu1 %v1489_v56, %s4969_s10 }
 0x2c5   : > { %1551 = vrot.lane.b32.xlu0 %v1488_v58, %s4969_s10  ;;  %v3482_v58 = vld [vmem:[%s4970_s3] ss:$0 sm:$0xff]  ;;  %s4980_s10 = sld [smem:[#allocation13_spill]] }
 0x2c6   : > { %1585 = vrot.lane.b32.xlu1 %v4116_v19, %s4122_s26  ;;  %v4504_v19 = vadd.s32 4294967293, %v4420_v12  ;;  %s4993_s3 = sld [smem:[#allocation21_spill]] }
 0x2c8   : > { %vm1455_vm8 = vcmp.lt.s32.totalorder %v4504_v19, 9 }
 0x2c9   : > { %1575 = vrot.lane.b32.xlu0 %v1524_v61, %s4121_s16  ;;  %v1459_v6 = vsel %vm1455_vm8, %v1448_v53, 0.0  ;;  %v3483_v61 = vld [vmem:[%s4971_s8] ss:$0 sm:$0xff]  ;;  %s4978_s16 = sld [smem:[#allocation12_spill]]  ;;  %s5015_s8 = sand.u32 1, %s4070_s1  }
 0x2cd   : > { %1583 = vrot.lane.b32.xlu0 %v1539_v62, %s4122_s26  ;;  %s4981_s26 = sld [smem:[#allocation14_spill]] }
 0x32b   : > { %v1560_v1 = vpop.permute.xlu0 %1559 }
 0x32c   : > { %v1562_v2 = vpop.permute.xlu1 %1561 }
 0x32f   : > { %v1568_v3 = vpop.permute.xlu0 %1567 }
 0x330   : > { %v1546_v5 = vpop.permute.xlu1 %1545 }
 0x331   : > { %v1590_v8 = vsel %vm1140_vm4, %v1459_v6, %v1546_v5  ;;  %v1767_v6 = vsub.s32 1, %v4417_v11 }
 0x333   : > { %v1544_v7 = vpop.permute.xlu0 %1543 }
 0x334   : > { %v1554_v9 = vpop.permute.xlu1 %1553  ;;  %v1589_v15 = vsel %vm1140_vm4, %v1458_v14, %v1544_v7  ;;  %v1819_v14 = vsub.s32 5, %v4417_v11  ;;  %vm4972_vm4 = vcmp.lt.s32.totalorder %v4423_v13, 9 }
 0x335   : > { %v1592_v10 = vsel %vm1143_vm5, %v1590_v8, %v1554_v9  ;;  %v1781_v8 = vsub.s32 2, %v4417_v11 }
 0x336   : > { %v1594_v17 = vsel %vm1146_vm6, %v1592_v10, %v1562_v2  ;;  %v1744_v2 = vld [vmem:[%s4186_s14] sm:$0x7f]  ;;  %v1805_v10 = vsub.s32 4, %v4417_v11 }
 0x337   : > { %v1552_v16 = vpop.permute.xlu0 %1551  ;;  %v1596_v23 = vsel %vm1162_vm7, %v1594_v17, %v1570_v63 }
 0x338   : > { %v1591_v18 = vsel %vm1143_vm5, %v1589_v15, %v1552_v16  ;;  %v1586_v27 = vpop.permute.xlu1 %1585  ;;  %v1599_v28 = vsel %vm1597_vm12, %v1596_v23, %v1578_v0  ;;  %v1791_v0 = vsub.s32 3, %v4417_v11  ;;  %v1833_v23 = vsub.s32 6, %v4417_v11 }
 0x339   : > { %v1593_v20 = vsel %vm1146_vm6, %v1591_v18, %v1560_v1  ;;  %v1602_v32 = vsel %vm1600_vm9, %v1599_v28, %v1586_v27  ;;  %vm4973_vm5 = vcmp.lt.s32.totalorder %v4417_v11, 5  ;;  %vm4974_vm6 = vcmp.lt.s32.totalorder %v4433_v22, 9 }
 0x33a   : > { %v1595_v26 = vsel %vm1162_vm7, %v1593_v20, %v1568_v3  ;;  %v1753_v3 = vsub.s32 0, %v4417_v11  ;;  %v1792_v9 = vrot.slane %v1744_v2, %v1791_v0  ;;  %v1768_v20 = vrot.slane %v1744_v2, %v1767_v6 }
 0x33b   : > { %v1576_v25 = vpop.permute.xlu0 %1575 }
 0x33c   : > { %v1598_v29 = vsel %vm1597_vm12, %v1595_v26, %v1576_v25  ;;  %v1754_v16 = vrot.slane %v1744_v2, %v1753_v3  ;;  %vm4977_vm12 = vcmp.lt.s32.totalorder %v4494_v60, 9 }
 0x33f   : > { %v1584_v30 = vpop.permute.xlu0 %1583 }
 0x340   : > { %v1601_v31 = vsel %vm1600_vm9, %v1598_v29, %v1584_v30  ;;  %v1782_v29 = vrot.slane %v1744_v2, %v1781_v8  ;;  %vm4976_vm9 = vcmp.lt.s32.totalorder %v4420_v12, 9 }
 0x341   : > { %3664 = vmatprep.mubr.msk.f32.mxu1 %vm1617_vm2, %v1601_v31  ;;  %v1806_v31 = vrot.slane %v1744_v2, %v1805_v10 }
 0x342   : > { %3665 = vmatmul.mubr.msk.f32.vlgmr.msra.gmra.mrb[2].mxu1 %vm1617_vm2, %v1602_v32  ;;  %v1820_v32 = vrot.slane %v1744_v2, %v1819_v14  ;;  %vm4975_vm2 = vcmp.lt.s32.totalorder %v4485_v57, 9 }
 0x415   : > { %v3666_v34 = vpop.f32.mrb[2].mxu1 }
 0x416   : > { %v1696_v35 = vadd.f32 %v3666_v34, %v3479_v33  ;;  %v1690_v36 = vpop.f32.mrb[3].mxu1 }
 0x417   : > { %v1691_v37 = vadd.f32 %v3479_v33, %v1690_v36 }
 0x418   : > { %v1704_v38 = vsel %vm1162_vm7, %v1696_v35, 0.0 }
 0x419   : > { %1705 = vadd.xlane.f32.xlu1 %v1704_v38  ;;  %v1701_v39 = vsel %vm1162_vm7, %v1691_v37, 0.0 }
 0x41a   : > { %1702 = vadd.xlane.f32.xlu0 %v1701_v39 }
 0x4a6   : > { %v1706_v40 = vpop.xlane.xlu1 %1705 }
 0x4a7   : > { %v1709_v41 = vmul.f32 0.03125, %v1706_v40  ;;  %v1703_v42 = vpop.xlane.xlu0 %1702 }
 0x4a8   : > { %v1708_v43 = vmul.f32 0.03125, %v1703_v42 }
 0x4a9   : > { %v1711_v44 = vsub.f32 %v1696_v35, %v1709_v41 }
 0x4aa   : > { %v1710_v45 = vsub.f32 %v1691_v37, %v1708_v43 }
 0x4ab   : > { %v1713_v48 = vmul.f32 %v1711_v44, %v1711_v44 }
 0x4ac   : > { %v1712_v46 = vmul.f32 %v1710_v45, %v1710_v45 }
 0x4ad   : > { %v1717_v49 = vsel %vm1162_vm7, %v1713_v48, 0.0 }
 0x4ae   : > { %v1714_v47 = vsel %vm1162_vm7, %v1712_v46, 0.0 }
 0x4af   : > { %1715 = vadd.xlane.f32.xlu0 %v1714_v47 }
 0x4b3   : > { %1718 = vadd.xlane.f32.xlu0 %v1717_v49 }
 0x53c   : > { %v1716_v50 = vpop.xlane.xlu0 %1715 }
 0x53d   : > { %v1720_v51 = vmul.f32 0.03125, %v1716_v50 }
 0x53f   : > { %v1722_v52 = vadd.f32 1e-06, %v1720_v51 }
 0x540   : > { %v1719_v53 = vpop.xlane.xlu0 %1718 }
 0x541   : > { %3980 = vrsqrt.f32 %v1722_v52  ;;  %v1721_v54 = vmul.f32 0.03125, %v1719_v53 }
 0x543   : > { %v1723_v55 = vadd.f32 1e-06, %v1721_v54 }
 0x545   : > { %3982 = vrsqrt.f32 %v1723_v55 }
 0x54b   : > { %v3981_v56 = vpop.eup %3980 }
 0x54c   : > { %v1726_v59 = vmul.f32 %v3981_v56, %v1710_v45 }
 0x54e   : > { %v1734_v62 = vmul.f32 %v3482_v58, %v1726_v59 }
 0x54f   : > { %v3983_v63 = vpop.eup %3982 }
 0x550   : > { %v1727_v1 = vmul.f32 %v3983_v63, %v1711_v44  ;;  %v4533_v5 = vadd.f32 %v3483_v61, %v1734_v62 }
 0x552   : > { %v1735_v7 = vmul.f32 %v3482_v58, %v1727_v1  ;;  %v1745_v17 = vrot.slane %v4533_v5, 5  ;;  %v1759_v18 = vrot.slane %v4533_v5, 6  ;;  %v1773_v27 = vrot.slane %v4533_v5, 7 }
 0x553   : > { %v1793_v30 = vmul.f32 %v1792_v9, %v4533_v5  ;;  %v1811_v43 = vrot.slane %v4533_v5, 2  ;;  %v1797_v45 = vrot.slane %v4533_v5, 1  ;;  %v1825_v46 = vrot.slane %v4533_v5, 3 }
 0x554   : > { %v4541_v15 = vadd.f32 %v3483_v61, %v1735_v7  ;;  %v1834_v1 = vrot.slane %v1744_v2, %v1833_v23 }
 0x556   : > { %v1746_v25 = vrot.slane %v4541_v15, 5  ;;  %v1760_v26 = vrot.slane %v4541_v15, 6  ;;  %v1774_v28 = vrot.slane %v4541_v15, 7  ;;  %v1812_v36 = vrot.slane %v4541_v15, 2 }
 0x557   : > { %v1798_v40 = vrot.slane %v4541_v15, 1  ;;  %v1826_v44 = vrot.slane %v4541_v15, 3  ;;  %v1788_v7 = vsel %vm4976_vm9, %v4541_v15, 0.0 }
 0x558   : > { %v1748_v33 = vsel %vm1447_vm13, %v1746_v25, %v1745_v17  ;;  %v1762_v34 = vsel %vm1462_vm0, %v1760_v26, %v1759_v18  ;;  %v1776_v35 = vsel %vm1477_vm1, %v1774_v28, %v1773_v27  ;;  %v1747_v47 = vsel %vm1447_vm13, %v1745_v17, %v1746_v25 }
 0x559   : > { %v1749_v37 = vsel %vm1452_vm14, %v1748_v33, 0.0  ;;  %v1763_v38 = vsel %vm1467_vm10, %v1762_v34, 0.0  ;;  %v1777_v39 = vsel %vm1482_vm11, %v1776_v35, 0.0  ;;  %v1761_v48 = vsel %vm1462_vm0, %v1759_v18, %v1760_v26 }
 0x55a   : > { %v1755_v41 = vmul.f32 %v1754_v16, %v1749_v37  ;;  %v1769_v42 = vmul.f32 %v1768_v20, %v1763_v38  ;;  %v1783_v50 = vmul.f32 %v1782_v29, %v1777_v39  ;;  %v1813_v51 = vsel %vm1513_vm3, %v1811_v43, %v1812_v36  ;;  %v3484_v38 = vld [vmem:[%s4191_s19] ss:$0 sm:$0xff] }
 0x55b   : > { %v1750_v52 = vsel %vm1455_vm8, %v1747_v47, 0.0  ;;  %v1799_v53 = vsel %vm1498_vm15, %v1797_v45, %v1798_v40  ;;  %v1764_v55 = vsel %vm4972_vm4, %v1761_v48, 0.0  ;;  %v1775_v56 = vsel %vm1477_vm1, %v1773_v27, %v1774_v28 }
 0x55c   : > { %v1771_v49 = vadd.f32 %v1769_v42, %v1755_v41  ;;  %v1756_v54 = vmul.f32 %v1754_v16, %v1750_v52  ;;  %v1827_v59 = vsel %vm4973_vm5, %v1825_v46, %v1826_v44  ;;  %v1770_v61 = vmul.f32 %v1768_v20, %v1764_v55 }
 0x55d   : > { %v1778_v62 = vsel %vm4974_vm6, %v1775_v56, 0.0  ;;  %v1815_v63 = vsel %vm4975_vm2, %v1813_v51, 0.0  ;;  %v1807_v17 = vmul.f32 %v1806_v31, %v1799_v53  ;;  %v1829_v20 = vsel %vm4977_vm12, %v1827_v59, 0.0  ;;  %v1892_v53 = vld [vmem:[%s4963_s6] sm:$0xff]  ;;  %v1894_v56 = vld [vmem:[%s4963_s6 + $0x10] sm:$0xff] }
 0x55e   : > { %v1785_v58 = vadd.f32 %v1783_v50, %v1771_v49  ;;  %v1772_v18 = vadd.f32 %v1770_v61, %v1756_v54  ;;  %v1784_v25 = vmul.f32 %v1782_v29, %v1778_v62  ;;  %v1808_v26 = vmul.f32 0.0, %v1806_v31  ;;  %v1893_v54 = vld [vmem:[%s4963_s6 + $0x8] sm:$0xff] }
 0x55f   : > { %v1821_v28 = vmul.f32 %v1820_v32, %v1815_v63  ;;  %v1794_v34 = vmul.f32 %v1792_v9, %v1788_v7  ;;  %v1835_v36 = vmul.f32 %v1834_v1, %v1829_v20  ;;  %v1822_v37 = vmul.f32 0.0, %v1820_v32  ;;  %v3486_v20 = vld [vmem:[%s4201_s30] ss:$0 sm:$0xff] }
 0x560   : > { %v1795_v16 = vadd.f32 %v1793_v30, %v1785_v58  ;;  %v1786_v33 = vadd.f32 %v1784_v25, %v1772_v18  ;;  %v1836_v41 = vmul.f32 0.0, %v1834_v1  ;;  %v3799_v55 = vpack.c.bf16 %v1893_v54, %v1892_v53  ;;  %v1895_v58 = vld [vmem:[%s4963_s6 + $0x18] sm:$0xff]  ;;  %v3485_v18 = vld [vmem:[%s4196_s24] ss:$0 sm:$0xff] }
 0x561   : > { %v3803_v59 = vpack.c.bf16 %v1895_v58, %v1894_v56  ;;  %vm2017_vm4 = vcmask 523264   ;;  %vm4983_vm5 = vcmp.lt.s32.totalorder %v4423_v13, 9  ;;  %vm4984_vm6 = vcmp.lt.s32.totalorder %v4417_v11, 5 }
 0x562   : > { %v1809_v27 = vadd.f32 %v1807_v17, %v1795_v16  ;;  %v1796_v2 = vadd.f32 %v1794_v34, %v1786_v33  ;;  %3800 = vmatprep.subr.bf16.mxu0 %v3799_v55 }
 0x563   : > { %3802 = vmatpush3.bf16.msra.mxu0 %v3799_v55 }
 0x564   : > { %v1823_v35 = vadd.f32 %v1821_v28, %v1809_v27  ;;  %v1810_v40 = vadd.f32 %v1808_v26, %v1796_v2  ;;  %3804 = vmatprep.subr.bf16.mxu0 %v3803_v59  ;;  %v2003_v2 = vld [vmem:[%s4978_s16 + $0x8] sm:$0xff] }
 0x566   : > { %v1837_v39 = vadd.f32 %v1835_v36, %v1823_v35  ;;  %v1824_v42 = vadd.f32 %v1822_v37, %v1810_v40  ;;  %v2002_v36 = vld [vmem:[%s4978_s16] sm:$0xff]  ;;  %v2004_v37 = vld [vmem:[%s4978_s16 + $0x10] sm:$0xff] }
 0x567   : > { %3806 = vmatpush3.bf16.msra.mxu0 %v3803_v59 }
 0x568   : > { %v1846_v30 = vadd.f32 %v3484_v38, %v1837_v39  ;;  %v1838_v43 = vadd.f32 %v1836_v41, %v1824_v42  ;;  %v2005_v39 = vld [vmem:[%s4978_s16 + $0x18] sm:$0xff]  ;;  %v2006_v41 = vld [vmem:[%s4978_s16 + $0x20] sm:$0xff] }
 0x569   : > { %v3811_v40 = vpack.c.bf16 %v2005_v39, %v2004_v37 }
 0x56a   : > { %v1850_v29 = vsel %vm1162_vm7, %v1846_v30, 0.0  ;;  %v1847_v31 = vadd.f32 %v3484_v38, %v1838_v43  ;;  %v3807_v38 = vpack.c.bf16 %v2003_v2, %v2002_v36  ;;  %v2009_v43 = vld [vmem:[%s4978_s16 + $0x38] sm:$0xff] }
 0x56b   : > { %1851 = vadd.xlane.f32.xlu1 %v1850_v29  ;;  %v2008_v29 = vld [vmem:[%s4978_s16 + $0x30] sm:$0xff] }
 0x56c   : > { %v1853_v44 = vsel %vm1162_vm7, %v1847_v31, 0.0  ;;  %3808 = vmatprep.subr.bf16.mxu0 %v3807_v38 }
 0x56d   : > { %1854 = vadd.xlane.f32.xlu0 %v1853_v44  ;;  %v3487_v44 = vld [vmem:[%s4979_s15] ss:$0 sm:$0xff]  ;;  %s4982_s15 = sld [smem:[#allocation15_spill]] }
 0x573   : > { %v2110_v36 = vld [vmem:[%s4982_s15] sm:$0x7f]  ;;  %s4991_s15 = sld [smem:[#allocation17_spill]] }
 0x574   : > { %v2120_v37 = vrot.slane %v2110_v36, %v1753_v3 }
 0x5f8   : > { %v1852_v9 = vpop.xlane.xlu1 %1851 }
 0x5f9   : > { %v1856_v32 = vmul.f32 0.03125, %v1852_v9 }
 0x5fa   : > { %v1855_v46 = vpop.xlane.xlu0 %1854 }
 0x5fb   : > { %v1858_v45 = vsub.f32 %v1846_v30, %v1856_v32  ;;  %v1857_v47 = vmul.f32 0.03125, %v1855_v46  ;;  %v2007_v30 = vld [vmem:[%s4978_s16 + $0x28] sm:$0xff] }
 0x5fc   : > { %v3815_v42 = vpack.c.bf16 %v2007_v30, %v2006_v41  ;;  %v2148_v30 = vrot.slane %v2110_v36, %v1781_v8 }
 0x5fd   : > { %v1860_v48 = vmul.f32 %v1858_v45, %v1858_v45  ;;  %v1859_v49 = vsub.f32 %v1847_v31, %v1857_v47  ;;  %v3819_v31 = vpack.c.bf16 %v2009_v43, %v2008_v29 }
 0x5ff   : > { %v1862_v50 = vsel %vm1162_vm7, %v1860_v48, 0.0  ;;  %v1861_v51 = vmul.f32 %v1859_v49, %v1859_v49 }
 0x600   : > { %1863 = vadd.xlane.f32.xlu1 %v1862_v50 }
 0x601   : > { %v1865_v52 = vsel %vm1162_vm7, %v1861_v51, 0.0 }
 0x602   : > { %1866 = vadd.xlane.f32.xlu0 %v1865_v52 }
 0x68d   : > { %v1864_v61 = vpop.xlane.xlu1 %1863 }
 0x68e   : > { %v1868_v62 = vmul.f32 0.03125, %v1864_v61 }
 0x68f   : > { %v1867_v1 = vpop.xlane.xlu0 %1866 }
 0x690   : > { %v1870_v63 = vadd.f32 1e-06, %v1868_v62  ;;  %v1869_v7 = vmul.f32 0.03125, %v1867_v1 }
 0x692   : > { %3984 = vrsqrt.f32 %v1870_v63  ;;  %v1871_v16 = vadd.f32 1e-06, %v1869_v7 }
 0x694   : > { %3986 = vrsqrt.f32 %v1871_v16 }
 0x69c   : > { %v3985_v17 = vpop.eup %3984 }
 0x69d   : > { %v1874_v25 = vmul.f32 %v3985_v17, %v1858_v45  ;;  %v3490_v17 = vld [vmem:[%s4980_s10] ss:$0 sm:$0xff]  ;;  %s4988_s10 = sld [smem:[#allocation16_spill]] }
 0x69e   : > { %v3987_v27 = vpop.eup %3986 }
 0x69f   : > { %v1882_v26 = vmul.f32 %v3485_v18, %v1874_v25  ;;  %v1875_v28 = vmul.f32 %v3987_v27, %v1859_v49  ;;  %v3493_v25 = vld [vmem:[%s4981_s26] ss:$0 sm:$0xff]  ;;  %s4990_s26 = sld [smem:[#allocation19_spill]] }
 0x6a1   : > { %v1890_v33 = vadd.f32 %v3486_v20, %v1882_v26  ;;  %v1883_v34 = vmul.f32 %v3485_v18, %v1875_v28 }
 0x6a3   : > { %3675 = vmatprep.mubr.msk.f32.mxu0 %vm1162_vm7, %v1890_v33  ;;  %v1891_v35 = vadd.f32 %v3486_v20, %v1883_v34 }
 0x6a5   : > { %3676 = vmatmul.mubr.msk.f32.vlgmr.msra.gmra.mrb[4].mxu0 %vm1162_vm7, %v1891_v35 }
 0x6a6   : > { %3810 = vmatpush3.bf16.msra.mxu0 %v3807_v38 }
 0x6a7   : > { %3812 = vmatprep.subr.bf16.mxu0 %v3811_v40 }
 0x6aa   : > { %3814 = vmatpush3.bf16.msra.mxu0 %v3811_v40 }
 0x6ab   : > { %3816 = vmatprep.subr.bf16.mxu0 %v3815_v42 }
 0x6ae   : > { %3818 = vmatpush3.bf16.msra.mxu0 %v3815_v42  ;;  %v2158_v42 = vrot.slane %v2110_v36, %v1791_v0 }
 0x6af   : > { %3820 = vmatprep.subr.bf16.mxu0 %v3819_v31 }
 0x6b2   : > { %3822 = vmatpush3.bf16.msra.mxu0 %v3819_v31 }
 0x778   : > { %v3677_v9 = vpop.f32.mrb[4].mxu0 }
 0x779   : > { %v1981_v32 = vadd.f32 %v3677_v9, %v3487_v44  ;;  %v1975_v45 = vpop.f32.mrb[5].mxu0 }
 0x77a   : > { %v1976_v46 = vadd.f32 %v3487_v44, %v1975_v45 }
 0x77b   : > { %v1987_v47 = vmul.f32 0.044715, %v1981_v32  ;;  %v1985_v1 = vmul.f32 0.5, %v1981_v32 }
 0x77c   : > { %v1986_v48 = vmul.f32 0.044715, %v1976_v46  ;;  %v1984_v62 = vmul.f32 0.5, %v1976_v46 }
 0x77d   : > { %v1989_v49 = vmul.f32 %v1987_v47, %v1981_v32 }
 0x77e   : > { %v1988_v50 = vmul.f32 %v1986_v48, %v1976_v46 }
 0x77f   : > { %v1991_v51 = vmul.f32 %v1989_v49, %v1981_v32  ;;  %v2172_v49 = vrot.slane %v2110_v36, %v1805_v10 }
 0x780   : > { %v1990_v52 = vmul.f32 %v1988_v50, %v1976_v46  ;;  %v2186_v50 = vrot.slane %v2110_v36, %v1819_v14 }
 0x781   : > { %v1993_v53 = vadd.f32 %v1991_v51, %v1981_v32  ;;  %v2174_v57 = vmul.f32 0.0, %v2172_v49 }
 0x782   : > { %v1992_v54 = vadd.f32 %v1990_v52, %v1976_v46 }
 0x783   : > { %v1995_v55 = vmul.f32 0.7978846, %v1993_v53 }
 0x784   : > { %v1994_v56 = vmul.f32 0.7978846, %v1992_v54 }
 0x785   : > { %3988 = vtanh.f32 %v1995_v55 }
 0x786   : > { %3990 = vtanh.f32 %v1994_v56 }
 0x78f   : > { %v3989_v58 = vpop.eup %3988 }
 0x790   : > { %v3991_v59 = vpop.eup %3990  ;;  %v1999_v61 = vadd.f32 1.0, %v3989_v58 }
 0x791   : > { %v1998_v63 = vadd.f32 1.0, %v3991_v59 }
 0x792   : > { %v2001_v16 = vmul.f32 %v1999_v61, %v1985_v1 }
 0x793   : > { %v2000_v7 = vmul.f32 %v1998_v63, %v1984_v62 }
 0x795   : > { %3694 = vmatprep.mubr.msk.f32.mxu0 %vm2017_vm4, %v2000_v7 }
 0x796   : > { %3695 = vmatmul.mubr.msk.f32.vlgmr.msra.gmra.mrb[6].mxu0 %vm2017_vm4, %v2001_v16  ;;  %v2200_v16 = vrot.slane %v2110_v36, %v1833_v23 }
 0x869   : > { %v3696_v18 = vpop.f32.mrb[6].mxu0 }
 0x86a   : > { %v2096_v20 = vadd.f32 %v3696_v18, %v3490_v17  ;;  %v2090_v26 = vpop.f32.mrb[7].mxu0 }
 0x86b   : > { %v2091_v27 = vadd.f32 %v3490_v17, %v2090_v26 }
 0x86c   : > { %v2107_v28 = vmul.f32 %v3493_v25, %v2096_v20 }
 0x86d   : > { %v2106_v33 = vmul.f32 %v3493_v25, %v2091_v27 }
 0x86e   : > { %v4633_v34 = vadd.f32 %v2107_v28, %v4541_v15  ;;  %v2134_v15 = vrot.slane %v2110_v36, %v1767_v6 }
 0x86f   : > { %v4636_v35 = vadd.f32 %v2106_v33, %v4533_v5 }
 0x870   : > { %v2112_v2 = vrot.slane %v4633_v34, 5  ;;  %v2126_v38 = vrot.slane %v4633_v34, 6  ;;  %v2140_v39 = vrot.slane %v4633_v34, 7  ;;  %v2164_v3 = vrot.slane %v4633_v34, 1 }
 0x871   : > { %v2111_v40 = vrot.slane %v4636_v35, 5  ;;  %v2125_v41 = vrot.slane %v4636_v35, 6  ;;  %v2139_v5 = vrot.slane %v4636_v35, 7  ;;  %v2177_v29 = vrot.slane %v4636_v35, 2 }
 0x872   : > { %v2178_v44 = vrot.slane %v4633_v34, 2  ;;  %v2163_v32 = vrot.slane %v4636_v35, 1  ;;  %v2191_v47 = vrot.slane %v4636_v35, 3  ;;  %v2192_v48 = vrot.slane %v4633_v34, 3 }
 0x873   : > { %v2114_v43 = vsel %vm1447_vm13, %v2112_v2, %v2111_v40  ;;  %v2128_v31 = vsel %vm1462_vm0, %v2126_v38, %v2125_v41  ;;  %v2142_v6 = vsel %vm1477_vm1, %v2140_v39, %v2139_v5  ;;  %v2113_v51 = vsel %vm1447_vm13, %v2111_v40, %v2112_v2 }
 0x874   : > { %v2115_v8 = vsel %vm1452_vm14, %v2114_v43, 0.0  ;;  %v2129_v0 = vsel %vm1467_vm10, %v2128_v31, 0.0  ;;  %v2143_v9 = vsel %vm1482_vm11, %v2142_v6, 0.0  ;;  %v2127_v52 = vsel %vm1462_vm0, %v2125_v41, %v2126_v38  ;;  %v3494_v41 = vld [vmem:[%s4988_s10] ss:$0 sm:$0xff]  ;;  %s4992_s10 = sld [smem:[#allocation18_spill]] }
 0x875   : > { %v2121_v45 = vmul.f32 %v2120_v37, %v2115_v8  ;;  %v2135_v46 = vmul.f32 %v2134_v15, %v2129_v0  ;;  %v2149_v54 = vmul.f32 %v2148_v30, %v2143_v9  ;;  %v2179_v55 = vsel %vm1513_vm3, %v2177_v29, %v2178_v44  ;;  %vm4985_vm3 = vmmov %vm4975_vm2 }
 0x876   : > { %v2116_v56 = vsel %vm1455_vm8, %v2113_v51, 0.0  ;;  %v2159_v58 = vmul.f32 %v2158_v42, %v4636_v35  ;;  %v2165_v10 = vsel %vm1498_vm15, %v2163_v32, %v2164_v3  ;;  %v2130_v59 = vsel %vm4983_vm5, %v2127_v52, 0.0  ;;  %vm4987_vm2 = vmmov %vm4976_vm9  ;;  %v2260_v51 = vld [vmem:[%s4990_s26 + $0x10] sm:$0xff] }
 0x877   : > { %v2137_v53 = vadd.f32 %v2135_v46, %v2121_v45  ;;  %v2122_v14 = vmul.f32 %v2120_v37, %v2116_v56  ;;  %v2193_v62 = vsel %vm4984_vm6, %v2191_v47, %v2192_v48  ;;  %v2136_v63 = vmul.f32 %v2134_v15, %v2130_v59  ;;  %vm4989_vm9 = vmmov %vm4977_vm12 }
 0x878   : > { %v2141_v1 = vsel %vm1477_vm1, %v2139_v5, %v2140_v39  ;;  %v2181_v7 = vsel %vm4985_vm3, %v2179_v55, 0.0  ;;  %vm4986_vm15 = vcmp.lt.s32.totalorder %v4433_v22, 9  ;;  %v2154_v18 = vsel %vm4987_vm2, %v4633_v34, 0.0 }
 0x879   : > { %v2151_v61 = vadd.f32 %v2149_v54, %v2137_v53  ;;  %v2144_v17 = vsel %vm4986_vm15, %v2141_v1, 0.0  ;;  %v2173_v20 = vmul.f32 %v2172_v49, %v2165_v10  ;;  %v2138_v26 = vadd.f32 %v2136_v63, %v2122_v14  ;;  %v2258_v49 = vld [vmem:[%s4990_s26] sm:$0xff]  ;;  %v2261_v53 = vld [vmem:[%s4990_s26 + $0x18] sm:$0xff] }
 0x87a   : > { %v2150_v27 = vmul.f32 %v2148_v30, %v2144_v17  ;;  %v2195_v28 = vsel %vm4989_vm9, %v2193_v62, 0.0  ;;  %v2187_v2 = vmul.f32 %v2186_v50, %v2181_v7  ;;  %v2160_v23 = vmul.f32 %v2158_v42, %v2154_v18  ;;  %v3495_v62 = vld [vmem:[%s4991_s15] ss:$0 sm:$0xff]  ;;  %s4994_s15 = sld [smem:[#allocation20_spill]] }
 0x87b   : > { %v2161_v25 = vadd.f32 %v2159_v58, %v2151_v61  ;;  %v2201_v38 = vmul.f32 %v2200_v16, %v2195_v28  ;;  %v2188_v40 = vmul.f32 0.0, %v2186_v50  ;;  %v2202_v3 = vmul.f32 0.0, %v2200_v16  ;;  %v2259_v50 = vld [vmem:[%s4990_s26 + $0x8] sm:$0xff]  ;;  %v3496_v1 = vld [vmem:[%s4992_s10] ss:$0 sm:$0xff]  ;;  %v2370_v28 = vld [vmem:[%s4993_s3 + $0x10] sm:$0xff] }
 0x87c   : > { %v2152_v37 = vadd.f32 %v2150_v27, %v2138_v26  ;;  %v3823_v52 = vpack.c.bf16 %v2259_v50, %v2258_v49  ;;  %v3827_v54 = vpack.c.bf16 %v2261_v53, %v2260_v51  ;;  %v2368_v26 = vld [vmem:[%s4993_s3] sm:$0xff]  ;;  %v2369_v27 = vld [vmem:[%s4993_s3 + $0x8] sm:$0xff]  ;;  %s4995_s10 = sld [smem:[#allocation22_spill]]  ;;  %vm5002_vm12 = vcmask 1040384  }
 0x87d   : > { %v2175_v33 = vadd.f32 %v2173_v20, %v2161_v25 }
 0x87e   : > { %v2162_v39 = vadd.f32 %v2160_v23, %v2152_v37  ;;  %3824 = vmatprep.subr.bf16.mxu1 %v3823_v52  ;;  %v2372_v37 = vld [vmem:[%s4993_s3 + $0x20] sm:$0xff]  ;;  %v2373_v23 = vld [vmem:[%s4993_s3 + $0x28] sm:$0xff] }
 0x87f   : > { %v2189_v36 = vadd.f32 %v2187_v2, %v2175_v33  ;;  %3826 = vmatpush3.bf16.msra.mxu1 %v3823_v52  ;;  %v2371_v33 = vld [vmem:[%s4993_s3 + $0x18] sm:$0xff] }
 0x880   : > { %v2176_v5 = vadd.f32 %v2174_v57, %v2162_v39  ;;  %3828 = vmatprep.subr.bf16.mxu1 %v3827_v54  ;;  %v3831_v57 = vpack.c.bf16 %v2369_v27, %v2368_v26  ;;  %v3835_v2 = vpack.c.bf16 %v2371_v33, %v2370_v28  ;;  %v2375_v39 = vld [vmem:[%s4993_s3 + $0x38] sm:$0xff] }
 0x881   : > { %v2203_v15 = vadd.f32 %v2201_v38, %v2189_v36  ;;  %v3839_v36 = vpack.c.bf16 %v2373_v23, %v2372_v37  ;;  %v2374_v38 = vld [vmem:[%s4993_s3 + $0x30] sm:$0xff]  ;;  %s4996_s3 = sld [smem:[#allocation23_spill]] }
 0x882   : > { %v2190_v43 = vadd.f32 %v2188_v40, %v2176_v5  ;;  %v3843_v40 = vpack.c.bf16 %v2375_v39, %v2374_v38  ;;  %v3500_v52 = vld [vmem:[%s4995_s10] ss:$0 sm:$0xff]  ;;  %s4999_s10 = sld [smem:[#allocation24_spill]] }
 0x883   : > { %v2212_v29 = vadd.f32 %v3494_v41, %v2203_v15  ;;  %3830 = vmatpush3.bf16.msra.mxu1 %v3827_v54 }
 0x884   : > { %v2204_v31 = vadd.f32 %v2202_v3, %v2190_v43  ;;  %3832 = vmatprep.subr.bf16.mxu1 %v3831_v57 }
 0x885   : > { %v2216_v30 = vsel %vm1162_vm7, %v2212_v29, 0.0 }
 0x886   : > { %2217 = vadd.xlane.f32.xlu1 %v2216_v30  ;;  %v2213_v60 = vadd.f32 %v3494_v41, %v2204_v31  ;;  %v3497_v41 = vld [vmem:[%s4994_s15] ss:$0 sm:$0xff]  ;;  %s4997_s15 = sld [smem:[#allocation26_spill]] }
 0x887   : > { %v3503_v54 = vld [vmem:[%s4996_s3] ss:$0 sm:$0xff]  ;;  %s4998_s3 = sld [smem:[#allocation28_spill]] }
 0x888   : > { %v2219_v6 = vsel %vm1162_vm7, %v2213_v60, 0.0 }
 0x889   : > { %2220 = vadd.xlane.f32.xlu0 %v2219_v6 }
 0x88c   : > { %v2519_v27 = vld [vmem:[%s4997_s15] sm:$0xff]  ;;  %v2520_v28 = vld [vmem:[%s4997_s15 + $0x8] sm:$0xff] }
 0x88d   : > { %v3847_v33 = vpack.c.bf16 %v2520_v28, %v2519_v27  ;;  %v2611_v23 = vld [vmem:[%s4998_s3] sm:$0xff] }
 0x88f   : > { %3848 = vmatprep.subr.bf16.mxu0 %v3847_v33 }
 0x890   : > { %3850 = vmatpush3.bf16.msra.mxu0 %v3847_v33 }
 0x913   : > { %v2218_v42 = vpop.xlane.xlu1 %2217 }
 0x914   : > { %v2222_v44 = vmul.f32 0.03125, %v2218_v42 }
 0x916   : > { %v2224_v8 = vsub.f32 %v2212_v29, %v2222_v44  ;;  %v2221_v0 = vpop.xlane.xlu0 %2220 }
 0x917   : > { %v2223_v9 = vmul.f32 0.03125, %v2221_v0 }
 0x918   : > { %v2226_v32 = vmul.f32 %v2224_v8, %v2224_v8 }
 0x919   : > { %v2225_v45 = vsub.f32 %v2213_v60, %v2223_v9 }
 0x91a   : > { %v2228_v46 = vsel %vm1162_vm7, %v2226_v32, 0.0 }
 0x91b   : > { %2229 = vadd.xlane.f32.xlu1 %v2228_v46  ;;  %v2227_v47 = vmul.f32 %v2225_v45, %v2225_v45 }
 0x91d   : > { %v2231_v48 = vsel %vm1162_vm7, %v2227_v47, 0.0 }
 0x91e   : > { %2232 = vadd.xlane.f32.xlu0 %v2231_v48 }
 0x9a8   : > { %v2230_v55 = vpop.xlane.xlu1 %2229 }
 0x9a9   : > { %v2234_v56 = vmul.f32 0.03125, %v2230_v55 }
 0x9ab   : > { %v2236_v58 = vadd.f32 1e-06, %v2234_v56  ;;  %v2233_v10 = vpop.xlane.xlu0 %2232 }
 0x9ac   : > { %v2235_v14 = vmul.f32 0.03125, %v2233_v10 }
 0x9ad   : > { %3992 = vrsqrt.f32 %v2236_v58 }
 0x9ae   : > { %v2237_v59 = vadd.f32 1e-06, %v2235_v14 }
 0x9b0   : > { %3994 = vrsqrt.f32 %v2237_v59 }
 0x9b7   : > { %v3993_v61 = vpop.eup %3992 }
 0x9b8   : > { %v2240_v63 = vmul.f32 %v3993_v61, %v2224_v8 }
 0x9ba   : > { %v2248_v7 = vmul.f32 %v3495_v62, %v2240_v63  ;;  %v3995_v16 = vpop.eup %3994 }
 0x9bb   : > { %v2241_v17 = vmul.f32 %v3995_v16, %v2225_v45 }
 0x9bc   : > { %v2256_v18 = vadd.f32 %v3496_v1, %v2248_v7 }
 0x9bd   : > { %v2249_v25 = vmul.f32 %v3495_v62, %v2241_v17 }
 0x9be   : > { %3705 = vmatprep.mubr.msk.f32.mxu1 %vm1162_vm7, %v2256_v18 }
 0x9bf   : > { %v2257_v20 = vadd.f32 %v3496_v1, %v2249_v25 }
 0x9c1   : > { %3706 = vmatmul.mubr.msk.f32.vlgmr.msra.gmra.mrb[4].mxu1 %vm1162_vm7, %v2257_v20 }
 0x9c2   : > { %3834 = vmatpush3.bf16.msra.mxu1 %v3831_v57  ;;  %v2521_v57 = vld [vmem:[%s4997_s15 + $0x10] sm:$0xff] }
 0x9c3   : > { %3836 = vmatprep.subr.bf16.mxu1 %v3835_v2 }
 0x9c6   : > { %3838 = vmatpush3.bf16.msra.mxu1 %v3835_v2  ;;  %v2522_v2 = vld [vmem:[%s4997_s15 + $0x18] sm:$0xff] }
 0x9c7   : > { %3840 = vmatprep.subr.bf16.mxu1 %v3839_v36  ;;  %v3851_v37 = vpack.c.bf16 %v2522_v2, %v2521_v57 }
 0x9c9   : > { %3852 = vmatprep.subr.bf16.mxu0 %v3851_v37 }
 0x9ca   : > { %3842 = vmatpush3.bf16.msra.mxu1 %v3839_v36  ;;  %v2612_v36 = vld [vmem:[%s4998_s3 + $0x8] sm:$0xff]  ;;  %3854 = vmatpush3.bf16.msra.mxu0 %v3851_v37 }
 0x9cb   : > { %3844 = vmatprep.subr.bf16.mxu1 %v3843_v40  ;;  %v3855_v38 = vpack.c.bf16 %v2612_v36, %v2611_v23  ;;  %v4123_v23 = vmov 683565275  }
 0x9cd   : > { %3856 = vmatprep.subr.bf16.mxu0 %v3855_v38 }
 0x9ce   : > { %3846 = vmatpush3.bf16.msra.mxu1 %v3843_v40 }
 0xa94   : > { %v3707_v15 = vpop.f32.mrb[4].mxu1 }
 0xa95   : > { %v2347_v5 = vadd.f32 %v3707_v15, %v3497_v41  ;;  %v2341_v3 = vpop.f32.mrb[5].mxu1 }
 0xa96   : > { %v2342_v29 = vadd.f32 %v3497_v41, %v2341_v3 }
 0xa97   : > { %v2353_v43 = vmul.f32 0.044715, %v2347_v5  ;;  %v2351_v49 = vmul.f32 0.5, %v2347_v5 }
 0xa98   : > { %v2352_v30 = vmul.f32 0.044715, %v2342_v29  ;;  %v2350_v47 = vmul.f32 0.5, %v2342_v29 }
 0xa99   : > { %v2355_v31 = vmul.f32 %v2353_v43, %v2347_v5  ;;  %v3504_v43 = vld [vmem:[%s4999_s10] ss:$0 sm:$0xff]  ;;  %s5004_s10 = sld [smem:[#allocation27_spill]] }
 0xa9a   : > { %v2354_v60 = vmul.f32 %v2352_v30, %v2342_v29 }
 0xa9b   : > { %v2357_v6 = vmul.f32 %v2355_v31, %v2347_v5 }
 0xa9c   : > { %v2356_v42 = vmul.f32 %v2354_v60, %v2342_v29 }
 0xa9d   : > { %v2359_v44 = vadd.f32 %v2357_v6, %v2347_v5  ;;  %v3505_v6 = vld [vmem:[%s5000_s5] ss:$0 sm:$0xff]  ;;  %s5001_s5 = sld [smem:[#allocation29_spill]] }
 0xa9e   : > { %v2358_v8 = vadd.f32 %v2356_v42, %v2342_v29 }
 0xa9f   : > { %v2361_v0 = vmul.f32 0.7978846, %v2359_v44 }
 0xaa0   : > { %v2360_v9 = vmul.f32 0.7978846, %v2358_v8  ;;  %v2613_v8 = vld [vmem:[%s4998_s3 + $0x10] sm:$0xff] }
 0xaa1   : > { %3996 = vtanh.f32 %v2361_v0  ;;  %v2614_v0 = vld [vmem:[%s4998_s3 + $0x18] sm:$0xff]  ;;  %s4131_s3 = smov 112  }
 0xaa2   : > { %3998 = vtanh.f32 %v2360_v9 }
 0xaab   : > { %v3997_v32 = vpop.eup %3996 }
 0xaac   : > { %v3999_v45 = vpop.eup %3998  ;;  %v2365_v46 = vadd.f32 1.0, %v3997_v32 }
 0xaad   : > { %v2364_v48 = vadd.f32 1.0, %v3999_v45  ;;  %v3859_v45 = vpack.c.bf16 %v2614_v0, %v2613_v8  ;;  %v4128_v8 = vmov 1326507024  }
 0xaae   : > { %v2367_v51 = vmul.f32 %v2365_v46, %v2351_v49  ;;  %v3124_v46 = vld [vmem:[%s4962_s12] sm:$0xff]  ;;  %v3126_v49 = vld [vmem:[%s4962_s12 + $0x10] sm:$0x1] }
 0xaaf   : > { %v2366_v50 = vmul.f32 %v2364_v48, %v2350_v47  ;;  %v3125_v47 = vld [vmem:[%s4962_s12 + $0x8] sm:$0xff] }
 0xab0   : > { %v3863_v48 = vpack.c.bf16 %v3125_v47, %v3124_v46 }
 0xab1   : > { %3724 = vmatprep.mubr.msk.f32.mxu1 %vm2017_vm4, %v2366_v50  ;;  %v2911_v50 = vld [vmem:[%s4964_s4] sm:$0xff] }
 0xab2   : > { %3725 = vmatmul.mubr.msk.f32.vlgmr.msra.gmra.mrb[6].mxu1 %vm2017_vm4, %v2367_v51  ;;  %3864 = vmatprep.subr.bf16.mxu1 %v3863_v48  ;;  %vm5003_vm4 = vmmov %vm5002_vm12  ;;  %v2912_v51 = vld [vmem:[%s4964_s4 + $0x8] sm:$0xff] }
 0xab3   : > { %3866 = vmatpush3.bf16.msra.mxu1 %v3863_v48 }
 0xab4   : > { %3753 = vmatprep.subr.msk.mxu1 %vm5002_vm12, %v3126_v49 }
 0xab7   : > { %3754 = vmatpush3.msk.msra.mxu1 %vm5003_vm4, %v3126_v49 }
 0xb85   : > { %v3726_v53 = vpop.f32.mrb[6].mxu1 }
 0xb86   : > { %v2461_v55 = vadd.f32 %v3726_v53, %v3500_v52  ;;  %v2455_v56 = vpop.f32.mrb[7].mxu1 }
 0xb87   : > { %v2456_v58 = vadd.f32 %v3500_v52, %v2455_v56  ;;  %v4756_v52 = vpack.c.bf16 %v2912_v51, %v2911_v50 }
 0xb88   : > { %v2472_v10 = vmul.f32 %v3503_v54, %v2461_v55  ;;  %v3509_v55 = vld [vmem:[%s5001_s5] ss:$0 sm:$0xff]  ;;  %s4129_s5 = smov 120  }
 0xb89   : > { %v2471_v14 = vmul.f32 %v3503_v54, %v2456_v58  ;;  %3868 = vmatprep.subr.bf16.mxu1 %v4756_v52 }
 0xb8a   : > { %v2474_v59 = vadd.f32 %v2472_v10, %v4633_v34 }
 0xb8b   : > { %v2473_v61 = vadd.f32 %v2471_v14, %v4636_v35 }
 0xb8c   : > { %v2480_v62 = vsel %vm1162_vm7, %v2474_v59, 0.0 }
 0xb8d   : > { %2481 = vadd.xlane.f32.xlu0 %v2480_v62  ;;  %v2477_v63 = vsel %vm1162_vm7, %v2473_v61, 0.0 }
 0xb8e   : > { %2478 = vadd.xlane.f32.xlu1 %v2477_v63 }
 0xc1a   : > { %v2482_v1 = vpop.xlane.xlu0 %2481 }
 0xc1b   : > { %v2484_v7 = vmul.f32 0.03125, %v2482_v1  ;;  %v2479_v16 = vpop.xlane.xlu1 %2478 }
 0xc1c   : > { %v2483_v17 = vmul.f32 0.03125, %v2479_v16 }
 0xc1d   : > { %v2486_v18 = vsub.f32 %v2474_v59, %v2484_v7 }
 0xc1e   : > { %v2485_v25 = vsub.f32 %v2473_v61, %v2483_v17 }
 0xc1f   : > { %v2488_v34 = vmul.f32 %v2486_v18, %v2486_v18 }
 0xc20   : > { %v2487_v35 = vmul.f32 %v2485_v25, %v2485_v25 }
 0xc21   : > { %v2492_v20 = vsel %vm1162_vm7, %v2488_v34, 0.0 }
 0xc22   : > { %2493 = vadd.xlane.f32.xlu0 %v2492_v20  ;;  %v2489_v26 = vsel %vm1162_vm7, %v2487_v35, 0.0 }
 0xc23   : > { %2490 = vadd.xlane.f32.xlu1 %v2489_v26 }
 0xcaf   : > { %v2494_v39 = vpop.xlane.xlu0 %2493 }
 0xcb0   : > { %v2496_v40 = vmul.f32 0.03125, %v2494_v39  ;;  %v2491_v41 = vpop.xlane.xlu1 %2490 }
 0xcb1   : > { %v2495_v15 = vmul.f32 0.03125, %v2491_v41 }
 0xcb2   : > { %v2498_v5 = vadd.f32 1e-06, %v2496_v40  ;;  %v4124_v40 = vmov 2475754826  }
 0xcb3   : > { %v2497_v3 = vadd.f32 1e-06, %v2495_v15  ;;  %v4125_v15 = vmov 2131351028  }
 0xcb4   : > { %4000 = vrsqrt.f32 %v2498_v5 }
 0xcb5   : > { %4002 = vrsqrt.f32 %v2497_v3  ;;  %v4126_v3 = vmov 2102212464  }
 0xcbe   : > { %v4001_v29 = vpop.eup %4000 }
 0xcbf   : > { %v4003_v30 = vpop.eup %4002  ;;  %v2502_v31 = vmul.f32 %v4001_v29, %v2486_v18 }
 0xcc0   : > { %v2501_v60 = vmul.f32 %v4003_v30, %v2485_v25 }
 0xcc1   : > { %v2510_v42 = vmul.f32 %v3504_v43, %v2502_v31 }
 0xcc2   : > { %v2509_v44 = vmul.f32 %v3504_v43, %v2501_v60  ;;  %v4127_v43 = vmov 920167782  }
 0xcc3   : > { %v2518_v32 = vadd.f32 %v3505_v6, %v2510_v42 }
 0xcc4   : > { %v2517_v9 = vadd.f32 %v3505_v6, %v2509_v44 }
 0xcc6   : > { %3735 = vmatprep.mubr.msk.f32.mxu0 %vm1162_vm7, %v2517_v9 }
 0xcc7   : > { %3736 = vmatmul.mubr.msk.f32.vlgmr.msra.gmra.mrb[8].mxu0 %vm1162_vm7, %v2518_v32 }
 0xcc8   : > { %3858 = vmatpush3.bf16.msra.mxu0 %v3855_v38  ;;  %3746 = vmatprep.mubr.msk.f32.mxu0 %vm1162_vm7, %v2517_v9 }
 0xcc9   : > { %3860 = vmatprep.subr.bf16.mxu0 %v3859_v45 }
 0xccc   : > { %3862 = vmatpush3.bf16.msra.mxu0 %v3859_v45 }
 0xccf   : > { %3747 = vmatmul.mubr.msk.f32.vlgmr.msra.gmra.mrb[10].mxu0 %vm1162_vm7, %v2518_v32 }
 0xd9a   : > { %v4759_v53 = vpop.f32.mrb[8].mxu0 }
 0xd9b   : > { %v4761_v54 = vpop.f32.mrb[9].mxu0 }
 0xda2   : > { %v3748_v56 = vpop.f32.mrb[10].mxu0 }
 0xda3   : > { %v4764_v58 = vadd.f32 %v3748_v56, %v3509_v55  ;;  %v2688_v10 = vpop.f32.mrb[11].mxu0 }
 0xda4   : > { %v4766_v14 = vadd.f32 %v3509_v55, %v2688_v10 }
 0xda5   : > { %v2806_v59 = vand.u32 2147483647, %v4764_v58  ;;  %v2809_v61 = vand.u32 2139095040, %v4764_v58 }
 0xda6   : > { %v2706_v62 = vand.u32 2139095040, %v4766_v14  ;;  %v2703_v7 = vand.u32 2147483647, %v4766_v14 }
 0xda7   : > { %v2810_v63 = vshrl.u32 %v2809_v61, 23  ;;  %v2813_v1 = vand.u32 8388607, %v2806_v59 }
 0xda8   : > { %v2707_v16 = vshrl.u32 %v2706_v62, 23  ;;  %v4776_v35 = vand.u32 8388607, %v2703_v7 }
 0xda9   : > { %v3516_v17 = vadd.s32 4294967169, %v2810_v63  ;;  %v2814_v34 = vor.u32 8388608, %v2813_v1 }
 0xdaa   : > { %v3512_v18 = vadd.s32 4294967169, %v2707_v16  ;;  %v2711_v2 = vor.u32 8388608, %v4776_v35 }
 0xdab   : > { %v2816_v25 = vadd.s32 1, %v3516_v17  ;;  %v4778_v33 = vshll.u32 %v2814_v34, 8 }
 0xdac   : > { %v2713_v20 = vadd.s32 1, %v3512_v18 }
 0xdad   : > { %vm2817_vm7 = vcmp.gt.s32.totalorder %v2816_v25, 0 }
 0xdae   : > { %v2818_v26 = vsel %vm2817_vm7, %v2816_v25, 0  ;;  %vm2714_vm5 = vcmp.gt.s32.totalorder %v2713_v20, 0 }
 0xdaf   : > { %v2819_v27 = vshrl.u32 %v2818_v26, 5  ;;  %v2820_v28 = vand.u32 31, %v2818_v26  ;;  %v2715_v57 = vsel %vm2714_vm5, %v2713_v20, 0 }
 0xdb0   : > { %v4781_v38 = vshrl.u32 %v2715_v57, 5  ;;  %v2717_v39 = vand.u32 31, %v2715_v57 }
 0xdb1   : > { %v2821_v37 = vsub.s32 32, %v2820_v28  ;;  %v2823_v36 = vshll.u32 %v4123_v23, %v2820_v28  ;;  %v2826_v41 = vshll.u32 %v4124_v40, %v2820_v28  ;;  %v2829_v5 = vshll.u32 %v4125_v15, %v2820_v28 }
 0xdb2   : > { %v2832_v29 = vshll.u32 %v4126_v3, %v2820_v28  ;;  %v2835_v30 = vshll.u32 %v4127_v43, %v2820_v28  ;;  %vm2838_vm6 = vcmp.lt.s32.totalorder %v2819_v27, 1  ;;  %vm2839_vm3 = vcmp.lt.s32.totalorder %v2819_v27, 2 }
 0xdb3   : > { %v2824_v31 = vshrl.u32 %v4124_v40, %v2821_v37  ;;  %v2827_v60 = vshrl.u32 %v4125_v15, %v2821_v37  ;;  %v2830_v6 = vshrl.u32 %v4126_v3, %v2821_v37  ;;  %v2822_v42 = vshrl.u32 %v4123_v23, %v2821_v37 }
 0xdb4   : > { %v2833_v44 = vshrl.u32 %v4127_v43, %v2821_v37  ;;  %v2836_v0 = vshrl.u32 %v4128_v8, %v2821_v37  ;;  %v2718_v46 = vsub.s32 32, %v2717_v39  ;;  %vm2840_vm15 = vcmp.lt.s32.totalorder %v2819_v27, 3 }
 0xdb5   : > { %v2825_v9 = vor.u32 %v2824_v31, %v2823_v36  ;;  %v2828_v32 = vor.u32 %v2827_v60, %v2826_v41  ;;  %v2831_v45 = vor.u32 %v2830_v6, %v2829_v5  ;;  %vm2841_vm2 = vcmp.lt.s32.totalorder %v2819_v27, 4 }
 0xdb6   : > { %v2834_v47 = vor.u32 %v2833_v44, %v2832_v29  ;;  %v2837_v48 = vor.u32 %v2836_v0, %v2835_v30  ;;  %v2720_v62 = vshll.u32 %v4123_v23, %v2717_v39  ;;  %v2721_v16 = vshrl.u32 %v4124_v40, %v2718_v46 }
 0xdb7   : > { %v2842_v49 = vsel %vm2838_vm6, %v2822_v42, %v2825_v9  ;;  %v2843_v50 = vsel %vm2841_vm2, %v2831_v45, 2102212464  ;;  %v2846_v51 = vsel %vm2838_vm6, %v2825_v9, %v2828_v32  ;;  %v2850_v55 = vsel %vm2838_vm6, %v2828_v32, %v2831_v45 }
 0xdb8   : > { %v2844_v56 = vsel %vm2840_vm15, %v2828_v32, %v2843_v50  ;;  %v2847_v10 = vsel %vm2841_vm2, %v2834_v47, 920167782  ;;  %v2851_v61 = vsel %vm2841_vm2, %v2837_v48, 1326507024  ;;  %v2723_v17 = vshll.u32 %v4124_v40, %v2717_v39 }
 0xdb9   : > { %v2848_v63 = vsel %vm2840_vm15, %v2831_v45, %v2847_v10  ;;  %v2852_v1 = vsel %vm2840_vm15, %v2834_v47, %v2851_v61  ;;  %v2845_v18 = vsel %vm2839_vm3, %v2842_v49, %v2844_v56  ;;  %v2724_v35 = vshrl.u32 %v4125_v15, %v2718_v46 }
 0xdba   : > { %v2849_v25 = vsel %vm2839_vm3, %v2846_v51, %v2848_v63  ;;  %v2853_v34 = vsel %vm2839_vm3, %v2850_v55, %v2852_v1  ;;  %v2722_v37 = vor.u32 %v2721_v16, %v2720_v62  ;;  %v2726_v41 = vshll.u32 %v4125_v15, %v2717_v39 }
 0xdbb   : > { %v4790_v20 = vmul.u32.u64.low %v4778_v33, %v2853_v34  ;;  %v4791_v26 = vmul.u32.u64.high %v4778_v33, %v2853_v34, %v4790_v20  ;;  %v4794_v28 = vmul.u32.u64.low %v4778_v33, %v2849_v25  ;;  %v4795_v57 = vmul.u32.u64.high %v4778_v33, %v2849_v25, %v4794_v28 }
 0xdbc   : > { %v2725_v36 = vor.u32 %v2724_v35, %v2723_v17  ;;  %v2727_v5 = vshrl.u32 %v4126_v3, %v2718_v46  ;;  %v2729_v40 = vshll.u32 %v4126_v3, %v2717_v39  ;;  %v2730_v29 = vshrl.u32 %v4127_v43, %v2718_v46 }
 0xdbd   : > { %v2733_v30 = vshrl.u32 %v4128_v8, %v2718_v46  ;;  %v2751_v31 = vshll.u32 %v2711_v2, 8  ;;  %v2861_v27 = vmul.u32 %v4778_v33, %v2845_v18  ;;  %v2719_v60 = vshrl.u32 %v4123_v23, %v2718_v46 }
 0xdbe   : > { %v2728_v6 = vor.u32 %v2727_v5, %v2726_v41  ;;  %v2732_v42 = vshll.u32 %v4127_v43, %v2717_v39  ;;  %vm2863_vm9 = vc.u32 %v4791_v26, %v4794_v28  ;;  %v2864_v44 = vadd.s32 1, %v4795_v57 }
 0xdbf   : > { %v2731_v0 = vor.u32 %v2730_v29, %v2729_v40  ;;  %vm2735_vm12 = vcmp.lt.s32.totalorder %v4781_v38, 1  ;;  %vm2737_vm4 = vcmp.lt.s32.totalorder %v4781_v38, 3  ;;  %vm2738_vm7 = vcmp.lt.s32.totalorder %v4781_v38, 4 }
 0xdc0   : > { %v2734_v9 = vor.u32 %v2733_v30, %v2732_v42  ;;  %v2743_v15 = vsel %vm2735_vm12, %v2722_v37, %v2725_v36  ;;  %v2865_v2 = vsel %vm2863_vm9, %v2864_v44, %v4795_v57  ;;  %v2740_v3 = vsel %vm2738_vm7, %v2728_v6, 2102212464 }
 0xdc1   : > { %v2744_v33 = vsel %vm2738_vm7, %v2731_v0, 920167782  ;;  %v2747_v23 = vsel %vm2735_vm12, %v2725_v36, %v2728_v6  ;;  %v2866_v8 = vadd.s32 %v2865_v2, %v2861_v27  ;;  %vm2736_vm5 = vcmp.lt.s32.totalorder %v4781_v38, 2  ;;  %v3506_v2 = vld [vmem:[%s5004_s10] ss:$0 sm:$0xff]  ;;  %s4130_s10 = smov 104  }
 0xdc2   : > { %v2745_v39 = vsel %vm2737_vm4, %v2728_v6, %v2744_v33  ;;  %v2748_v43 = vsel %vm2738_vm7, %v2734_v9, 1326507024  ;;  %v2739_v32 = vsel %vm2735_vm12, %v2719_v60, %v2722_v37  ;;  %v2741_v45 = vsel %vm2737_vm4, %v2725_v36, %v2740_v3 }
 0xdc3   : > { %v2746_v46 = vsel %vm2736_vm5, %v2743_v15, %v2745_v39  ;;  %v2749_v47 = vsel %vm2737_vm4, %v2731_v0, %v2748_v43  ;;  %v2867_v48 = vadd.s32 536870912, %v2866_v8  ;;  %v2742_v61 = vsel %vm2736_vm5, %v2739_v32, %v2741_v45 }
 0xdc4   : > { %v2750_v49 = vsel %vm2736_vm5, %v2747_v23, %v2749_v47  ;;  %v4805_v50 = vmul.u32.u64.low %v2751_v31, %v2746_v46  ;;  %v4806_v51 = vmul.u32.u64.high %v2751_v31, %v2746_v46, %v4805_v50  ;;  %v2758_v38 = vmul.u32 %v2751_v31, %v2742_v61 }
 0xdc5   : > { %v4808_v55 = vmul.u32.u64.low %v2751_v31, %v2750_v49  ;;  %v4809_v56 = vmul.u32.u64.high %v2751_v31, %v2750_v49, %v4808_v55  ;;  %v2868_v10 = vshrl.u32 %v2867_v48, 30  ;;  %v2862_v40 = vadd.s32 %v4794_v28, %v4791_v26 }
 0xdc6   : > { %v2761_v63 = vadd.s32 1, %v4806_v51  ;;  %v2608_v28 = vadd.f32 %v4759_v53, %v3506_v2  ;;  %vm2808_vm2 = vcmp.lt.s32.totalorder %v4764_v58, 0  ;;  %vm2807_vm9 = vcmp.le.f32.partialorder %v2806_v59, 0.7853982 }
 0xdc7   : > { %v2869_v62 = vshll.u32 %v2868_v10, 30  ;;  %vm2760_vm6 = vc.u32 %v4809_v56, %v4805_v50  ;;  %v2892_v32 = vsub.s32 4, %v2868_v10  ;;  %vm2705_vm12 = vcmp.lt.s32.totalorder %v4766_v14, 0 }
 0xdc8   : > { %v2762_v16 = vsel %vm2760_vm6, %v2761_v63, %v4806_v51  ;;  %v2699_v55 = vmul.f32 1.442695, %v2608_v28  ;;  %vm2704_vm4 = vcmp.le.f32.partialorder %v2703_v7, 0.7853982 }
 0xdc9   : > { %v2870_v1 = vsub.s32 %v2866_v8, %v2869_v62  ;;  %v2763_v17 = vadd.s32 %v2762_v16, %v2758_v38  ;;  %v2759_v8 = vadd.s32 %v4805_v50, %v4809_v56  ;;  %v2893_v50 = vsel %vm2808_vm2, %v2892_v32, %v2868_v10 }
 0xdca   : > { %v2895_v53 = vsel %vm2807_vm9, 0, %v2893_v50 }
 0xdcb   : > { %v2872_v18 = vsub.s32 0, %v2870_v1  ;;  %v2764_v25 = vadd.s32 536870912, %v2763_v17 }
 0xdcd   : > { %v3517_v34 = vmin.u32 %v2872_v18, %v2870_v1  ;;  %v2765_v35 = vshrl.u32 %v2764_v25, 30  ;;  %v3111_v18 = vadd.s32 3, %v2895_v53 }
 0xdcf   : > { %v2874_v20 = vclz %v3517_v34  ;;  %v2766_v57 = vshll.u32 %v2765_v35, 30 }
 0xdd1   : > { %v3518_v37 = vadd.s32 4294967294, %v2874_v20  ;;  %v2767_v36 = vsub.s32 %v2763_v17, %v2766_v57  ;;  %v2789_v17 = vsub.s32 4, %v2765_v35  ;;  %v2899_v20 = vand.u32 3, %v2895_v53 }
 0xdd2   : > { %v3112_v57 = vand.u32 3, %v3111_v18 }
 0xdd3   : > { %vm3519_vm3 = vcmp.lt.s32.totalorder %v3518_v37, 0  ;;  %v2769_v5 = vsub.s32 0, %v2767_v36  ;;  %v2790_v34 = vsel %vm2705_vm12, %v2789_v17, %v2765_v35  ;;  %vm2901_vm5 = vcmp.eq.s32.totalorder %v2899_v20, 0 }
 0xdd4   : > { %v2877_v41 = vsel %vm3519_vm3, 0, %v3518_v37  ;;  %vm3117_vm7 = vcmp.eq.s32.totalorder %v3112_v57, 2  ;;  %vm2904_vm6 = vcmp.eq.s32.totalorder %v2899_v20, 2  ;;  %vm3114_vm3 = vcmp.eq.s32.totalorder %v3112_v57, 0 }
 0xdd5   : > { %v2878_v29 = vsub.s32 32, %v2877_v41  ;;  %v2882_v30 = vsub.s32 4294967266, %v2877_v41  ;;  %v3513_v31 = vmin.u32 %v2769_v5, %v2767_v36  ;;  %v2879_v27 = vshll.u32 %v2870_v1, %v2877_v41 }
 0xdd6   : > { %v2603_v1 = vadd.f32 %v3506_v2, %v4761_v54  ;;  %v2792_v41 = vsel %vm2704_vm4, 0, %v2790_v34 }
 0xdd7   : > { %v2880_v60 = vshrl.u32 %v2862_v40, %v2878_v29  ;;  %v2883_v6 = vadd.s32 127, %v2882_v30  ;;  %v2771_v42 = vclz %v3513_v31  ;;  %v3007_v30 = vadd.s32 3, %v2792_v41 }
 0xdd8   : > { %v2697_v59 = vmul.f32 1.442695, %v2603_v1  ;;  %v2796_v2 = vand.u32 3, %v2792_v41 }
 0xdd9   : > { %v2881_v44 = vor.u32 %v2880_v60, %v2879_v27  ;;  %v2884_v0 = vshll.u32 %v2883_v6, 23  ;;  %v3514_v9 = vadd.s32 4294967294, %v2771_v42 }
 0xddb   : > { %v2885_v15 = vor.u32 4788187, %v2884_v0  ;;  %vm3515_vm15 = vcmp.lt.s32.totalorder %v3514_v9, 0  ;;  %v2888_v33 = vcvt.s32.f32 %v2881_v44 }
 0xddc   : > { %v2774_v23 = vsel %vm3515_vm15, 0, %v3514_v9  ;;  %vm3113_vm15 = vcmp.lt.s32.totalorder %v3112_v57, 2  ;;  %v3008_v9 = vand.u32 3, %v3007_v30 }
 0xddd   : > { %v2886_v3 = vand.u32 2147483647, %v2885_v15  ;;  %v2775_v39 = vsub.s32 32, %v2774_v23  ;;  %v2779_v26 = vsub.s32 4294967266, %v2774_v23  ;;  %v2776_v45 = vshll.u32 %v2767_v36, %v2774_v23 }
 0xddf   : > { %v2889_v43 = vmul.f32 %v2888_v33, %v2886_v3  ;;  %v2777_v46 = vshrl.u32 %v2759_v8, %v2775_v39  ;;  %v2780_v47 = vadd.s32 127, %v2779_v26 }
 0xde1   : > { %v2890_v48 = vxor.u32 2147483648, %v2889_v43  ;;  %v2778_v49 = vor.u32 %v2777_v46, %v2776_v45  ;;  %v2781_v51 = vshll.u32 %v2780_v47, 23 }
 0xde3   : > { %v2891_v61 = vsel %vm2808_vm2, %v2890_v48, %v2889_v43  ;;  %v2782_v62 = vor.u32 4788187, %v2781_v51  ;;  %v2785_v38 = vcvt.s32.f32 %v2778_v49  ;;  %vm2900_vm2 = vcmp.lt.s32.totalorder %v2899_v20, 2 }
 0xde4   : > { %v2894_v56 = vsel %vm2807_vm9, %v4764_v58, %v2891_v61  ;;  %vm2898_vm9 = vweird.f32 %v4764_v58  ;;  %v2913_v61 = vld [vmem:[%s4964_s4 + $0x10] sm:$0x1] }
 0xde5   : > { %4004 = vcosq.f32 %v2894_v56  ;;  %v2783_v63 = vand.u32 2147483647, %v2782_v62 }
 0xde6   : > { %4006 = vsinq.f32 %v2894_v56 }
 0xde7   : > { %4008 = vpow2.f32 %v2699_v55  ;;  %v2786_v16 = vmul.f32 %v2785_v38, %v2783_v63 }
 0xde9   : > { %v2787_v25 = vxor.u32 2147483648, %v2786_v16 }
 0xdeb   : > { %v2788_v10 = vsel %vm2705_vm12, %v2787_v25, %v2786_v16  ;;  %vm3013_vm12 = vcmp.eq.s32.totalorder %v3008_v9, 2 }
 0xdec   : > { %v2791_v37 = vsel %vm2704_vm4, %v4766_v14, %v2788_v10  ;;  %vm2801_vm4 = vcmp.eq.s32.totalorder %v2796_v2, 2 }
 0xded   : > { %4010 = vcosq.f32 %v2791_v37 }
 0xdee   : > { %4012 = vsinq.f32 %v2791_v37  ;;  %v3345_v37 = vld [vmem:[%s4316_s20] sm:$0xff] }
 0xdef   : > { %v4005_v36 = vpop.eup %4004  ;;  %4014 = vpow2.f32 %v2697_v59  ;;  %v3347_v30 = vrot.slane %v3345_v37, 6 }
 0xdf0   : > { %v4007_v54 = vpop.eup %4006  ;;  %v2905_v5 = vxor.u32 2147483648, %v4005_v36 }
 0xdf1   : > { %v4009_v40 = vpop.eup %4008  ;;  %v2902_v29 = vxor.u32 2147483648, %v4007_v54 }
 0xdf2   : > { %v3119_v7 = vsel %vm3117_vm7, %v2905_v5, %v4007_v54  ;;  %v2906_v35 = vsel %vm2904_vm6, %v2905_v5, %v4007_v54  ;;  %v2702_v60 = vmin.f32 %v4009_v40, 100.0  ;;  %vm3010_vm7 = vcmp.eq.s32.totalorder %v3008_v9, 0 }
 0xdf3   : > { %v3116_v31 = vsel %vm3114_vm3, %v4005_v36, %v2902_v29  ;;  %v2903_v27 = vsel %vm2901_vm5, %v4005_v36, %v2902_v29  ;;  %vm2798_vm5 = vcmp.eq.s32.totalorder %v2796_v2, 0  ;;  %vm3009_vm6 = vcmp.lt.s32.totalorder %v3008_v9, 2 }
 0xdf4   : > { %v3120_v6 = vsel %vm3113_vm15, %v3116_v31, %v3119_v7  ;;  %v2907_v42 = vsel %vm2900_vm2, %v2903_v27, %v2906_v35  ;;  %vm2797_vm3 = vcmp.lt.s32.totalorder %v2796_v2, 2  ;;  %vm2795_vm15 = vweird.f32 %v4766_v14 }
 0xdf5   : > { %v3121_v44 = vsel %vm2898_vm9, nan, %v3120_v6  ;;  %v2908_v0 = vsel %vm2898_vm9, nan, %v2907_v42  ;;  %vm5005_vm2 = vcmask 138240  }
 0xdf6   : > { %v3123_v15 = vmul.f32 %v3121_v44, %v2702_v60  ;;  %v2910_v3 = vmul.f32 %v2908_v0, %v2702_v60  ;;  %vm5006_vm9 = vmmov %vm5005_vm2 }
 0xdf7   : > { %v4011_v33 = vpop.eup %4010 }
 0xdf8   : > { %v4013_v23 = vpop.eup %4012  ;;  %v2802_v8 = vxor.u32 2147483648, %v4011_v33 }
 0xdf9   : > { %v4015_v39 = vpop.eup %4014  ;;  %v2799_v26 = vxor.u32 2147483648, %v4013_v23 }
 0xdfa   : > { %v3015_v28 = vsel %vm3013_vm12, %v2802_v8, %v4013_v23  ;;  %v2803_v58 = vsel %vm2801_vm4, %v2802_v8, %v4013_v23  ;;  %v2701_v45 = vmin.f32 %v4015_v39, 100.0  ;;  %vm5007_vm12 = vmmov %vm5005_vm2  ;;  %vm5008_vm4 = vcmask 1040384  }
 0xdfb   : > { %v3012_v43 = vsel %vm3010_vm7, %v4011_v33, %v2799_v26  ;;  %v2800_v32 = vsel %vm2798_vm5, %v4011_v33, %v2799_v26  ;;  %vm5009_vm7 = vmmov %vm5008_vm4 }
 0xdfc   : > { %v3016_v46 = vsel %vm3009_vm6, %v3012_v43, %v3015_v28  ;;  %v2804_v47 = vsel %vm2797_vm3, %v2800_v32, %v2803_v58  ;;  %vm5010_vm5 = vmmov %vm5005_vm2  ;;  %vm5011_vm6 = vcmp.lt.s32.totalorder %v4420_v12, 9  ;;  %vm5012_vm3 = vcmp.lt.s32.totalorder %v4433_v22, 9 }
 0xdfd   : > { %v3017_v48 = vsel %vm2795_vm15, nan, %v3016_v46  ;;  %v2805_v49 = vsel %vm2795_vm15, nan, %v2804_v47 }
 0xdfe   : > { %v3122_v51 = vmul.f32 %v3017_v48, %v2701_v45  ;;  %v2909_v55 = vmul.f32 %v2805_v49, %v2701_v45 }
 0xe00   : > { %3755 = vmatprep.mubr.msk.f32.mxu1 %vm5005_vm2, %v3122_v51 }
 0xe01   : > { %3756 = vmatmul.mubr.msk.f32.vlgmr.msra.gmra.mrb[8].mxu1 %vm5006_vm9, %v3123_v15 }
 0xe02   : > { %3870 = vmatpush3.bf16.msra.mxu1 %v4756_v52  ;;  %3764 = vmatprep.mubr.msk.f32.mxu1 %vm5007_vm12, %v2909_v55 }
 0xe03   : > { %3762 = vmatprep.subr.msk.mxu1 %vm5008_vm4, %v2913_v61 }
 0xe06   : > { %3763 = vmatpush3.msk.msra.mxu1 %vm5009_vm7, %v2913_v61 }
 0xe09   : > { %3765 = vmatmul.mubr.msk.f32.vlgmr.msra.gmra.mrb[8].mxu1 %vm5010_vm5, %v2910_v3 }
 0xedc   : > { %v3766_v14 = vpop.f32.mrb[8].mxu1 }
 0xedd   : > { %v3296_v50 = vsel %vm5011_vm6, %v3766_v14, 0.0  ;;  %v3286_v56 = vpop.f32.mrb[9].mxu1 }
 0xede   : > { %3305 = vrot.lane.b32.xlu0 %v3296_v50, %s4129_s5  ;;  %3303 = vrot.lane.b32.xlu1 %v3286_v56, %s4129_s5  ;;  %s4929_s5 = sand.u32 1, %s4070_s1  }
 0xee2   : > { %3331 = vrot.lane.b32.xlu0 %v3286_v56, %s4130_s10  ;;  %3317 = vrot.lane.b32.xlu1 %v3286_v56, %s4131_s3 }
 0xee6   : > { %3319 = vrot.lane.b32.xlu1 %v3296_v50, %s4131_s3  ;;  %s3468_s3 = sshll.u32 %s4929_s5, 3 }
 0xee7   : > { %s1091_s5 = scalar_lea.vmem [#allocation2], %s3468_s3  ;;  %s4132_s3 = smov [#allocation2]  }
 0xee8   : > { %s3369_s4 = sshll.u32 %s1091_s5, 4  ;;  %s4020_s12 = sshll.u32 %s4132_s3, 4  ;;  %s4873_s4 = int_to_ptr.vmem [resolvable:$true] %s3369_s4  ;;  %s4021_s12 = int_to_ptr.vmem [resolvable:$false] %s4020_s12 }
 0xee9   : > { %s4016_s9 = scalar_lea.vmem %s4873_s4, 128  ;;  %s4022_s13 = scalar_lea.vmem %s4021_s12, 256 }
 0xeea   : > { %3333 = vrot.lane.b32.xlu1 %v3296_v50, %s4130_s10  ;;  %s3535_s10 = sshll.u32 %s4344_s0, 7  ;;  %s3356_s0 = scalar_lea.sflag [#allocation3], %s5015_s8 }
 0xeeb   : > { %s4871_s6 = scalar_lea.hbm %s4321_s27, %s3535_s10  ;;  %p4017_p11 = scmp.ne.s32.totalorder %s4873_s4, %s4016_s9 }
 0xeec   : > { %p4023_p0 = scmp.lt.s32.totalorder %s4873_s4, %s4021_s12  ;;  %p4024_p1 = scmp.lt.s32.totalorder %s4022_s13, %s4016_s9 }
 0xeed   : > { %p4018_p12 = pnand %p4017_p11, %p4361_p5 }
 0xeee   : > { %p4025_p2 = por %p4024_p1, %p4023_p0 }
 0xeef   : > { %p4019_p13 = pneg %p4018_p12 }
 0xef1   : > { %p4026_p3 = pnand %p4025_p2, %p4019_p13 }
 0xf50   : > { %v3306_v52 = vpop.permute.xlu0 %3305  ;;  %v3304_v62 = vpop.permute.xlu1 %3303 }
 0xf51   : > { %v3310_v53 = vrot.slane %v3306_v52, 7  ;;  %v3309_v63 = vrot.slane %v3304_v62, 7 }
 0xf53   : > { %v3311_v1 = vsel %vm1477_vm1, %v3309_v63, %v3310_v53  ;;  %v3312_v16 = vsel %vm1477_vm1, %v3310_v53, %v3309_v63  ;;  %vm5013_vm1 = vmmov %vm5011_vm6 }
 0xf54   : > { %v3318_v38 = vpop.permute.xlu1 %3317  ;;  %v3313_v59 = vsel %vm1482_vm11, %v3312_v16, 0.0  ;;  %v3314_v10 = vsel %vm5012_vm3, %v3311_v1, 0.0  ;;  %v3332_v34 = vpop.permute.xlu0 %3331  ;;  %v3298_v36 = vsel %vm5013_vm1, %v3296_v50, 0.0  ;;  %vm5014_vm11 = vcmp.lt.s32.totalorder %v4423_v13, 9 }
 0xf55   : > { %v3323_v18 = vrot.slane %v3318_v38, 6  ;;  %v3315_v54 = vadd.f32 %v3313_v59, %v3286_v56  ;;  %v3316_v5 = vadd.f32 %v3314_v10, %v3298_v36  ;;  %v3337_v40 = vrot.slane %v3332_v34, 5 }
 0xf58   : > { %v3320_v17 = vpop.permute.xlu1 %3319 }
 0xf59   : > { %v3324_v25 = vrot.slane %v3320_v17, 6 }
 0xf5b   : > { %v3325_v20 = vsel %vm1462_vm0, %v3323_v18, %v3324_v25  ;;  %v3326_v57 = vsel %vm1462_vm0, %v3324_v25, %v3323_v18  ;;  %vm3351_vm0 = vcmask 64514  }
 0xf5c   : > { %v3327_v24 = vsel %vm1467_vm10, %v3326_v57, 0.0  ;;  %v3328_v22 = vsel %vm5014_vm11, %v3325_v20, 0.0  ;;  %v3334_v41 = vpop.permute.xlu1 %3333  ;;  %vm3353_vm10 = vcmask 58368  }
 0xf5d   : > { %v3338_v29 = vrot.slane %v3334_v41, 5  ;;  %v3329_v7 = vadd.f32 %v3327_v24, %v3315_v54  ;;  %v3330_v35 = vadd.f32 %v3328_v22, %v3316_v5 }
 0xf5f   : > { %v3339_v12 = vsel %vm1447_vm13, %v3337_v40, %v3338_v29  ;;  %v3340_v31 = vsel %vm1447_vm13, %v3338_v29, %v3337_v40 }
 0xf60   : > { %v3341_v13 = vsel %vm1452_vm14, %v3340_v31, 0.0  ;;  %v3342_v21 = vsel %vm1455_vm8, %v3339_v12, 0.0 }
 0xf61   : > { %v3343_v27 = vadd.f32 %v3341_v13, %v3329_v7  ;;  %v3344_v60 = vadd.f32 %v3342_v21, %v3330_v35 }
 0xf63   : > { %v3349_v6 = vmul.f32 %v3347_v30, %v3343_v27  ;;  %v3350_v42 = vmul.f32 %v3347_v30, %v3344_v60 }
 0xf65   : > { %3352 = vst.msk [vmem:[%s1091_s5 - $0x2] sm:$0xfc] %vm3351_vm0, %v3349_v6 }
 0xf66   : > { %3354 = vst.msk [vmem:[%s1091_s5 + $0x6] sm:$0x3] %vm3353_vm10, %v3350_v42 }
 0xf67   : > { %4029 = shalt.err (!%p4026_p3)
}
 0xf68   : > { %s4030_s8 = scalar_lea.hbm %s4871_s6, 128  ;;  %s4034_s5 = scalar_lea.hbm %s4321_s27, 256 }
 0xf69   : > { %p4031_p4 = scmp.ne.s32.totalorder %s4871_s6, %s4030_s8  ;;  %p4035_p9 = scmp.lt.u32.totalorder %s4871_s6, %s4321_s27 }
 0xf6a   : > { %p4036_p10 = scmp.lt.u32.totalorder %s4034_s5, %s4030_s8  ;;  %p4038_p12 = scmp.lt.u32.totalorder %s4030_s8, %s4871_s6 }
 0xf6b   : > { %p4032_p7 = pnand %p4031_p4, %p4361_p5 }
 0xf6c   : > { %p4037_p11 = por %p4036_p10, %p4035_p9 }
 0xf6d   : > { %p4033_p8 = pneg %p4032_p7 }
 0xf6e   : > { %p4039_p0 = por %p4038_p12, %p4037_p11 }
 0xf70   : > { %p4040_p13 = pnand %p4039_p0, %p4033_p8 }
 0xf72   : > { %4043 = shalt.err (!%p4040_p13)
}
 0xf73   : > { %3881 = dma.vmem_to_hbm [thread:$0]  (%p4361_p5), %s4873_s4, 128, %s4871_s6, %s3356_s0  }
 0xf74 PF: > { %p3887_p1 = scmp.ge.s32.totalorder %s4078_s7, 2  ;;  %s3381_s9 = sand.u32 1, %s4066_s28  }
 0xf75   : > { %s3382_s13 = scalar_lea.sflag [#allocation3], %s3381_s9 }
 0xf76   : > { %p3884_p2 = pnand %p3887_p1, %p4365_p6 }
 0xf78   : > { %4061 = dma.done.wait (!%p3884_p2), %s3382_s13, 128  }
 0xf79   : > { %4063 = vsyncadd (!%p3884_p2), %s3382_s13, 4294967168  ;;  %p83_p3 = scmp.ge.s32.totalorder %s4348_s11, 4   ;;  %s5016_s28 = smov %s4070_s1 }
 0xf7a   : > { %s5017_s1 = smov %s4074_s2  ;;  %s5018_s2 = smov %s4359_s18 }
 0xf7b   : > { %s5019_s7 = smov %s4348_s11  ;;  %85 = sbr.rel (!%p83_p3) target bundleno = 80 (0x50), region = 235 }
 0xf82   :  { %3387 = vsyncpa [#allocation3], 1 }
 0xf83   :  { %3389 = vsyncpa [#allocation3 + $0x1], 1 }

</bundles_post_ra>
